<compile_context>
chip_gen: v5e
topology: v5e:2x2
jax: 0.10.0
libtpu: 0.0.40
codegen_flags: <defaults>
</compile_context>

<pallas_src>
import functools

import jax
import jax.numpy as jnp
from jax.experimental import pallas as pl
from jax.experimental.pallas import tpu as pltpu


_VMEM_LIMIT = 32 * 1024 * 1024   # fits every generation (<= v7x scoped default)

# Flip to jnp.bfloat16 to double MXU throughput and halve slab/weight vreg
# footprint at real audio lengths; f32 keeps the forward numerically faithful.
_MXU_DTYPE = jnp.float32


# ----------------------------------------------------------------------------
# BlockSpec / compiler-param helpers
# ----------------------------------------------------------------------------
def _batch_spec(shape):
    """Per-batch block: leading (squeezed) batch dim indexed by the grid."""
    n = len(shape)
    return pl.BlockSpec((None,) + tuple(shape), lambda i: (i,) + (0,) * n)


def _const_spec(shape):
    """Whole-array block, resident across the grid (weights / biases / codebook)."""
    n = len(shape)
    return pl.BlockSpec(tuple(shape), lambda i: (0,) * n)


def _cparams():
    return pltpu.CompilerParams(dimension_semantics=("parallel",),
                                vmem_limit_bytes=_VMEM_LIMIT)


def _cost_estimate(flops, args, out_bytes, transcendentals=0):
    bytes_accessed = int(out_bytes) + sum(int(a.size) * a.dtype.itemsize
                                          for a in args)
    return pl.CostEstimate(flops=int(flops), transcendentals=int(transcendentals),
                           bytes_accessed=int(bytes_accessed))


# ----------------------------------------------------------------------------
# In-kernel value-level conv helpers (im2col -> single MXU matmul)
# ----------------------------------------------------------------------------
def _im2col(x, k, pad):
    """x: (L, C) f32 -> (L + 2*pad - k + 1, k*C) slab, zero-padded in-kernel."""
    L, C = x.shape
    if pad > 0:
        z = jnp.zeros((pad, C), jnp.float32)
        x = jnp.concatenate([z, x, z], axis=0)
    l_out = L + 2 * pad - k + 1
    if k == 1:
        return x
    # TODO(synk): pad l_out up to a multiple of 8 (sublane alignment) once L is big.
    return jnp.concatenate([x[t:t + l_out, :] for t in range(k)], axis=1)


def _conv(x, w, b, *, k, pad, relu_in=False, relu_out=False):
    """Stride-1 conv on values: x (L, C), w (k*C, Cout), b (1, Cout) or None."""
    if relu_in:
        x = jnp.maximum(x, 0.0)
    slab = _im2col(x, k, pad)
    y = jnp.dot(slab.astype(_MXU_DTYPE), w.astype(_MXU_DTYPE),
                preferred_element_type=jnp.float32)
    if b is not None:
        y = y + b.astype(jnp.float32)
    if relu_out:
        y = jnp.maximum(y, 0.0)
    return y


# ----------------------------------------------------------------------------
# Kernel 1: fully fused encoder
#   conv_1+ReLU, conv_2+ReLU+skip, conv_3 (k4 stride2 p2)+ReLU,
#   conv_4+ReLU+skip, conv_5+ReLU+skip, residual stack, relu+skip, _pre_vq_conv
# ----------------------------------------------------------------------------
def _encoder_kernel(x_ref, w1_ref, b1_ref, w2_ref, b2_ref, w3_ref, b3_ref,
                    w4_ref, b4_ref, w5_ref, b5_ref, rw1_ref, rw2_ref,
                    wp_ref, bp_ref, z_ref, *, num_res, l_half):
    x = x_ref[...].astype(jnp.float32)                               # (L, Cin)
    x1 = _conv(x, w1_ref[...], b1_ref[...], k=3, pad=1, relu_out=True)
    x2 = _conv(x1, w2_ref[...], b2_ref[...], k=3, pad=1, relu_out=True) + x1
    # conv_3: k=4 stride=2 pad=2 == full stride-1 conv then even-row selection
    # matmul (keeps everything in vregs; avoids in-kernel reshape / strided slice).
    y_full = _conv(x2, w3_ref[...], b3_ref[...], k=4, pad=2)         # (L+1, H)
    rows = jax.lax.broadcasted_iota(jnp.int32, (l_half, y_full.shape[0]), 0)
    cols = jax.lax.broadcasted_iota(jnp.int32, (l_half, y_full.shape[0]), 1)
    sel = (cols == 2 * rows).astype(jnp.float32)                     # (L/2+1, L+1)
    x3 = jnp.maximum(jnp.dot(sel, y_full, preferred_element_type=jnp.float32), 0.0)
    x4 = _conv(x3, w4_ref[...], b4_ref[...], k=3, pad=1, relu_out=True) + x3
    x5 = _conv(x4, w5_ref[...], b5_ref[...], k=3, pad=1, relu_out=True) + x4
    h = x5
    for l in range(num_res):                   # Residual: x + Conv1(ReLU(Conv3(ReLU(x))))
        t = _conv(h, rw1_ref[l], None, k=3, pad=1, relu_in=True, relu_out=True)
        h = h + _conv(t, rw2_ref[l], None, k=1, pad=0)
    h = jnp.maximum(h, 0.0) + x5               # stack final ReLU + encoder skip
    z = _conv(h, wp_ref[...], bp_ref[...], k=3, pad=1)               # _pre_vq_conv
    z_ref[...] = z.astype(z_ref.dtype)


def encoder_fused(x, enc, pre_vq_w, pre_vq_b):
    B, L, Cin = x.shape
    H = enc['c1_w'].shape[2]
    Rl, _, _, Rh = enc['res_w1'].shape
    D = pre_vq_w.shape[2]
    L2 = (L + 2 * 2 - 4) // 2 + 1                                    # conv_3 output length
    args = [x,
            enc['c1_w'].reshape(3 * Cin, H), enc['c1_b'].reshape(1, H),
            enc['c2_w'].reshape(3 * H, H), enc['c2_b'].reshape(1, H),
            enc['c3_w'].reshape(4 * H, H), enc['c3_b'].reshape(1, H),
            enc['c4_w'].reshape(3 * H, H), enc['c4_b'].reshape(1, H),
            enc['c5_w'].reshape(3 * H, H), enc['c5_b'].reshape(1, H),
            enc['res_w1'].reshape(Rl, 3 * H, Rh), enc['res_w2'].reshape(Rl, Rh, H),
            pre_vq_w.reshape(3 * H, D), pre_vq_b.reshape(1, D)]
    in_specs = [_batch_spec((L, Cin))] + [_const_spec(a.shape) for a in args[1:]]
    flops = 2 * B * (L * 3 * Cin * H + L * 3 * H * H + (L + 1) * 4 * H * H
                     + L2 * (L + 1) * H
                     + L2 * (2 * 3 * H * H + Rl * (3 * H * Rh + Rh * H) + 3 * H * D))
    return pl.pallas_call(
        functools.partial(_encoder_kernel, num_res=Rl, l_half=L2),
        out_shape=jax.ShapeDtypeStruct((B, L2, D), jnp.float32),
        grid=(B,),
        in_specs=in_specs,
        out_specs=_batch_spec((L2, D)),
        compiler_params=_cparams(),
        cost_estimate=_cost_estimate(flops, args, 4 * B * L2 * D),
    )(*args)


# ----------------------------------------------------------------------------
# Kernel 2: vector quantizer (batch-parallel; per-batch partial stats so the
# grid axis can be "parallel" on v7x; loss/perplexity finalized in the wrapper)
# ----------------------------------------------------------------------------
def _vq_kernel(z_ref, e_ref, esq_ref, q_ref, counts_ref, sse_ref, *, num_embeddings):
    z = z_ref[...].astype(jnp.float32)                     # (L, D)
    e = e_ref[...].astype(jnp.float32)                     # (K, D)
    ze = jax.lax.dot_general(z, e, (((1,), (1,)), ((), ())),
                             preferred_element_type=jnp.float32)       # (L, K)
    # ||z - e_k||^2 minus the k-constant ||z||^2 term: same argmin as torch.
    score = esq_ref[...] - 2.0 * ze                        # (L, K)
    smin = jnp.min(score, axis=1, keepdims=True)
    iota = jax.lax.broadcasted_iota(jnp.int32, score.shape, 1)
    first = jnp.min(jnp.where(score <= smin, iota, num_embeddings),
                    axis=1, keepdims=True)                 # first argmin (torch semantics)
    enc = (iota == first).astype(jnp.float32)              # one-hot (L, K)
    q = jnp.dot(enc, e, preferred_element_type=jnp.float32)
    q_ref[...] = q.astype(q_ref.dtype)                     # straight-through forward value
    counts_ref[...] = jnp.sum(enc, axis=0, keepdims=True)                    # (1, K)
    sse_ref[...] = jnp.sum((q - z) ** 2, axis=(0, 1), keepdims=True)         # (1, 1)


def vector_quantize(z, embedding, commitment_cost):
    B, L, D = z.shape
    K = embedding.shape[0]
    e_sq = jnp.sum(embedding * embedding, axis=1)[None, :]    # (1, K), no MXU push
    q, counts, sse = pl.pallas_call(
        functools.partial(_vq_kernel, num_embeddings=K),
        out_shape=(jax.ShapeDtypeStruct((B, L, D), jnp.float32),
                   jax.ShapeDtypeStruct((B, 1, K), jnp.float32),
                   jax.ShapeDtypeStruct((B, 1, 1), jnp.float32)),
        grid=(B,),
        in_specs=[_batch_spec((L, D)), _const_spec((K, D)), _const_spec((1, K))],
        out_specs=(_batch_spec((L, D)), _batch_spec((1, K)), _batch_spec((1, 1))),
        compiler_params=_cparams(),
        cost_estimate=pl.CostEstimate(
            flops=int(4 * B * L * K * D), transcendentals=0,
            bytes_accessed=int(4 * (2 * B * L * D + K * D + K + B * (K + 1)))),
    )(z, embedding, e_sq)
    # Tiny finalization in the wrapper (keeps the batch axis "parallel" for v7x).
    mse = jnp.sum(sse) / float(B * L * D)                  # forward value of both MSE terms
    vq_loss = (1.0 + commitment_cost) * mse                # q_latent + commitment * e_latent
    avg = jnp.sum(counts, axis=(0, 1)) / float(B * L)      # (K,)
    perplexity = jnp.exp(-jnp.sum(avg * jnp.log(avg + 1e-10)))
    return vq_loss, q, perplexity


# ----------------------------------------------------------------------------
# Kernel 3: fully fused decoder
#   conv_1, Upsample(x2), residual stack(+ReLU), ConvT1(k3,p1)+ReLU,
#   ConvT2(k3,p0)+ReLU, ConvT3(k2,p0), crop to in_len, lane-dense NCL output.
#   (stride-1 ConvTranspose == conv with flipped taps, swapped channels, pad k-1-p)
# ----------------------------------------------------------------------------
def _decoder_kernel(q_ref, wc1_ref, bc1_ref, rw1_ref, rw2_ref,
                    wt1_ref, bt1_ref, wt2_ref, bt2_ref, wt3t_ref, bt3_ref,
                    o_ref, *, num_res, l_in):
    x = _conv(q_ref[...].astype(jnp.float32), wc1_ref[...], bc1_ref[...],
              k=3, pad=1)                                             # (L2, H)
    # nn.Upsample(scale_factor=2, nearest): out[r] = in[r // 2] via one-hot matmul.
    l2 = x.shape[0]
    lu = 2 * l2
    rows = jax.lax.broadcasted_iota(jnp.int32, (lu, l2), 0)
    cols = jax.lax.broadcasted_iota(jnp.int32, (lu, l2), 1)
    up = jnp.logical_or(rows == 2 * cols, rows == 2 * cols + 1).astype(jnp.float32)
    x = jnp.dot(up, x, preferred_element_type=jnp.float32)            # (Lu, H)
    for l in range(num_res):
        t = _conv(x, rw1_ref[l], None, k=3, pad=1, relu_in=True, relu_out=True)
        x = x + _conv(t, rw2_ref[l], None, k=1, pad=0)
    x = jnp.maximum(x, 0.0)                                           # stack final ReLU
    x = _conv(x, wt1_ref[...], bt1_ref[...], k=3, pad=1, relu_out=True)   # ConvT1 + ReLU
    x = _conv(x, wt2_ref[...], bt2_ref[...], k=3, pad=2, relu_out=True)   # ConvT2 + ReLU (Lu+2)
    # ConvT3 (k2 -> conv pad 1, Lu+3) computed transposed so the store is the
    # final NCL layout (length on lanes) and the wrapper transpose disappears.
    slab = _im2col(x, 2, 1)                                           # (Lu+3, 2H)
    yT = jax.lax.dot_general(wt3t_ref[...].astype(_MXU_DTYPE),
                             slab.astype(_MXU_DTYPE),
                             (((1,), (1,)), ((), ())),
                             preferred_element_type=jnp.float32)      # (Cout, Lu+3)
    yT = yT + bt3_ref[...].astype(jnp.float32)
    o_ref[...] = yT[:, :l_in].astype(o_ref.dtype)                     # in-kernel crop


def decoder_fused(q, dec, *, l_in, cout):
    B, L2, D = q.shape
    H = dec['c1_w'].shape[2]
    Rl, _, _, Rh = dec['res_w1'].shape
    Lu = 2 * L2
    L_rec = Lu + 3                                   # (k3,p1)->Lu, (k3,p2)->Lu+2, (k2,p1)->Lu+3
    assert L_rec >= l_in, (L_rec, l_in)
    args = [q,
            dec['c1_w'].reshape(3 * D, H), dec['c1_b'].reshape(1, H),
            dec['res_w1'].reshape(Rl, 3 * H, Rh), dec['res_w2'].reshape(Rl, Rh, H),
            dec['ct1_w'].reshape(3 * H, H), dec['ct1_b'].reshape(1, H),
            dec['ct2_w'].reshape(3 * H, H), dec['ct2_b'].reshape(1, H),
            jnp.transpose(dec['ct3_w'].reshape(2 * H, cout)),          # (Cout, 2H)
            dec['ct3_b'].reshape(cout, 1)]
    in_specs = [_batch_spec((L2, D))] + [_const_spec(a.shape) for a in args[1:]]
    flops = 2 * B * (L2 * 3 * D * H + Lu * L2
                     + Lu * Rl * (3 * H * Rh + Rh * H)
                     + Lu * 3 * H * H + (Lu + 2) * 3 * H * H
                     + L_rec * 2 * H * cout)
    return pl.pallas_call(
        functools.partial(_decoder_kernel, num_res=Rl, l_in=l_in),
        out_shape=jax.ShapeDtypeStruct((B, cout, l_in), jnp.float32),
        grid=(B,),
        in_specs=in_specs,
        out_specs=_batch_spec((cout, l_in)),
        compiler_params=_cparams(),
        cost_estimate=_cost_estimate(flops, args, 4 * B * cout * l_in),
    )(*args)


# ----------------------------------------------------------------------------
# Full forward
# ----------------------------------------------------------------------------
def convolutional_vq_vae_forward(params, x_ncl, *, commitment_cost, output_features_dim):
    """x_ncl: (B, Cin, L), same axis convention as the PyTorch module."""
    x = jnp.transpose(x_ncl, (0, 2, 1))                   # -> (B, L, Cin) channels-last
    z = encoder_fused(x, params['enc'], params['pre_vq_w'], params['pre_vq_b'])
    vq_loss, quantized, perplexity = vector_quantize(z, params['vq_emb'], commitment_cost)
    # TODO(synk): Jitter layer and speaker conditioning are train-only / disabled in config.
    in_len = x_ncl.shape[2]
    rec_ncl = decoder_fused(quantized, params['dec'],
                            l_in=in_len, cout=output_features_dim)    # already (B, C, L_in)
    return rec_ncl, vq_loss, perplexity


# ----------------------------------------------------------------------------
# Deterministic parameter construction (synthetic, arrays only -- no Python
# scalars in the pytree so nothing structural gets traced under jit)
# ----------------------------------------------------------------------------
def init_params(key, cfg):
    Cin = cfg['input_features_dim']
    H = cfg['num_hiddens']
    Rh = cfg['num_residual_hiddens']
    D = cfg['embedding_dim']
    K = cfg['num_embeddings']
    Rl = cfg['num_residual_layers']
    keys = iter(jax.random.split(key, 64))

    def conv_w(cout, cin, k):
        # PyTorch Conv1d weight (Cout, Cin, k) -> kernel layout (k, Cin, Cout)
        w = 0.1 * jax.random.normal(next(keys), (cout, cin, k), jnp.float32)
        return jnp.transpose(w, (2, 1, 0))

    def convT_w(cin, cout, k):
        # PyTorch ConvTranspose1d weight (Cin, Cout, k); stride-1 transposed conv ==
        # regular conv with flipped taps, swapped channels, padding k-1-p (p is
        # applied statically inside the decoder kernel).
        w = 0.1 * jax.random.normal(next(keys), (cin, cout, k), jnp.float32)
        return jnp.flip(jnp.transpose(w, (2, 0, 1)), axis=0)

    def bias(c):
        return 0.05 * jax.random.normal(next(keys), (c,), jnp.float32)

    def res_w():
        w1 = jnp.stack([conv_w(Rh, H, 3) for _ in range(Rl)])   # (Rl, 3, H, Rh), no bias
        w2 = jnp.stack([conv_w(H, Rh, 1) for _ in range(Rl)])   # (Rl, 1, Rh, H), no bias
        return w1, w2

    enc_r1, enc_r2 = res_w()
    dec_r1, dec_r2 = res_w()
    return {
        'enc': {
            'c1_w': conv_w(H, Cin, 3), 'c1_b': bias(H),
            'c2_w': conv_w(H, H, 3), 'c2_b': bias(H),
            'c3_w': conv_w(H, H, 4), 'c3_b': bias(H),
            'c4_w': conv_w(H, H, 3), 'c4_b': bias(H),
            'c5_w': conv_w(H, H, 3), 'c5_b': bias(H),
            'res_w1': enc_r1, 'res_w2': enc_r2,
        },
        'pre_vq_w': conv_w(D, H, 3), 'pre_vq_b': bias(D),
        'vq_emb': jax.random.uniform(next(keys), (K, D), jnp.float32,
                                     minval=-1.0 / K, maxval=1.0 / K),
        'dec': {
            'c1_w': conv_w(H, D, 3), 'c1_b': bias(H),
            'res_w1': dec_r1, 'res_w2': dec_r2,
            'ct1_w': convT_w(H, H, 3), 'ct1_b': bias(H),      # ConvT k3 p1 -> conv pad 1
            'ct2_w': convT_w(H, H, 3), 'ct2_b': bias(H),      # ConvT k3 p0 -> conv pad 2
            'ct3_w': convT_w(H, Cin, 2), 'ct3_b': bias(Cin),  # ConvT k2 p0 -> conv pad 1
        },
    }


if __name__ == "__main__":
    configuration = {
        'input_features_dim': 4,
        'output_features_dim': 4,
        'num_hiddens': 32,
        'num_residual_layers': 2,
        'num_residual_hiddens': 16,
        'embedding_dim': 16,
        'num_embeddings': 32,
        'commitment_cost': 0.25,
        'use_jitter': False,
        'jitter_probability': 0.12,
        'use_speaker_conditioning': False,
        'sampling_rate': 16000,
    }
    key = jax.random.PRNGKey(0)
    pkey, xkey = jax.random.split(key)
    params = init_params(pkey, configuration)

    # x: (batch=2, input_features_dim=4, length=16), PyTorch NCL convention.
    x = jax.random.normal(xkey, (2, configuration['input_features_dim'], 16), jnp.float32)

    fwd = jax.jit(functools.partial(
        convolutional_vq_vae_forward,
        commitment_cost=configuration['commitment_cost'],
        output_features_dim=configuration['output_features_dim']))

    rec, vq_loss, perplexity = fwd(params, x)
    jax.block_until_ready((rec, vq_loss, perplexity))
    assert rec.shape == x.shape, rec.shape
    assert vq_loss.shape == () and perplexity.shape == ()
    print("KERNEL_OK")
</pallas_src>

<mosaic_0001>
module attributes {stable_mosaic.version = 11 : i64} {
  func.func @_encoder_kernel(%arg0: i32, %arg1: memref<1x16x4xf32, #tpu.memory_space<vmem>>, %arg2: memref<12x32xf32, #tpu.memory_space<vmem>>, %arg3: memref<1x32xf32, #tpu.memory_space<vmem>>, %arg4: memref<96x32xf32, #tpu.memory_space<vmem>>, %arg5: memref<1x32xf32, #tpu.memory_space<vmem>>, %arg6: memref<128x32xf32, #tpu.memory_space<vmem>>, %arg7: memref<1x32xf32, #tpu.memory_space<vmem>>, %arg8: memref<96x32xf32, #tpu.memory_space<vmem>>, %arg9: memref<1x32xf32, #tpu.memory_space<vmem>>, %arg10: memref<96x32xf32, #tpu.memory_space<vmem>>, %arg11: memref<1x32xf32, #tpu.memory_space<vmem>>, %arg12: memref<2x96x16xf32, #tpu.memory_space<vmem>>, %arg13: memref<2x16x32xf32, #tpu.memory_space<vmem>>, %arg14: memref<96x16xf32, #tpu.memory_space<vmem>>, %arg15: memref<1x16xf32, #tpu.memory_space<vmem>>, %arg16: memref<1x9x16xf32, #tpu.memory_space<vmem>>) attributes {dimension_semantics = [#tpu.dimension_semantics<parallel>], iteration_bounds = array<i64: 2>, scalar_prefetch = 0 : i64, scratch_operands = 0 : i64, tpu.core_type = #tpu.core_type<tc>, window_params = [{transform_indices = @transform_0, window_bounds = array<i64: 1, 16, 4>}, {pipeline_mode = #tpu.pipeline_mode<synchronous>, transform_indices = @transform_1, window_bounds = array<i64: 12, 32>}, {pipeline_mode = #tpu.pipeline_mode<synchronous>, transform_indices = @transform_2, window_bounds = array<i64: 1, 32>}, {pipeline_mode = #tpu.pipeline_mode<synchronous>, transform_indices = @transform_3, window_bounds = array<i64: 96, 32>}, {pipeline_mode = #tpu.pipeline_mode<synchronous>, transform_indices = @transform_4, window_bounds = array<i64: 1, 32>}, {pipeline_mode = #tpu.pipeline_mode<synchronous>, transform_indices = @transform_5, window_bounds = array<i64: 128, 32>}, {pipeline_mode = #tpu.pipeline_mode<synchronous>, transform_indices = @transform_6, window_bounds = array<i64: 1, 32>}, {pipeline_mode = #tpu.pipeline_mode<synchronous>, transform_indices = @transform_7, window_bounds = array<i64: 96, 32>}, {pipeline_mode = #tpu.pipeline_mode<synchronous>, transform_indices = @transform_8, window_bounds = array<i64: 1, 32>}, {pipeline_mode = #tpu.pipeline_mode<synchronous>, transform_indices = @transform_9, window_bounds = array<i64: 96, 32>}, {pipeline_mode = #tpu.pipeline_mode<synchronous>, transform_indices = @transform_10, window_bounds = array<i64: 1, 32>}, {pipeline_mode = #tpu.pipeline_mode<synchronous>, transform_indices = @transform_11, window_bounds = array<i64: 2, 96, 16>}, {pipeline_mode = #tpu.pipeline_mode<synchronous>, transform_indices = @transform_12, window_bounds = array<i64: 2, 16, 32>}, {pipeline_mode = #tpu.pipeline_mode<synchronous>, transform_indices = @transform_13, window_bounds = array<i64: 96, 16>}, {pipeline_mode = #tpu.pipeline_mode<synchronous>, transform_indices = @transform_14, window_bounds = array<i64: 1, 16>}, {transform_indices = @transform_15, window_bounds = array<i64: 1, 9, 16>}]} {
    %c0 = arith.constant 0 : index
    %c0_0 = arith.constant 0 : index
    %c0_1 = arith.constant 0 : index
    %0 = vector.load %arg1[%c0, %c0_0, %c0_1] : memref<1x16x4xf32, #tpu.memory_space<vmem>>, vector<1x16x4xf32>
    %1 = vector.shape_cast %0 : vector<1x16x4xf32> to vector<16x4xf32>
    %c0_2 = arith.constant 0 : index
    %c0_3 = arith.constant 0 : index
    %2 = vector.load %arg2[%c0_2, %c0_3] : memref<12x32xf32, #tpu.memory_space<vmem>>, vector<12x32xf32>
    %c0_4 = arith.constant 0 : index
    %c0_5 = arith.constant 0 : index
    %3 = vector.load %arg3[%c0_4, %c0_5] : memref<1x32xf32, #tpu.memory_space<vmem>>, vector<1x32xf32>
    %cst = arith.constant 0.000000e+00 : f32
    %4 = vector.broadcast %cst : f32 to vector<1x4xf32>
    %5 = tpu.concatenate %4, %1, %4 in 0 : vector<1x4xf32>, vector<16x4xf32>, vector<1x4xf32> -> vector<18x4xf32>
    %6 = vector.extract_strided_slice %5 {offsets = [0, 0], sizes = [16, 4], strides = [1, 1]} : vector<18x4xf32> to vector<16x4xf32>
    %7 = vector.extract_strided_slice %5 {offsets = [1, 0], sizes = [16, 4], strides = [1, 1]} : vector<18x4xf32> to vector<16x4xf32>
    %8 = vector.extract_strided_slice %5 {offsets = [2, 0], sizes = [16, 4], strides = [1, 1]} : vector<18x4xf32> to vector<16x4xf32>
    %9 = tpu.concatenate %6, %7, %8 in 1 : vector<16x4xf32>, vector<16x4xf32>, vector<16x4xf32> -> vector<16x12xf32>
    %cst_6 = arith.constant dense<0.000000e+00> : vector<16x32xf32>
    %10 = tpu.matmul %9, %2, %cst_6 {dimension_numbers = #tpu.dot_dimension_numbers<[1], [0], [0], [1], [0, 0, 1, 1], [], []>} : vector<16x12xf32>, vector<12x32xf32>, vector<16x32xf32> -> vector<16x32xf32>
    %11 = vector.broadcast %3 : vector<1x32xf32> to vector<16x32xf32>
    %12 = arith.addf %10, %11 : vector<16x32xf32>
    %cst_7 = arith.constant 0.000000e+00 : f32
    %13 = vector.broadcast %cst_7 : f32 to vector<16x32xf32>
    %14 = arith.maximumf %12, %13 : vector<16x32xf32>
    %c0_8 = arith.constant 0 : index
    %c0_9 = arith.constant 0 : index
    %15 = vector.load %arg4[%c0_8, %c0_9] : memref<96x32xf32, #tpu.memory_space<vmem>>, vector<96x32xf32>
    %c0_10 = arith.constant 0 : index
    %c0_11 = arith.constant 0 : index
    %16 = vector.load %arg5[%c0_10, %c0_11] : memref<1x32xf32, #tpu.memory_space<vmem>>, vector<1x32xf32>
    %cst_12 = arith.constant 0.000000e+00 : f32
    %17 = vector.broadcast %cst_12 : f32 to vector<1x32xf32>
    %18 = tpu.concatenate %17, %14, %17 in 0 : vector<1x32xf32>, vector<16x32xf32>, vector<1x32xf32> -> vector<18x32xf32>
    %19 = vector.extract_strided_slice %18 {offsets = [0, 0], sizes = [16, 32], strides = [1, 1]} : vector<18x32xf32> to vector<16x32xf32>
    %20 = vector.extract_strided_slice %18 {offsets = [1, 0], sizes = [16, 32], strides = [1, 1]} : vector<18x32xf32> to vector<16x32xf32>
    %21 = vector.extract_strided_slice %18 {offsets = [2, 0], sizes = [16, 32], strides = [1, 1]} : vector<18x32xf32> to vector<16x32xf32>
    %22 = tpu.concatenate %19, %20, %21 in 1 : vector<16x32xf32>, vector<16x32xf32>, vector<16x32xf32> -> vector<16x96xf32>
    %cst_13 = arith.constant dense<0.000000e+00> : vector<16x32xf32>
    %23 = tpu.matmul %22, %15, %cst_13 {dimension_numbers = #tpu.dot_dimension_numbers<[1], [0], [0], [1], [0, 0, 1, 1], [], []>} : vector<16x96xf32>, vector<96x32xf32>, vector<16x32xf32> -> vector<16x32xf32>
    %24 = vector.broadcast %16 : vector<1x32xf32> to vector<16x32xf32>
    %25 = arith.addf %23, %24 : vector<16x32xf32>
    %cst_14 = arith.constant 0.000000e+00 : f32
    %26 = vector.broadcast %cst_14 : f32 to vector<16x32xf32>
    %27 = arith.maximumf %25, %26 : vector<16x32xf32>
    %28 = arith.addf %27, %14 : vector<16x32xf32>
    %c0_15 = arith.constant 0 : index
    %c0_16 = arith.constant 0 : index
    %29 = vector.load %arg6[%c0_15, %c0_16] : memref<128x32xf32, #tpu.memory_space<vmem>>, vector<128x32xf32>
    %c0_17 = arith.constant 0 : index
    %c0_18 = arith.constant 0 : index
    %30 = vector.load %arg7[%c0_17, %c0_18] : memref<1x32xf32, #tpu.memory_space<vmem>>, vector<1x32xf32>
    %cst_19 = arith.constant 0.000000e+00 : f32
    %31 = vector.broadcast %cst_19 : f32 to vector<2x32xf32>
    %32 = tpu.concatenate %31, %28, %31 in 0 : vector<2x32xf32>, vector<16x32xf32>, vector<2x32xf32> -> vector<20x32xf32>
    %33 = vector.extract_strided_slice %32 {offsets = [0, 0], sizes = [17, 32], strides = [1, 1]} : vector<20x32xf32> to vector<17x32xf32>
    %34 = vector.extract_strided_slice %32 {offsets = [1, 0], sizes = [17, 32], strides = [1, 1]} : vector<20x32xf32> to vector<17x32xf32>
    %35 = vector.extract_strided_slice %32 {offsets = [2, 0], sizes = [17, 32], strides = [1, 1]} : vector<20x32xf32> to vector<17x32xf32>
    %36 = vector.extract_strided_slice %32 {offsets = [3, 0], sizes = [17, 32], strides = [1, 1]} : vector<20x32xf32> to vector<17x32xf32>
    %37 = tpu.concatenate %33, %34, %35, %36 in 1 : vector<17x32xf32>, vector<17x32xf32>, vector<17x32xf32>, vector<17x32xf32> -> vector<17x128xf32>
    %cst_20 = arith.constant dense<0.000000e+00> : vector<17x32xf32>
    %38 = tpu.matmul %37, %29, %cst_20 {dimension_numbers = #tpu.dot_dimension_numbers<[1], [0], [0], [1], [0, 0, 1, 1], [], []>} : vector<17x128xf32>, vector<128x32xf32>, vector<17x32xf32> -> vector<17x32xf32>
    %39 = vector.broadcast %30 : vector<1x32xf32> to vector<17x32xf32>
    %40 = arith.addf %38, %39 : vector<17x32xf32>
    %41 = tpu.iota {dimensions = array<i32: 0>} : vector<9x17xi32>
    %42 = tpu.iota {dimensions = array<i32: 1>} : vector<9x17xi32>
    %c2_i32 = arith.constant 2 : i32
    %43 = vector.broadcast %c2_i32 : i32 to vector<9x17xi32>
    %44 = arith.muli %43, %41 : vector<9x17xi32>
    %45 = arith.cmpi eq, %42, %44 : vector<9x17xi32>
    %46 = arith.extui %45 : vector<9x17xi1> to vector<9x17xi32>
    %47 = arith.sitofp %46 : vector<9x17xi32> to vector<9x17xf32>
    %cst_21 = arith.constant dense<0.000000e+00> : vector<9x32xf32>
    %48 = tpu.matmul %47, %40, %cst_21 {dimension_numbers = #tpu.dot_dimension_numbers<[1], [0], [0], [1], [0, 0, 1, 1], [], []>} : vector<9x17xf32>, vector<17x32xf32>, vector<9x32xf32> -> vector<9x32xf32>
    %cst_22 = arith.constant 0.000000e+00 : f32
    %49 = vector.broadcast %cst_22 : f32 to vector<9x32xf32>
    %50 = arith.maximumf %48, %49 : vector<9x32xf32>
    %c0_23 = arith.constant 0 : index
    %c0_24 = arith.constant 0 : index
    %51 = vector.load %arg8[%c0_23, %c0_24] : memref<96x32xf32, #tpu.memory_space<vmem>>, vector<96x32xf32>
    %c0_25 = arith.constant 0 : index
    %c0_26 = arith.constant 0 : index
    %52 = vector.load %arg9[%c0_25, %c0_26] : memref<1x32xf32, #tpu.memory_space<vmem>>, vector<1x32xf32>
    %cst_27 = arith.constant 0.000000e+00 : f32
    %53 = vector.broadcast %cst_27 : f32 to vector<1x32xf32>
    %54 = tpu.concatenate %53, %50, %53 in 0 : vector<1x32xf32>, vector<9x32xf32>, vector<1x32xf32> -> vector<11x32xf32>
    %55 = vector.extract_strided_slice %54 {offsets = [0, 0], sizes = [9, 32], strides = [1, 1]} : vector<11x32xf32> to vector<9x32xf32>
    %56 = vector.extract_strided_slice %54 {offsets = [1, 0], sizes = [9, 32], strides = [1, 1]} : vector<11x32xf32> to vector<9x32xf32>
    %57 = vector.extract_strided_slice %54 {offsets = [2, 0], sizes = [9, 32], strides = [1, 1]} : vector<11x32xf32> to vector<9x32xf32>
    %58 = tpu.concatenate %55, %56, %57 in 1 : vector<9x32xf32>, vector<9x32xf32>, vector<9x32xf32> -> vector<9x96xf32>
    %cst_28 = arith.constant dense<0.000000e+00> : vector<9x32xf32>
    %59 = tpu.matmul %58, %51, %cst_28 {dimension_numbers = #tpu.dot_dimension_numbers<[1], [0], [0], [1], [0, 0, 1, 1], [], []>} : vector<9x96xf32>, vector<96x32xf32>, vector<9x32xf32> -> vector<9x32xf32>
    %60 = vector.broadcast %52 : vector<1x32xf32> to vector<9x32xf32>
    %61 = arith.addf %59, %60 : vector<9x32xf32>
    %cst_29 = arith.constant 0.000000e+00 : f32
    %62 = vector.broadcast %cst_29 : f32 to vector<9x32xf32>
    %63 = arith.maximumf %61, %62 : vector<9x32xf32>
    %64 = arith.addf %63, %50 : vector<9x32xf32>
    %c0_30 = arith.constant 0 : index
    %c0_31 = arith.constant 0 : index
    %65 = vector.load %arg10[%c0_30, %c0_31] : memref<96x32xf32, #tpu.memory_space<vmem>>, vector<96x32xf32>
    %c0_32 = arith.constant 0 : index
    %c0_33 = arith.constant 0 : index
    %66 = vector.load %arg11[%c0_32, %c0_33] : memref<1x32xf32, #tpu.memory_space<vmem>>, vector<1x32xf32>
    %cst_34 = arith.constant 0.000000e+00 : f32
    %67 = vector.broadcast %cst_34 : f32 to vector<1x32xf32>
    %68 = tpu.concatenate %67, %64, %67 in 0 : vector<1x32xf32>, vector<9x32xf32>, vector<1x32xf32> -> vector<11x32xf32>
    %69 = vector.extract_strided_slice %68 {offsets = [0, 0], sizes = [9, 32], strides = [1, 1]} : vector<11x32xf32> to vector<9x32xf32>
    %70 = vector.extract_strided_slice %68 {offsets = [1, 0], sizes = [9, 32], strides = [1, 1]} : vector<11x32xf32> to vector<9x32xf32>
    %71 = vector.extract_strided_slice %68 {offsets = [2, 0], sizes = [9, 32], strides = [1, 1]} : vector<11x32xf32> to vector<9x32xf32>
    %72 = tpu.concatenate %69, %70, %71 in 1 : vector<9x32xf32>, vector<9x32xf32>, vector<9x32xf32> -> vector<9x96xf32>
    %cst_35 = arith.constant dense<0.000000e+00> : vector<9x32xf32>
    %73 = tpu.matmul %72, %65, %cst_35 {dimension_numbers = #tpu.dot_dimension_numbers<[1], [0], [0], [1], [0, 0, 1, 1], [], []>} : vector<9x96xf32>, vector<96x32xf32>, vector<9x32xf32> -> vector<9x32xf32>
    %74 = vector.broadcast %66 : vector<1x32xf32> to vector<9x32xf32>
    %75 = arith.addf %73, %74 : vector<9x32xf32>
    %cst_36 = arith.constant 0.000000e+00 : f32
    %76 = vector.broadcast %cst_36 : f32 to vector<9x32xf32>
    %77 = arith.maximumf %75, %76 : vector<9x32xf32>
    %78 = arith.addf %77, %64 : vector<9x32xf32>
    %c0_37 = arith.constant 0 : index
    %c0_38 = arith.constant 0 : index
    %c0_39 = arith.constant 0 : index
    %79 = vector.load %arg12[%c0_37, %c0_38, %c0_39] : memref<2x96x16xf32, #tpu.memory_space<vmem>>, vector<1x96x16xf32>
    %80 = vector.shape_cast %79 : vector<1x96x16xf32> to vector<96x16xf32>
    %cst_40 = arith.constant 0.000000e+00 : f32
    %81 = vector.broadcast %cst_40 : f32 to vector<9x32xf32>
    %82 = arith.maximumf %78, %81 : vector<9x32xf32>
    %cst_41 = arith.constant 0.000000e+00 : f32
    %83 = vector.broadcast %cst_41 : f32 to vector<1x32xf32>
    %84 = tpu.concatenate %83, %82, %83 in 0 : vector<1x32xf32>, vector<9x32xf32>, vector<1x32xf32> -> vector<11x32xf32>
    %85 = vector.extract_strided_slice %84 {offsets = [0, 0], sizes = [9, 32], strides = [1, 1]} : vector<11x32xf32> to vector<9x32xf32>
    %86 = vector.extract_strided_slice %84 {offsets = [1, 0], sizes = [9, 32], strides = [1, 1]} : vector<11x32xf32> to vector<9x32xf32>
    %87 = vector.extract_strided_slice %84 {offsets = [2, 0], sizes = [9, 32], strides = [1, 1]} : vector<11x32xf32> to vector<9x32xf32>
    %88 = tpu.concatenate %85, %86, %87 in 1 : vector<9x32xf32>, vector<9x32xf32>, vector<9x32xf32> -> vector<9x96xf32>
    %cst_42 = arith.constant dense<0.000000e+00> : vector<9x16xf32>
    %89 = tpu.matmul %88, %80, %cst_42 {dimension_numbers = #tpu.dot_dimension_numbers<[1], [0], [0], [1], [0, 0, 1, 1], [], []>} : vector<9x96xf32>, vector<96x16xf32>, vector<9x16xf32> -> vector<9x16xf32>
    %cst_43 = arith.constant 0.000000e+00 : f32
    %90 = vector.broadcast %cst_43 : f32 to vector<9x16xf32>
    %91 = arith.maximumf %89, %90 : vector<9x16xf32>
    %c0_44 = arith.constant 0 : index
    %c0_45 = arith.constant 0 : index
    %c0_46 = arith.constant 0 : index
    %92 = vector.load %arg13[%c0_44, %c0_45, %c0_46] : memref<2x16x32xf32, #tpu.memory_space<vmem>>, vector<1x16x32xf32>
    %93 = vector.shape_cast %92 : vector<1x16x32xf32> to vector<16x32xf32>
    %cst_47 = arith.constant dense<0.000000e+00> : vector<9x32xf32>
    %94 = tpu.matmul %91, %93, %cst_47 {dimension_numbers = #tpu.dot_dimension_numbers<[1], [0], [0], [1], [0, 0, 1, 1], [], []>} : vector<9x16xf32>, vector<16x32xf32>, vector<9x32xf32> -> vector<9x32xf32>
    %95 = arith.addf %78, %94 : vector<9x32xf32>
    %c1 = arith.constant 1 : index
    %c0_48 = arith.constant 0 : index
    %c0_49 = arith.constant 0 : index
    %96 = vector.load %arg12[%c1, %c0_48, %c0_49] : memref<2x96x16xf32, #tpu.memory_space<vmem>>, vector<1x96x16xf32>
    %97 = vector.shape_cast %96 : vector<1x96x16xf32> to vector<96x16xf32>
    %cst_50 = arith.constant 0.000000e+00 : f32
    %98 = vector.broadcast %cst_50 : f32 to vector<9x32xf32>
    %99 = arith.maximumf %95, %98 : vector<9x32xf32>
    %cst_51 = arith.constant 0.000000e+00 : f32
    %100 = vector.broadcast %cst_51 : f32 to vector<1x32xf32>
    %101 = tpu.concatenate %100, %99, %100 in 0 : vector<1x32xf32>, vector<9x32xf32>, vector<1x32xf32> -> vector<11x32xf32>
    %102 = vector.extract_strided_slice %101 {offsets = [0, 0], sizes = [9, 32], strides = [1, 1]} : vector<11x32xf32> to vector<9x32xf32>
    %103 = vector.extract_strided_slice %101 {offsets = [1, 0], sizes = [9, 32], strides = [1, 1]} : vector<11x32xf32> to vector<9x32xf32>
    %104 = vector.extract_strided_slice %101 {offsets = [2, 0], sizes = [9, 32], strides = [1, 1]} : vector<11x32xf32> to vector<9x32xf32>
    %105 = tpu.concatenate %102, %103, %104 in 1 : vector<9x32xf32>, vector<9x32xf32>, vector<9x32xf32> -> vector<9x96xf32>
    %cst_52 = arith.constant dense<0.000000e+00> : vector<9x16xf32>
    %106 = tpu.matmul %105, %97, %cst_52 {dimension_numbers = #tpu.dot_dimension_numbers<[1], [0], [0], [1], [0, 0, 1, 1], [], []>} : vector<9x96xf32>, vector<96x16xf32>, vector<9x16xf32> -> vector<9x16xf32>
    %cst_53 = arith.constant 0.000000e+00 : f32
    %107 = vector.broadcast %cst_53 : f32 to vector<9x16xf32>
    %108 = arith.maximumf %106, %107 : vector<9x16xf32>
    %c1_54 = arith.constant 1 : index
    %c0_55 = arith.constant 0 : index
    %c0_56 = arith.constant 0 : index
    %109 = vector.load %arg13[%c1_54, %c0_55, %c0_56] : memref<2x16x32xf32, #tpu.memory_space<vmem>>, vector<1x16x32xf32>
    %110 = vector.shape_cast %109 : vector<1x16x32xf32> to vector<16x32xf32>
    %cst_57 = arith.constant dense<0.000000e+00> : vector<9x32xf32>
    %111 = tpu.matmul %108, %110, %cst_57 {dimension_numbers = #tpu.dot_dimension_numbers<[1], [0], [0], [1], [0, 0, 1, 1], [], []>} : vector<9x16xf32>, vector<16x32xf32>, vector<9x32xf32> -> vector<9x32xf32>
    %112 = arith.addf %95, %111 : vector<9x32xf32>
    %cst_58 = arith.constant 0.000000e+00 : f32
    %113 = vector.broadcast %cst_58 : f32 to vector<9x32xf32>
    %114 = arith.maximumf %112, %113 : vector<9x32xf32>
    %115 = arith.addf %114, %78 : vector<9x32xf32>
    %c0_59 = arith.constant 0 : index
    %c0_60 = arith.constant 0 : index
    %116 = vector.load %arg14[%c0_59, %c0_60] : memref<96x16xf32, #tpu.memory_space<vmem>>, vector<96x16xf32>
    %c0_61 = arith.constant 0 : index
    %c0_62 = arith.constant 0 : index
    %117 = vector.load %arg15[%c0_61, %c0_62] : memref<1x16xf32, #tpu.memory_space<vmem>>, vector<1x16xf32>
    %cst_63 = arith.constant 0.000000e+00 : f32
    %118 = vector.broadcast %cst_63 : f32 to vector<1x32xf32>
    %119 = tpu.concatenate %118, %115, %118 in 0 : vector<1x32xf32>, vector<9x32xf32>, vector<1x32xf32> -> vector<11x32xf32>
    %120 = vector.extract_strided_slice %119 {offsets = [0, 0], sizes = [9, 32], strides = [1, 1]} : vector<11x32xf32> to vector<9x32xf32>
    %121 = vector.extract_strided_slice %119 {offsets = [1, 0], sizes = [9, 32], strides = [1, 1]} : vector<11x32xf32> to vector<9x32xf32>
    %122 = vector.extract_strided_slice %119 {offsets = [2, 0], sizes = [9, 32], strides = [1, 1]} : vector<11x32xf32> to vector<9x32xf32>
    %123 = tpu.concatenate %120, %121, %122 in 1 : vector<9x32xf32>, vector<9x32xf32>, vector<9x32xf32> -> vector<9x96xf32>
    %cst_64 = arith.constant dense<0.000000e+00> : vector<9x16xf32>
    %124 = tpu.matmul %123, %116, %cst_64 {dimension_numbers = #tpu.dot_dimension_numbers<[1], [0], [0], [1], [0, 0, 1, 1], [], []>} : vector<9x96xf32>, vector<96x16xf32>, vector<9x16xf32> -> vector<9x16xf32>
    %125 = vector.broadcast %117 : vector<1x16xf32> to vector<9x16xf32>
    %126 = arith.addf %124, %125 : vector<9x16xf32>
    %c0_65 = arith.constant 0 : index
    %c0_66 = arith.constant 0 : index
    %c0_67 = arith.constant 0 : index
    %127 = vector.load %arg16[%c0_65, %c0_66, %c0_67] : memref<1x9x16xf32, #tpu.memory_space<vmem>>, vector<1x9x16xf32>
    %128 = vector.shape_cast %127 : vector<1x9x16xf32> to vector<9x16xf32>
    %129 = vector.shape_cast %126 : vector<9x16xf32> to vector<1x9x16xf32>
    tpu.vector_store %arg16[%c0_65, %c0_66, %c0_67], %129 {strides = array<i32>} : memref<1x9x16xf32, #tpu.memory_space<vmem>>, vector<1x9x16xf32>,
    return
  }
  func.func @transform_0(%arg0: i32) -> (i32, i32, i32) {
    %c0_i32 = arith.constant 0 : i32
    %c0_i32_0 = arith.constant 0 : i32
    %c0_i32_1 = arith.constant 0 : i32
    return %arg0, %c0_i32, %c0_i32_0 : i32, i32, i32
  }
  func.func @transform_1(%arg0: i32) -> (i32, i32) {
    %c0_i32 = arith.constant 0 : i32
    %c0_i32_0 = arith.constant 0 : i32
    %c0_i32_1 = arith.constant 0 : i32
    return %c0_i32, %c0_i32_0 : i32, i32
  }
  func.func @transform_2(%arg0: i32) -> (i32, i32) {
    %c0_i32 = arith.constant 0 : i32
    %c0_i32_0 = arith.constant 0 : i32
    %c0_i32_1 = arith.constant 0 : i32
    return %c0_i32, %c0_i32_0 : i32, i32
  }
  func.func @transform_3(%arg0: i32) -> (i32, i32) {
    %c0_i32 = arith.constant 0 : i32
    %c0_i32_0 = arith.constant 0 : i32
    %c0_i32_1 = arith.constant 0 : i32
    return %c0_i32, %c0_i32_0 : i32, i32
  }
  func.func @transform_4(%arg0: i32) -> (i32, i32) {
    %c0_i32 = arith.constant 0 : i32
    %c0_i32_0 = arith.constant 0 : i32
    %c0_i32_1 = arith.constant 0 : i32
    return %c0_i32, %c0_i32_0 : i32, i32
  }
  func.func @transform_5(%arg0: i32) -> (i32, i32) {
    %c0_i32 = arith.constant 0 : i32
    %c0_i32_0 = arith.constant 0 : i32
    %c0_i32_1 = arith.constant 0 : i32
    return %c0_i32, %c0_i32_0 : i32, i32
  }
  func.func @transform_6(%arg0: i32) -> (i32, i32) {
    %c0_i32 = arith.constant 0 : i32
    %c0_i32_0 = arith.constant 0 : i32
    %c0_i32_1 = arith.constant 0 : i32
    return %c0_i32, %c0_i32_0 : i32, i32
  }
  func.func @transform_7(%arg0: i32) -> (i32, i32) {
    %c0_i32 = arith.constant 0 : i32
    %c0_i32_0 = arith.constant 0 : i32
    %c0_i32_1 = arith.constant 0 : i32
    return %c0_i32, %c0_i32_0 : i32, i32
  }
  func.func @transform_8(%arg0: i32) -> (i32, i32) {
    %c0_i32 = arith.constant 0 : i32
    %c0_i32_0 = arith.constant 0 : i32
    %c0_i32_1 = arith.constant 0 : i32
    return %c0_i32, %c0_i32_0 : i32, i32
  }
  func.func @transform_9(%arg0: i32) -> (i32, i32) {
    %c0_i32 = arith.constant 0 : i32
    %c0_i32_0 = arith.constant 0 : i32
    %c0_i32_1 = arith.constant 0 : i32
    return %c0_i32, %c0_i32_0 : i32, i32
  }
  func.func @transform_10(%arg0: i32) -> (i32, i32) {
    %c0_i32 = arith.constant 0 : i32
    %c0_i32_0 = arith.constant 0 : i32
    %c0_i32_1 = arith.constant 0 : i32
    return %c0_i32, %c0_i32_0 : i32, i32
  }
  func.func @transform_11(%arg0: i32) -> (i32, i32, i32) {
    %c0_i32 = arith.constant 0 : i32
    %c0_i32_0 = arith.constant 0 : i32
    %c0_i32_1 = arith.constant 0 : i32
    %c0_i32_2 = arith.constant 0 : i32
    return %c0_i32, %c0_i32_0, %c0_i32_1 : i32, i32, i32
  }
  func.func @transform_12(%arg0: i32) -> (i32, i32, i32) {
    %c0_i32 = arith.constant 0 : i32
    %c0_i32_0 = arith.constant 0 : i32
    %c0_i32_1 = arith.constant 0 : i32
    %c0_i32_2 = arith.constant 0 : i32
    return %c0_i32, %c0_i32_0, %c0_i32_1 : i32, i32, i32
  }
  func.func @transform_13(%arg0: i32) -> (i32, i32) {
    %c0_i32 = arith.constant 0 : i32
    %c0_i32_0 = arith.constant 0 : i32
    %c0_i32_1 = arith.constant 0 : i32
    return %c0_i32, %c0_i32_0 : i32, i32
  }
  func.func @transform_14(%arg0: i32) -> (i32, i32) {
    %c0_i32 = arith.constant 0 : i32
    %c0_i32_0 = arith.constant 0 : i32
    %c0_i32_1 = arith.constant 0 : i32
    return %c0_i32, %c0_i32_0 : i32, i32
  }
  func.func @transform_15(%arg0: i32) -> (i32, i32, i32) {
    %c0_i32 = arith.constant 0 : i32
    %c0_i32_0 = arith.constant 0 : i32
    %c0_i32_1 = arith.constant 0 : i32
    return %arg0, %c0_i32, %c0_i32_0 : i32, i32, i32
  }
}

module attributes {stable_mosaic.version = 11 : i64} {
  func.func @_vq_kernel(%arg0: i32, %arg1: memref<1x9x16xf32, #tpu.memory_space<vmem>>, %arg2: memref<32x16xf32, #tpu.memory_space<vmem>>, %arg3: memref<1x32xf32, #tpu.memory_space<vmem>>, %arg4: memref<1x9x16xf32, #tpu.memory_space<vmem>>, %arg5: memref<1x1x32xf32, #tpu.memory_space<vmem>>, %arg6: memref<1x1x1xf32, #tpu.memory_space<vmem>>) attributes {dimension_semantics = [#tpu.dimension_semantics<parallel>], iteration_bounds = array<i64: 2>, scalar_prefetch = 0 : i64, scratch_operands = 0 : i64, tpu.core_type = #tpu.core_type<tc>, window_params = [{transform_indices = @transform_0, window_bounds = array<i64: 1, 9, 16>}, {pipeline_mode = #tpu.pipeline_mode<synchronous>, transform_indices = @transform_1, window_bounds = array<i64: 32, 16>}, {pipeline_mode = #tpu.pipeline_mode<synchronous>, transform_indices = @transform_2, window_bounds = array<i64: 1, 32>}, {transform_indices = @transform_3, window_bounds = array<i64: 1, 9, 16>}, {transform_indices = @transform_4, window_bounds = array<i64: 1, 1, 32>}, {transform_indices = @transform_5, window_bounds = array<i64: 1, 1, 1>}]} {
    %c0 = arith.constant 0 : index
    %c0_0 = arith.constant 0 : index
    %c0_1 = arith.constant 0 : index
    %0 = vector.load %arg1[%c0, %c0_0, %c0_1] : memref<1x9x16xf32, #tpu.memory_space<vmem>>, vector<1x9x16xf32>
    %1 = vector.shape_cast %0 : vector<1x9x16xf32> to vector<9x16xf32>
    %c0_2 = arith.constant 0 : index
    %c0_3 = arith.constant 0 : index
    %2 = vector.load %arg2[%c0_2, %c0_3] : memref<32x16xf32, #tpu.memory_space<vmem>>, vector<32x16xf32>
    %cst = arith.constant dense<0.000000e+00> : vector<9x32xf32>
    %3 = tpu.matmul %1, %2, %cst {dimension_numbers = #tpu.dot_dimension_numbers<[1], [1], [0], [0], [0, 0, 1, 0], [], []>} : vector<9x16xf32>, vector<32x16xf32>, vector<9x32xf32> -> vector<9x32xf32>
    %c0_4 = arith.constant 0 : index
    %c0_5 = arith.constant 0 : index
    %4 = vector.load %arg3[%c0_4, %c0_5] : memref<1x32xf32, #tpu.memory_space<vmem>>, vector<1x32xf32>
    %cst_6 = arith.constant 2.000000e+00 : f32
    %5 = vector.broadcast %cst_6 : f32 to vector<9x32xf32>
    %6 = arith.mulf %5, %3 : vector<9x32xf32>
    %7 = vector.broadcast %4 : vector<1x32xf32> to vector<9x32xf32>
    %8 = arith.subf %7, %6 : vector<9x32xf32>
    %cst_7 = arith.constant dense<0x7F800000> : vector<9xf32>
    %9 = vector.multi_reduction <minimumf>, %8, %cst_7 [1] : vector<9x32xf32> to vector<9xf32>
    %10 = vector.shape_cast %9 : vector<9xf32> to vector<9x1xf32>
    %11 = tpu.iota {dimensions = array<i32: 1>} : vector<9x32xi32>
    %12 = vector.broadcast %10 : vector<9x1xf32> to vector<9x32xf32>
    %13 = arith.cmpf ole, %8, %12 : vector<9x32xf32>
    %c32_i32 = arith.constant 32 : i32
    %14 = vector.broadcast %c32_i32 : i32 to vector<9x32xi32>
    %15 = arith.select %13, %11, %14 : vector<9x32xi1>, vector<9x32xi32>
    %cst_8 = arith.constant dense<2147483647> : vector<9xi32>
    %16 = vector.multi_reduction <minsi>, %15, %cst_8 [1] : vector<9x32xi32> to vector<9xi32>
    %17 = vector.shape_cast %16 : vector<9xi32> to vector<9x1xi32>
    %18 = vector.broadcast %17 : vector<9x1xi32> to vector<9x32xi32>
    %19 = arith.cmpi eq, %11, %18 : vector<9x32xi32>
    %20 = arith.extui %19 : vector<9x32xi1> to vector<9x32xi32>
    %21 = arith.sitofp %20 : vector<9x32xi32> to vector<9x32xf32>
    %cst_9 = arith.constant dense<0.000000e+00> : vector<9x16xf32>
    %22 = tpu.matmul %21, %2, %cst_9 {dimension_numbers = #tpu.dot_dimension_numbers<[1], [0], [0], [1], [0, 0, 1, 1], [], []>} : vector<9x32xf32>, vector<32x16xf32>, vector<9x16xf32> -> vector<9x16xf32>
    %c0_10 = arith.constant 0 : index
    %c0_11 = arith.constant 0 : index
    %c0_12 = arith.constant 0 : index
    %23 = vector.load %arg4[%c0_10, %c0_11, %c0_12] : memref<1x9x16xf32, #tpu.memory_space<vmem>>, vector<1x9x16xf32>
    %24 = vector.shape_cast %23 : vector<1x9x16xf32> to vector<9x16xf32>
    %25 = vector.shape_cast %22 : vector<9x16xf32> to vector<1x9x16xf32>
    tpu.vector_store %arg4[%c0_10, %c0_11, %c0_12], %25 {strides = array<i32>} : memref<1x9x16xf32, #tpu.memory_space<vmem>>, vector<1x9x16xf32>,
    %cst_13 = arith.constant dense<0.000000e+00> : vector<32xf32>
    %26 = vector.multi_reduction <add>, %21, %cst_13 [0] : vector<9x32xf32> to vector<32xf32>
    %27 = vector.shape_cast %26 : vector<32xf32> to vector<1x32xf32>
    %c0_14 = arith.constant 0 : index
    %c0_15 = arith.constant 0 : index
    %c0_16 = arith.constant 0 : index
    %28 = vector.load %arg5[%c0_14, %c0_15, %c0_16] : memref<1x1x32xf32, #tpu.memory_space<vmem>>, vector<1x1x32xf32>
    %29 = vector.shape_cast %28 : vector<1x1x32xf32> to vector<1x32xf32>
    %30 = vector.shape_cast %27 : vector<1x32xf32> to vector<1x1x32xf32>
    tpu.vector_store %arg5[%c0_14, %c0_15, %c0_16], %30 {strides = array<i32>} : memref<1x1x32xf32, #tpu.memory_space<vmem>>, vector<1x1x32xf32>,
    %31 = arith.subf %22, %1 : vector<9x16xf32>
    %32 = arith.mulf %31, %31 : vector<9x16xf32>
    %33 = vector.shape_cast %32 : vector<9x16xf32> to vector<1x9x16xf32>
    %cst_17 = arith.constant dense<0.000000e+00> : vector<1xf32>
    %34 = vector.multi_reduction <add>, %33, %cst_17 [1, 2] : vector<1x9x16xf32> to vector<1xf32>
    %35 = vector.shape_cast %34 : vector<1xf32> to vector<1x1x1xf32>
    %36 = vector.extract %35[0, 0, 0] : f32 from vector<1x1x1xf32>
    %37 = vector.broadcast %36 : f32 to vector<1x1xf32>
    %c0_18 = arith.constant 0 : index
    %c0_19 = arith.constant 0 : index
    %c0_20 = arith.constant 0 : index
    %38 = vector.load %arg6[%c0_18, %c0_19, %c0_20] : memref<1x1x1xf32, #tpu.memory_space<vmem>>, vector<1x1x1xf32>
    %39 = vector.shape_cast %38 : vector<1x1x1xf32> to vector<1x1xf32>
    %40 = vector.shape_cast %37 : vector<1x1xf32> to vector<1x1x1xf32>
    tpu.vector_store %arg6[%c0_18, %c0_19, %c0_20], %40 {strides = array<i32>} : memref<1x1x1xf32, #tpu.memory_space<vmem>>, vector<1x1x1xf32>,
    return
  }
  func.func @transform_0(%arg0: i32) -> (i32, i32, i32) {
    %c0_i32 = arith.constant 0 : i32
    %c0_i32_0 = arith.constant 0 : i32
    %c0_i32_1 = arith.constant 0 : i32
    return %arg0, %c0_i32, %c0_i32_0 : i32, i32, i32
  }
  func.func @transform_1(%arg0: i32) -> (i32, i32) {
    %c0_i32 = arith.constant 0 : i32
    %c0_i32_0 = arith.constant 0 : i32
    %c0_i32_1 = arith.constant 0 : i32
    return %c0_i32, %c0_i32_0 : i32, i32
  }
  func.func @transform_2(%arg0: i32) -> (i32, i32) {
    %c0_i32 = arith.constant 0 : i32
    %c0_i32_0 = arith.constant 0 : i32
    %c0_i32_1 = arith.constant 0 : i32
    return %c0_i32, %c0_i32_0 : i32, i32
  }
  func.func @transform_3(%arg0: i32) -> (i32, i32, i32) {
    %c0_i32 = arith.constant 0 : i32
    %c0_i32_0 = arith.constant 0 : i32
    %c0_i32_1 = arith.constant 0 : i32
    return %arg0, %c0_i32, %c0_i32_0 : i32, i32, i32
  }
  func.func @transform_4(%arg0: i32) -> (i32, i32, i32) {
    %c0_i32 = arith.constant 0 : i32
    %c0_i32_0 = arith.constant 0 : i32
    %c0_i32_1 = arith.constant 0 : i32
    return %arg0, %c0_i32, %c0_i32_0 : i32, i32, i32
  }
  func.func @transform_5(%arg0: i32) -> (i32, i32, i32) {
    %c0_i32 = arith.constant 0 : i32
    %c0_i32_0 = arith.constant 0 : i32
    %c0_i32_1 = arith.constant 0 : i32
    return %arg0, %c0_i32, %c0_i32_0 : i32, i32, i32
  }
}

module attributes {stable_mosaic.version = 11 : i64} {
  func.func @_decoder_kernel(%arg0: i32, %arg1: memref<1x9x16xf32, #tpu.memory_space<vmem>>, %arg2: memref<48x32xf32, #tpu.memory_space<vmem>>, %arg3: memref<1x32xf32, #tpu.memory_space<vmem>>, %arg4: memref<2x96x16xf32, #tpu.memory_space<vmem>>, %arg5: memref<2x16x32xf32, #tpu.memory_space<vmem>>, %arg6: memref<96x32xf32, #tpu.memory_space<vmem>>, %arg7: memref<1x32xf32, #tpu.memory_space<vmem>>, %arg8: memref<96x32xf32, #tpu.memory_space<vmem>>, %arg9: memref<1x32xf32, #tpu.memory_space<vmem>>, %arg10: memref<4x64xf32, #tpu.memory_space<vmem>>, %arg11: memref<4x1xf32, #tpu.memory_space<vmem>>, %arg12: memref<1x4x16xf32, #tpu.memory_space<vmem>>) attributes {dimension_semantics = [#tpu.dimension_semantics<parallel>], iteration_bounds = array<i64: 2>, scalar_prefetch = 0 : i64, scratch_operands = 0 : i64, tpu.core_type = #tpu.core_type<tc>, window_params = [{transform_indices = @transform_0, window_bounds = array<i64: 1, 9, 16>}, {pipeline_mode = #tpu.pipeline_mode<synchronous>, transform_indices = @transform_1, window_bounds = array<i64: 48, 32>}, {pipeline_mode = #tpu.pipeline_mode<synchronous>, transform_indices = @transform_2, window_bounds = array<i64: 1, 32>}, {pipeline_mode = #tpu.pipeline_mode<synchronous>, transform_indices = @transform_3, window_bounds = array<i64: 2, 96, 16>}, {pipeline_mode = #tpu.pipeline_mode<synchronous>, transform_indices = @transform_4, window_bounds = array<i64: 2, 16, 32>}, {pipeline_mode = #tpu.pipeline_mode<synchronous>, transform_indices = @transform_5, window_bounds = array<i64: 96, 32>}, {pipeline_mode = #tpu.pipeline_mode<synchronous>, transform_indices = @transform_6, window_bounds = array<i64: 1, 32>}, {pipeline_mode = #tpu.pipeline_mode<synchronous>, transform_indices = @transform_7, window_bounds = array<i64: 96, 32>}, {pipeline_mode = #tpu.pipeline_mode<synchronous>, transform_indices = @transform_8, window_bounds = array<i64: 1, 32>}, {pipeline_mode = #tpu.pipeline_mode<synchronous>, transform_indices = @transform_9, window_bounds = array<i64: 4, 64>}, {pipeline_mode = #tpu.pipeline_mode<synchronous>, transform_indices = @transform_10, window_bounds = array<i64: 4, 1>}, {transform_indices = @transform_11, window_bounds = array<i64: 1, 4, 16>}]} {
    %c0 = arith.constant 0 : index
    %c0_0 = arith.constant 0 : index
    %c0_1 = arith.constant 0 : index
    %0 = vector.load %arg1[%c0, %c0_0, %c0_1] : memref<1x9x16xf32, #tpu.memory_space<vmem>>, vector<1x9x16xf32>
    %1 = vector.shape_cast %0 : vector<1x9x16xf32> to vector<9x16xf32>
    %c0_2 = arith.constant 0 : index
    %c0_3 = arith.constant 0 : index
    %2 = vector.load %arg2[%c0_2, %c0_3] : memref<48x32xf32, #tpu.memory_space<vmem>>, vector<48x32xf32>
    %c0_4 = arith.constant 0 : index
    %c0_5 = arith.constant 0 : index
    %3 = vector.load %arg3[%c0_4, %c0_5] : memref<1x32xf32, #tpu.memory_space<vmem>>, vector<1x32xf32>
    %cst = arith.constant 0.000000e+00 : f32
    %4 = vector.broadcast %cst : f32 to vector<1x16xf32>
    %5 = tpu.concatenate %4, %1, %4 in 0 : vector<1x16xf32>, vector<9x16xf32>, vector<1x16xf32> -> vector<11x16xf32>
    %6 = vector.extract_strided_slice %5 {offsets = [0, 0], sizes = [9, 16], strides = [1, 1]} : vector<11x16xf32> to vector<9x16xf32>
    %7 = vector.extract_strided_slice %5 {offsets = [1, 0], sizes = [9, 16], strides = [1, 1]} : vector<11x16xf32> to vector<9x16xf32>
    %8 = vector.extract_strided_slice %5 {offsets = [2, 0], sizes = [9, 16], strides = [1, 1]} : vector<11x16xf32> to vector<9x16xf32>
    %9 = tpu.concatenate %6, %7, %8 in 1 : vector<9x16xf32>, vector<9x16xf32>, vector<9x16xf32> -> vector<9x48xf32>
    %cst_6 = arith.constant dense<0.000000e+00> : vector<9x32xf32>
    %10 = tpu.matmul %9, %2, %cst_6 {dimension_numbers = #tpu.dot_dimension_numbers<[1], [0], [0], [1], [0, 0, 1, 1], [], []>} : vector<9x48xf32>, vector<48x32xf32>, vector<9x32xf32> -> vector<9x32xf32>
    %11 = vector.broadcast %3 : vector<1x32xf32> to vector<9x32xf32>
    %12 = arith.addf %10, %11 : vector<9x32xf32>
    %13 = tpu.iota {dimensions = array<i32: 0>} : vector<18x9xi32>
    %14 = tpu.iota {dimensions = array<i32: 1>} : vector<18x9xi32>
    %c2_i32 = arith.constant 2 : i32
    %15 = vector.broadcast %c2_i32 : i32 to vector<18x9xi32>
    %16 = arith.muli %15, %14 : vector<18x9xi32>
    %17 = arith.cmpi eq, %13, %16 : vector<18x9xi32>
    %c2_i32_7 = arith.constant 2 : i32
    %18 = vector.broadcast %c2_i32_7 : i32 to vector<18x9xi32>
    %19 = arith.muli %18, %14 : vector<18x9xi32>
    %c1_i32 = arith.constant 1 : i32
    %20 = vector.broadcast %c1_i32 : i32 to vector<18x9xi32>
    %21 = arith.addi %19, %20 : vector<18x9xi32>
    %22 = arith.cmpi eq, %13, %21 : vector<18x9xi32>
    %23 = arith.ori %17, %22 : vector<18x9xi1>
    %24 = arith.extui %23 : vector<18x9xi1> to vector<18x9xi32>
    %25 = arith.sitofp %24 : vector<18x9xi32> to vector<18x9xf32>
    %cst_8 = arith.constant dense<0.000000e+00> : vector<18x32xf32>
    %26 = tpu.matmul %25, %12, %cst_8 {dimension_numbers = #tpu.dot_dimension_numbers<[1], [0], [0], [1], [0, 0, 1, 1], [], []>} : vector<18x9xf32>, vector<9x32xf32>, vector<18x32xf32> -> vector<18x32xf32>
    %c0_9 = arith.constant 0 : index
    %c0_10 = arith.constant 0 : index
    %c0_11 = arith.constant 0 : index
    %27 = vector.load %arg4[%c0_9, %c0_10, %c0_11] : memref<2x96x16xf32, #tpu.memory_space<vmem>>, vector<1x96x16xf32>
    %28 = vector.shape_cast %27 : vector<1x96x16xf32> to vector<96x16xf32>
    %cst_12 = arith.constant 0.000000e+00 : f32
    %29 = vector.broadcast %cst_12 : f32 to vector<18x32xf32>
    %30 = arith.maximumf %26, %29 : vector<18x32xf32>
    %cst_13 = arith.constant 0.000000e+00 : f32
    %31 = vector.broadcast %cst_13 : f32 to vector<1x32xf32>
    %32 = tpu.concatenate %31, %30, %31 in 0 : vector<1x32xf32>, vector<18x32xf32>, vector<1x32xf32> -> vector<20x32xf32>
    %33 = vector.extract_strided_slice %32 {offsets = [0, 0], sizes = [18, 32], strides = [1, 1]} : vector<20x32xf32> to vector<18x32xf32>
    %34 = vector.extract_strided_slice %32 {offsets = [1, 0], sizes = [18, 32], strides = [1, 1]} : vector<20x32xf32> to vector<18x32xf32>
    %35 = vector.extract_strided_slice %32 {offsets = [2, 0], sizes = [18, 32], strides = [1, 1]} : vector<20x32xf32> to vector<18x32xf32>
    %36 = tpu.concatenate %33, %34, %35 in 1 : vector<18x32xf32>, vector<18x32xf32>, vector<18x32xf32> -> vector<18x96xf32>
    %cst_14 = arith.constant dense<0.000000e+00> : vector<18x16xf32>
    %37 = tpu.matmul %36, %28, %cst_14 {dimension_numbers = #tpu.dot_dimension_numbers<[1], [0], [0], [1], [0, 0, 1, 1], [], []>} : vector<18x96xf32>, vector<96x16xf32>, vector<18x16xf32> -> vector<18x16xf32>
    %cst_15 = arith.constant 0.000000e+00 : f32
    %38 = vector.broadcast %cst_15 : f32 to vector<18x16xf32>
    %39 = arith.maximumf %37, %38 : vector<18x16xf32>
    %c0_16 = arith.constant 0 : index
    %c0_17 = arith.constant 0 : index
    %c0_18 = arith.constant 0 : index
    %40 = vector.load %arg5[%c0_16, %c0_17, %c0_18] : memref<2x16x32xf32, #tpu.memory_space<vmem>>, vector<1x16x32xf32>
    %41 = vector.shape_cast %40 : vector<1x16x32xf32> to vector<16x32xf32>
    %cst_19 = arith.constant dense<0.000000e+00> : vector<18x32xf32>
    %42 = tpu.matmul %39, %41, %cst_19 {dimension_numbers = #tpu.dot_dimension_numbers<[1], [0], [0], [1], [0, 0, 1, 1], [], []>} : vector<18x16xf32>, vector<16x32xf32>, vector<18x32xf32> -> vector<18x32xf32>
    %43 = arith.addf %26, %42 : vector<18x32xf32>
    %c1 = arith.constant 1 : index
    %c0_20 = arith.constant 0 : index
    %c0_21 = arith.constant 0 : index
    %44 = vector.load %arg4[%c1, %c0_20, %c0_21] : memref<2x96x16xf32, #tpu.memory_space<vmem>>, vector<1x96x16xf32>
    %45 = vector.shape_cast %44 : vector<1x96x16xf32> to vector<96x16xf32>
    %cst_22 = arith.constant 0.000000e+00 : f32
    %46 = vector.broadcast %cst_22 : f32 to vector<18x32xf32>
    %47 = arith.maximumf %43, %46 : vector<18x32xf32>
    %cst_23 = arith.constant 0.000000e+00 : f32
    %48 = vector.broadcast %cst_23 : f32 to vector<1x32xf32>
    %49 = tpu.concatenate %48, %47, %48 in 0 : vector<1x32xf32>, vector<18x32xf32>, vector<1x32xf32> -> vector<20x32xf32>
    %50 = vector.extract_strided_slice %49 {offsets = [0, 0], sizes = [18, 32], strides = [1, 1]} : vector<20x32xf32> to vector<18x32xf32>
    %51 = vector.extract_strided_slice %49 {offsets = [1, 0], sizes = [18, 32], strides = [1, 1]} : vector<20x32xf32> to vector<18x32xf32>
    %52 = vector.extract_strided_slice %49 {offsets = [2, 0], sizes = [18, 32], strides = [1, 1]} : vector<20x32xf32> to vector<18x32xf32>
    %53 = tpu.concatenate %50, %51, %52 in 1 : vector<18x32xf32>, vector<18x32xf32>, vector<18x32xf32> -> vector<18x96xf32>
    %cst_24 = arith.constant dense<0.000000e+00> : vector<18x16xf32>
    %54 = tpu.matmul %53, %45, %cst_24 {dimension_numbers = #tpu.dot_dimension_numbers<[1], [0], [0], [1], [0, 0, 1, 1], [], []>} : vector<18x96xf32>, vector<96x16xf32>, vector<18x16xf32> -> vector<18x16xf32>
    %cst_25 = arith.constant 0.000000e+00 : f32
    %55 = vector.broadcast %cst_25 : f32 to vector<18x16xf32>
    %56 = arith.maximumf %54, %55 : vector<18x16xf32>
    %c1_26 = arith.constant 1 : index
    %c0_27 = arith.constant 0 : index
    %c0_28 = arith.constant 0 : index
    %57 = vector.load %arg5[%c1_26, %c0_27, %c0_28] : memref<2x16x32xf32, #tpu.memory_space<vmem>>, vector<1x16x32xf32>
    %58 = vector.shape_cast %57 : vector<1x16x32xf32> to vector<16x32xf32>
    %cst_29 = arith.constant dense<0.000000e+00> : vector<18x32xf32>
    %59 = tpu.matmul %56, %58, %cst_29 {dimension_numbers = #tpu.dot_dimension_numbers<[1], [0], [0], [1], [0, 0, 1, 1], [], []>} : vector<18x16xf32>, vector<16x32xf32>, vector<18x32xf32> -> vector<18x32xf32>
    %60 = arith.addf %43, %59 : vector<18x32xf32>
    %cst_30 = arith.constant 0.000000e+00 : f32
    %61 = vector.broadcast %cst_30 : f32 to vector<18x32xf32>
    %62 = arith.maximumf %60, %61 : vector<18x32xf32>
    %c0_31 = arith.constant 0 : index
    %c0_32 = arith.constant 0 : index
    %63 = vector.load %arg6[%c0_31, %c0_32] : memref<96x32xf32, #tpu.memory_space<vmem>>, vector<96x32xf32>
    %c0_33 = arith.constant 0 : index
    %c0_34 = arith.constant 0 : index
    %64 = vector.load %arg7[%c0_33, %c0_34] : memref<1x32xf32, #tpu.memory_space<vmem>>, vector<1x32xf32>
    %cst_35 = arith.constant 0.000000e+00 : f32
    %65 = vector.broadcast %cst_35 : f32 to vector<1x32xf32>
    %66 = tpu.concatenate %65, %62, %65 in 0 : vector<1x32xf32>, vector<18x32xf32>, vector<1x32xf32> -> vector<20x32xf32>
    %67 = vector.extract_strided_slice %66 {offsets = [0, 0], sizes = [18, 32], strides = [1, 1]} : vector<20x32xf32> to vector<18x32xf32>
    %68 = vector.extract_strided_slice %66 {offsets = [1, 0], sizes = [18, 32], strides = [1, 1]} : vector<20x32xf32> to vector<18x32xf32>
    %69 = vector.extract_strided_slice %66 {offsets = [2, 0], sizes = [18, 32], strides = [1, 1]} : vector<20x32xf32> to vector<18x32xf32>
    %70 = tpu.concatenate %67, %68, %69 in 1 : vector<18x32xf32>, vector<18x32xf32>, vector<18x32xf32> -> vector<18x96xf32>
    %cst_36 = arith.constant dense<0.000000e+00> : vector<18x32xf32>
    %71 = tpu.matmul %70, %63, %cst_36 {dimension_numbers = #tpu.dot_dimension_numbers<[1], [0], [0], [1], [0, 0, 1, 1], [], []>} : vector<18x96xf32>, vector<96x32xf32>, vector<18x32xf32> -> vector<18x32xf32>
    %72 = vector.broadcast %64 : vector<1x32xf32> to vector<18x32xf32>
    %73 = arith.addf %71, %72 : vector<18x32xf32>
    %cst_37 = arith.constant 0.000000e+00 : f32
    %74 = vector.broadcast %cst_37 : f32 to vector<18x32xf32>
    %75 = arith.maximumf %73, %74 : vector<18x32xf32>
    %c0_38 = arith.constant 0 : index
    %c0_39 = arith.constant 0 : index
    %76 = vector.load %arg8[%c0_38, %c0_39] : memref<96x32xf32, #tpu.memory_space<vmem>>, vector<96x32xf32>
    %c0_40 = arith.constant 0 : index
    %c0_41 = arith.constant 0 : index
    %77 = vector.load %arg9[%c0_40, %c0_41] : memref<1x32xf32, #tpu.memory_space<vmem>>, vector<1x32xf32>
    %cst_42 = arith.constant 0.000000e+00 : f32
    %78 = vector.broadcast %cst_42 : f32 to vector<2x32xf32>
    %79 = tpu.concatenate %78, %75, %78 in 0 : vector<2x32xf32>, vector<18x32xf32>, vector<2x32xf32> -> vector<22x32xf32>
    %80 = vector.extract_strided_slice %79 {offsets = [0, 0], sizes = [20, 32], strides = [1, 1]} : vector<22x32xf32> to vector<20x32xf32>
    %81 = vector.extract_strided_slice %79 {offsets = [1, 0], sizes = [20, 32], strides = [1, 1]} : vector<22x32xf32> to vector<20x32xf32>
    %82 = vector.extract_strided_slice %79 {offsets = [2, 0], sizes = [20, 32], strides = [1, 1]} : vector<22x32xf32> to vector<20x32xf32>
    %83 = tpu.concatenate %80, %81, %82 in 1 : vector<20x32xf32>, vector<20x32xf32>, vector<20x32xf32> -> vector<20x96xf32>
    %cst_43 = arith.constant dense<0.000000e+00> : vector<20x32xf32>
    %84 = tpu.matmul %83, %76, %cst_43 {dimension_numbers = #tpu.dot_dimension_numbers<[1], [0], [0], [1], [0, 0, 1, 1], [], []>} : vector<20x96xf32>, vector<96x32xf32>, vector<20x32xf32> -> vector<20x32xf32>
    %85 = vector.broadcast %77 : vector<1x32xf32> to vector<20x32xf32>
    %86 = arith.addf %84, %85 : vector<20x32xf32>
    %cst_44 = arith.constant 0.000000e+00 : f32
    %87 = vector.broadcast %cst_44 : f32 to vector<20x32xf32>
    %88 = arith.maximumf %86, %87 : vector<20x32xf32>
    %cst_45 = arith.constant 0.000000e+00 : f32
    %89 = vector.broadcast %cst_45 : f32 to vector<1x32xf32>
    %90 = tpu.concatenate %89, %88, %89 in 0 : vector<1x32xf32>, vector<20x32xf32>, vector<1x32xf32> -> vector<22x32xf32>
    %91 = vector.extract_strided_slice %90 {offsets = [0, 0], sizes = [21, 32], strides = [1, 1]} : vector<22x32xf32> to vector<21x32xf32>
    %92 = vector.extract_strided_slice %90 {offsets = [1, 0], sizes = [21, 32], strides = [1, 1]} : vector<22x32xf32> to vector<21x32xf32>
    %93 = tpu.concatenate %91, %92 in 1 : vector<21x32xf32>, vector<21x32xf32> -> vector<21x64xf32>
    %c0_46 = arith.constant 0 : index
    %c0_47 = arith.constant 0 : index
    %94 = vector.load %arg10[%c0_46, %c0_47] : memref<4x64xf32, #tpu.memory_space<vmem>>, vector<4x64xf32>
    %cst_48 = arith.constant dense<0.000000e+00> : vector<4x21xf32>
    %95 = tpu.matmul %94, %93, %cst_48 {dimension_numbers = #tpu.dot_dimension_numbers<[1], [1], [0], [0], [0, 0, 1, 0], [], []>} : vector<4x64xf32>, vector<21x64xf32>, vector<4x21xf32> -> vector<4x21xf32>
    %c0_49 = arith.constant 0 : index
    %c0_50 = arith.constant 0 : index
    %96 = vector.load %arg11[%c0_49, %c0_50] : memref<4x1xf32, #tpu.memory_space<vmem>>, vector<4x1xf32>
    %97 = vector.broadcast %96 : vector<4x1xf32> to vector<4x21xf32>
    %98 = arith.addf %95, %97 : vector<4x21xf32>
    %99 = vector.extract_strided_slice %98 {offsets = [0, 0], sizes = [4, 16], strides = [1, 1]} : vector<4x21xf32> to vector<4x16xf32>
    %c0_51 = arith.constant 0 : index
    %c0_52 = arith.constant 0 : index
    %c0_53 = arith.constant 0 : index
    %100 = vector.load %arg12[%c0_51, %c0_52, %c0_53] : memref<1x4x16xf32, #tpu.memory_space<vmem>>, vector<1x4x16xf32>
    %101 = vector.shape_cast %100 : vector<1x4x16xf32> to vector<4x16xf32>
    %102 = vector.shape_cast %99 : vector<4x16xf32> to vector<1x4x16xf32>
    tpu.vector_store %arg12[%c0_51, %c0_52, %c0_53], %102 {strides = array<i32>} : memref<1x4x16xf32, #tpu.memory_space<vmem>>, vector<1x4x16xf32>,
    return
  }
  func.func @transform_0(%arg0: i32) -> (i32, i32, i32) {
    %c0_i32 = arith.constant 0 : i32
    %c0_i32_0 = arith.constant 0 : i32
    %c0_i32_1 = arith.constant 0 : i32
    return %arg0, %c0_i32, %c0_i32_0 : i32, i32, i32
  }
  func.func @transform_1(%arg0: i32) -> (i32, i32) {
    %c0_i32 = arith.constant 0 : i32
    %c0_i32_0 = arith.constant 0 : i32
    %c0_i32_1 = arith.constant 0 : i32
    return %c0_i32, %c0_i32_0 : i32, i32
  }
  func.func @transform_2(%arg0: i32) -> (i32, i32) {
    %c0_i32 = arith.constant 0 : i32
    %c0_i32_0 = arith.constant 0 : i32
    %c0_i32_1 = arith.constant 0 : i32
    return %c0_i32, %c0_i32_0 : i32, i32
  }
  func.func @transform_3(%arg0: i32) -> (i32, i32, i32) {
    %c0_i32 = arith.constant 0 : i32
    %c0_i32_0 = arith.constant 0 : i32
    %c0_i32_1 = arith.constant 0 : i32
    %c0_i32_2 = arith.constant 0 : i32
    return %c0_i32, %c0_i32_0, %c0_i32_1 : i32, i32, i32
  }
  func.func @transform_4(%arg0: i32) -> (i32, i32, i32) {
    %c0_i32 = arith.constant 0 : i32
    %c0_i32_0 = arith.constant 0 : i32
    %c0_i32_1 = arith.constant 0 : i32
    %c0_i32_2 = arith.constant 0 : i32
    return %c0_i32, %c0_i32_0, %c0_i32_1 : i32, i32, i32
  }
  func.func @transform_5(%arg0: i32) -> (i32, i32) {
    %c0_i32 = arith.constant 0 : i32
    %c0_i32_0 = arith.constant 0 : i32
    %c0_i32_1 = arith.constant 0 : i32
    return %c0_i32, %c0_i32_0 : i32, i32
  }
  func.func @transform_6(%arg0: i32) -> (i32, i32) {
    %c0_i32 = arith.constant 0 : i32
    %c0_i32_0 = arith.constant 0 : i32
    %c0_i32_1 = arith.constant 0 : i32
    return %c0_i32, %c0_i32_0 : i32, i32
  }
  func.func @transform_7(%arg0: i32) -> (i32, i32) {
    %c0_i32 = arith.constant 0 : i32
    %c0_i32_0 = arith.constant 0 : i32
    %c0_i32_1 = arith.constant 0 : i32
    return %c0_i32, %c0_i32_0 : i32, i32
  }
  func.func @transform_8(%arg0: i32) -> (i32, i32) {
    %c0_i32 = arith.constant 0 : i32
    %c0_i32_0 = arith.constant 0 : i32
    %c0_i32_1 = arith.constant 0 : i32
    return %c0_i32, %c0_i32_0 : i32, i32
  }
  func.func @transform_9(%arg0: i32) -> (i32, i32) {
    %c0_i32 = arith.constant 0 : i32
    %c0_i32_0 = arith.constant 0 : i32
    %c0_i32_1 = arith.constant 0 : i32
    return %c0_i32, %c0_i32_0 : i32, i32
  }
  func.func @transform_10(%arg0: i32) -> (i32, i32) {
    %c0_i32 = arith.constant 0 : i32
    %c0_i32_0 = arith.constant 0 : i32
    %c0_i32_1 = arith.constant 0 : i32
    return %c0_i32, %c0_i32_0 : i32, i32
  }
  func.func @transform_11(%arg0: i32) -> (i32, i32, i32) {
    %c0_i32 = arith.constant 0 : i32
    %c0_i32_0 = arith.constant 0 : i32
    %c0_i32_1 = arith.constant 0 : i32
    return %arg0, %c0_i32, %c0_i32_0 : i32, i32, i32
  }
}

</mosaic_0001>

<bundles_post_ra>
// kernel: convolutional_vq_vae_forward.4
= control target key start
LH: loop header
LB: loop body
LE: loop exit
PB: predicated region body
PF: predicated region fallthrough
CT: control target
= control target key end

     0   :  { %s592_s18 = smov 0   ;;  %s668_s0 = inlined_call_operand.vmem [shape: f32[2,9,16], index: 0, kind: input, shape index: {}]   ;;  %s669_s1 = inlined_call_operand.vmem [shape: f32[32,16], index: 1, kind: input, shape index: {}]   ;;  %s670_s2 = inlined_call_operand.vmem [shape: f32[1,32], index: 2, kind: input, shape index: {}]   ;;  %s671_s3 = inlined_call_operand.vmem [shape: f32[2,9,16], index: 3, kind: output, shape index: {0}]   ;;  %s672_s4 = inlined_call_operand.vmem [shape: f32[2,1,32], index: 4, kind: output, shape index: {1}]   ;;  %s673_s5 = inlined_call_operand.vmem [shape: f32[2,1,1], index: 5, kind: output, shape index: {2}]  }
   0x1 LB: > { %s514_s19 = sadd.s32 4294967295, %s559_s18   ;;  %p518_p0 = scmp.ge.s32.totalorder %s559_s18, 1  ;;  %s559_s18 = sphi %s592_s18, %s16_s18  }
   0x2   : > { %p192_p1 = scmp.lt.s32.totalorder %s559_s18, 3 }
   0x4   : > { %p193_p2 = pnand %p518_p0, %p192_p1 }
   0x5   : > { %p226_p3 = scmp.lt.s32.totalorder (!%p193_p2), %s514_s19, 1 }
   0x6   : > { %196 = sbr.rel (%p193_p2) target bundleno = 842 (0x34a), region = 32 }
   0xb   : > { %v247_v0 = vld [vmem:[%s669_s1 + $0x18] sm:$0xff]  ;;  %vm248_vm0 = vcmask 130048   ;;  %v246_v1 = vld [vmem:[%s669_s1 + $0x10] sm:$0xff]  ;;  %s675_s19 = smov (!%p226_p3, %s514_s19), 1  ;;  %v245_v2 = vld [vmem:[%s669_s1 + $0x8] sm:$0xff]  ;;  %vm298_vm1 = vcmask 261120   ;;  %v306_v15 = vlaneseq }
   0xc   : > { %523 = vmatpush.xpose.msk.msra.mxu0 %vm248_vm0, %v247_v0  ;;  %537 = vmatpush.xpose.msk.msra.mxu2 %vm248_vm0, %v247_v0  ;;  %v244_v3 = vld [vmem:[%s669_s1] sm:$0xff]  ;;  %s535_s28 = sshll.u32 %s675_s19, 4  ;;  %vm302_vm2 = vcmask 253952   ;;  %v561_v41 = vmov 0.0   ;;  %s238_s11 = scalar_lea.vmem %s672_s4, %s675_s19  ;;  %vm378_vm9 = vcmask 122880   ;;  %vm407_vm10 = vcmask 0  }
   0xd   : > { %366 = vmatpush.msra.mxu1 %v247_v0  ;;  %s230_s6 = scalar_lea.vmem %s668_s0, %s535_s28  ;;  %v552_v6 = vld [vmem:[%s670_s2] ss:$0 sm:$0xff]  ;;  %v307_v16 = vand.u32 127, %v306_v15  ;;  %s235_s14 = scalar_lea.vmem %s671_s3, %s535_s28 }
   0xe   : > { %v628_v4 = vld [vmem:[%s230_s6] sm:$0xff]  ;;  %v630_v5 = vld [vmem:[%s230_s6 + $0x8] sm:$0x1]  ;;  %s241_s17 = scalar_lea.vmem %s673_s5, %s675_s19 }
   0xf   : > { %367 = vmatpush.msra.mxu1 %v246_v1 }
  0x10   : > { %524 = vmatpush.xpose.msk.msra.mxu0 %vm248_vm0, %v246_v1  ;;  %538 = vmatpush.xpose.msk.msra.mxu2 %vm248_vm0, %v246_v1 }
  0x11   : > { %368 = vmatpush.msra.mxu1 %v245_v2 }
  0x13   : > { %369 = vmatpush.msra.mxu1 %v244_v3 }
  0x14   : > { %525 = vmatpush.xpose.msk.msra.mxu0 %vm248_vm0, %v245_v2  ;;  %539 = vmatpush.xpose.msk.msra.mxu2 %vm248_vm0, %v245_v2 }
  0x18   : > { %526 = vmatpush.xpose.msk.msra.mxu0 %vm248_vm0, %v244_v3  ;;  %540 = vmatpush.xpose.msk.msra.mxu2 %vm248_vm0, %v244_v3 }
  0x1b   : > { %527 = vmatmul.msk.f32.vlgmr.msra.gmra.mxu0 %vm248_vm0, %v628_v4  ;;  %528 = vmatmul.msk.f32.vlgmr.msra.gmra.mxu2 %vm248_vm0, %v630_v5 }
  0x98   : > { %v284_v7 = vpop.f32.mrf.mxu0 }
  0x99   : > { %v291_v8 = vmul.f32 2.0, %v284_v7 }
  0x9b   : > { %v296_v9 = vsub.f32 %v552_v6, %v291_v8 }
  0x9d   : > { %v299_v10 = vsel %vm298_vm1, %v296_v9, inf }
  0x9e   : > { %300 = vmin.xlane.f32.xlu0 %v299_v10  ;;  %v287_v11 = vpop.f32.mrf.mxu2 }
  0x9f   : > { %v292_v12 = vmul.f32 2.0, %v287_v11 }
  0xa1   : > { %v297_v13 = vsub.f32 %v552_v6, %v292_v12 }
  0xa3   : > { %v303_v14 = vsel %vm302_vm2, %v297_v13, inf }
  0xa6   : > { %304 = vmin.xlane.f32.xlu0 %v303_v14 }
 0x111   : > { %v301_v17 = vpop.xlane.xlu0 %300 }
 0x112   : > { %vm308_vm3 = vcmp.le.f32.partialorder %v296_v9, %v301_v17 }
 0x113   : > { %v310_v18 = vsel %vm308_vm3, %v307_v16, 32 }
 0x114   : > { %v312_v19 = vsel %vm298_vm1, %v310_v18, 2147483647 }
 0x115   : > { %v314_v20 = vshra.s32 %v312_v19, 16  ;;  %v313_v27 = vand.u32 65535, %v312_v19 }
 0x117   : > { %v316_v21 = vcvt.s32.f32 %v314_v20  ;;  %v315_v29 = vcvt.s32.f32 %v313_v27 }
 0x119   : > { %317 = vmin.xlane.f32.xlu1 %v316_v21  ;;  %v305_v22 = vpop.xlane.xlu0 %304 }
 0x11a   : > { %vm309_vm4 = vcmp.le.f32.partialorder %v297_v13, %v305_v22 }
 0x11b   : > { %v311_v23 = vsel %vm309_vm4, %v307_v16, 32 }
 0x11c   : > { %v327_v24 = vsel %vm302_vm2, %v311_v23, 2147483647 }
 0x11d   : > { %v329_v25 = vshra.s32 %v327_v24, 16  ;;  %v328_v31 = vand.u32 65535, %v327_v24 }
 0x11f   : > { %v331_v26 = vcvt.s32.f32 %v329_v25  ;;  %v330_v33 = vcvt.s32.f32 %v328_v31 }
 0x121   : > { %332 = vmin.xlane.f32.xlu1 %v331_v26 }
 0x18c   : > { %v318_v28 = vpop.xlane.xlu1 %317 }
 0x18d   : > { %vm319_vm5 = vcmp.eq.f32.partialorder %v316_v21, %v318_v28  ;;  %v324_v35 = vcvt.f32.s32 %v318_v28 }
 0x18e   : > { %v320_v30 = vsel %vm319_vm5, %v315_v29, inf }
 0x18f   : > { %321 = vmin.xlane.f32.xlu2 %v320_v30  ;;  %v325_v37 = vshll.u32 %v324_v35, 16 }
 0x194   : > { %v333_v32 = vpop.xlane.xlu1 %332 }
 0x195   : > { %vm334_vm6 = vcmp.eq.f32.partialorder %v331_v26, %v333_v32  ;;  %v339_v40 = vcvt.f32.s32 %v333_v32 }
 0x196   : > { %v335_v34 = vsel %vm334_vm6, %v330_v33, inf }
 0x197   : > { %336 = vmin.xlane.f32.xlu2 %v335_v34  ;;  %v340_v44 = vshll.u32 %v339_v40, 16 }
 0x202   : > { %v322_v36 = vpop.xlane.xlu2 %321 }
 0x203   : > { %v323_v38 = vcvt.f32.s32 %v322_v36 }
 0x205   : > { %v326_v39 = vadd.s32 %v325_v37, %v323_v38 }
 0x207   : > { %vm342_vm7 = vcmp.eq.s32.totalorder %v307_v16, %v326_v39 }
 0x208   : > { %v529_v42 = vsel %vm342_vm7, 1.0, %v561_v41 }
 0x209   : > { %531 = vmatmul.msk.f32.vlgmr.msra.gmra.mxu1 %vm298_vm1, %v529_v42  ;;  %v380_v48 = vsel %vm298_vm1, %v529_v42, 0.0 }
 0x20a   : > { %v337_v43 = vpop.xlane.xlu2 %336 }
 0x20b   : > { %v338_v45 = vcvt.f32.s32 %v337_v43 }
 0x20d   : > { %v341_v46 = vadd.s32 %v340_v44, %v338_v45 }
 0x20f   : > { %vm343_vm8 = vcmp.eq.s32.totalorder %v307_v16, %v341_v46 }
 0x210   : > { %v530_v47 = vsel %vm343_vm8, 1.0, %v561_v41 }
 0x211   : > { %532 = vmatmul.msk.f32.gmra.mxu1 %vm298_vm1, %v530_v47  ;;  %v381_v49 = vsel %vm302_vm2, %v530_v47, 0.0 }
 0x212   : > { %v382_v50 = vadd.f32 %v381_v49, %v380_v48 }
 0x214   : > { %v383_v51 = vrot.slane %v382_v50, 4 }
 0x216   : > { %v384_v52 = vadd.f32 %v383_v51, %v382_v50 }
 0x218   : > { %v385_v53 = vrot.slane %v384_v52, 2 }
 0x21a   : > { %v386_v54 = vadd.f32 %v385_v53, %v384_v52 }
 0x21c   : > { %v387_v55 = vrot.slane %v386_v54, 1 }
 0x21e   : > { %v388_v56 = vadd.f32 %v387_v55, %v386_v54 }
 0x220   : > { %389 = vst.msk [vmem:[%s238_s11] sm:$0x1] %vm302_vm2, %v388_v56 }
 0x286   : > { %v371_v57 = vpop.f32.mrf.mxu1 }
 0x287   : > { %377 = vst.msk [vmem:[%s235_s14] sm:$0xff] %vm248_vm0, %v371_v57  ;;  %v390_v58 = vsub.f32 %v371_v57, %v628_v4 }
 0x289   : > { %v392_v60 = vmul.f32 %v390_v58, %v390_v58 }
 0x28b   : > { %v394_v63 = vsel %vm248_vm0, %v392_v60, 0.0 }
 0x28e   : > { %v374_v59 = vpop.f32.mrf.mxu1 }
 0x28f   : > { %379 = vst.msk [vmem:[%s235_s14 + $0x8] sm:$0x1] %vm378_vm9, %v374_v59  ;;  %v391_v61 = vsub.f32 %v374_v59, %v630_v5 }
 0x291   : > { %v393_v62 = vmul.f32 %v391_v61, %v391_v61 }
 0x293   : > { %v395_v0 = vsel %vm378_vm9, %v393_v62, 0.0 }
 0x294   : > { %v396_v1 = vadd.f32 %v395_v0, %v394_v63 }
 0x296   : > { %397 = vadd.xlane.f32.xlu0 %v396_v1 }
 0x309   : > { %v398_v2 = vpop.xlane.xlu0 %397 }
 0x30a   : > { %v399_v3 = vrot.slane %v398_v2, 4 }
 0x30c   : > { %v400_v6 = vadd.f32 %v399_v3, %v398_v2 }
 0x30e   : > { %v401_v7 = vrot.slane %v400_v6, 2 }
 0x310   : > { %v402_v8 = vadd.f32 %v401_v7, %v400_v6 }
 0x312   : > { %v403_v9 = vrot.slane %v402_v8, 1 }
 0x314   : > { %v404_v4 = vadd.f32 %v403_v9, %v402_v8 }
 0x316   : > { %541 = vpush %v404_v4 }
 0x347   : > { %s542_s20 = spop %541 }
 0x348   : > { %v406_v5 = vstv %s542_s20 }
 0x349   : > { %408 = vst.msk [vmem:[%s241_s17] sm:$0x1] %vm407_vm10, %v406_v5 }
 0x34a PF: > { %s16_s18 = sadd.s32 1, %s559_s18  }
 0x34b   : > { %p13_p4 = scmp.ge.s32.totalorder %s16_s18, 4  }
 0x34d   :  { %15 = sbr.rel (!%p13_p4) target bundleno = 1 (0x1), region = 86 }

// kernel: convolutional_vq_vae_forward.3
= control target key start
LH: loop header
LB: loop body
LE: loop exit
PB: predicated region body
PF: predicated region fallthrough
CT: control target
= control target key end

     0   :  { %20 = vsyncpa [#allocation3], 0  ;;  %s1600_s18 = smov 0   ;;  %s2080_s0 = inlined_call_operand.vmem [shape: f32[2,16,4], index: 0, kind: input, shape index: {}]   ;;  %s2081_s1 = inlined_call_operand.vmem [shape: f32[12,32], index: 1, kind: input, shape index: {}]   ;;  %s2082_s2 = inlined_call_operand.vmem [shape: f32[1,32], index: 2, kind: input, shape index: {}]   ;;  %s2083_s3 = inlined_call_operand.vmem [shape: f32[96,32], index: 3, kind: input, shape index: {}]   ;;  %s2084_s4 = inlined_call_operand.vmem [shape: f32[1,32], index: 4, kind: input, shape index: {}]   ;;  %s2085_s5 = inlined_call_operand.vmem [shape: f32[128,32], index: 5, kind: input, shape index: {}]   ;;  %s2086_s6 = inlined_call_operand.vmem [shape: f32[1,32], index: 6, kind: input, shape index: {}]   ;;  %s2087_s7 = inlined_call_operand.vmem [shape: f32[96,32], index: 7, kind: input, shape index: {}]   ;;  %s2088_s8 = inlined_call_operand.vmem [shape: f32[1,32], index: 8, kind: input, shape index: {}]   ;;  %s2089_s9 = inlined_call_operand.vmem [shape: f32[96,32], index: 9, kind: input, shape index: {}]   ;;  %s2090_s10 = inlined_call_operand.hbm [shape: f32[1,32], index: 10, kind: input, shape index: {}]   ;;  %s2091_s11 = inlined_call_operand.vmem [shape: f32[2,96,16], index: 11, kind: input, shape index: {}]   ;;  %s2092_s12 = inlined_call_operand.vmem [shape: f32[2,16,32], index: 12, kind: input, shape index: {}]   ;;  %s2093_s13 = inlined_call_operand.vmem [shape: f32[96,16], index: 13, kind: input, shape index: {}]   ;;  %s2094_s14 = inlined_call_operand.vmem [shape: f32[1,16], index: 14, kind: input, shape index: {}]   ;;  %s2095_s15 = inlined_call_operand.vmem [shape: f32[2,9,16], index: 15, kind: output, shape index: {}]  }
   0x1 LB: > { %s1387_s19 = sadd.s32 4294967295, %s1511_s18   ;;  %p1389_p0 = scmp.ge.s32.totalorder %s1511_s18, 1  ;;  %s1511_s18 = sphi %s1600_s18, %s26_s18  }
   0x2   : > { %p377_p1 = scmp.lt.s32.totalorder %s1511_s18, 3  ;;  %s416_s22 = sshll.u32 %s2090_s10, 4  ;;  %s417_s22 = int_to_ptr.hbm [resolvable:$true] %s416_s22 }
   0x3   : > { %p1448_p3 = scmp.eq.s32.totalorder %s1387_s19, 0  ;;  %s1513_s23 = smov [#allocation2]  }
   0x4   : > { %p378_p2 = pnand %p1389_p0, %p377_p1  ;;  %s418_s24 = sshll.u32 %s1513_s23, 4  ;;  %s419_s24 = int_to_ptr.vmem [resolvable:$true] %s418_s24 }
   0x6   : > { %p1444_p4 = pneg %p378_p2  ;;  %451 = sbr.rel (%p378_p2) target bundleno = 2550 (0x9f6), region = 80 }
   0x8   : > { %p1445_p5 = pnand %p1448_p3, %p1444_p4 }
   0xa   : > { %1447 = dma.hbm_to_vmem [thread:$0]  (!%p1445_p5), %s417_s22, 16, %s419_s24, [#allocation3]  }
   0xb   : > { %1506 = dma.done.wait (%p1448_p3), [#allocation3], 16  }
   0xc   : > { %1508 = vsyncadd (%p1448_p3), [#allocation3], 4294967280  ;;  %p500_p6 = scmp.lt.s32.totalorder %s1387_s19, 1  ;;  %vm517_vm0 = vcmask 1040384   ;;  %vm528_vm1 = vcmask 1046528   ;;  %s1514_s29 = smov 4  }
   0xd   : > { %vm540_vm2 = vcmask 1045504   ;;  %s1515_s30 = smov 8   ;;  %v513_v17 = vld [vmem:[%s2081_s1 + $0x8] sm:$0xf]  ;;  %vm568_vm3 = vcmask 1043456   ;;  %v512_v18 = vld [vmem:[%s2081_s1] sm:$0xff] }
   0xe   : > { %s2097_s19 = smov (!%p500_p6, %s1387_s19), 1  ;;  %1398 = vmatpush.msk.msra.mxu1 %vm568_vm3, %v513_v17  ;;  %vm552_vm4 = vcmask 31744   ;;  %vm555_vm5 = vcmask 64512   ;;  %vm561_vm6 = vcmask 97280   ;;  %v608_v27 = vld [vmem:[%s2083_s3 + $0x58] sm:$0xff]  ;;  %v607_v28 = vld [vmem:[%s2083_s3 + $0x50] sm:$0xff] }
   0xf   : > { %s1438_s25 = sshll.u32 %s2097_s19, 4  ;;  %v1465_v29 = vld [vmem:[%s2082_s2] ss:$0 sm:$0xff]  ;;  %v606_v30 = vld [vmem:[%s2083_s3 + $0x48] sm:$0xff]  ;;  %v604_v34 = vld [vmem:[%s2083_s3 + $0x38] sm:$0xff]  ;;  %s1516_s27 = smov 64  }
  0x10   : > { %s504_s28 = scalar_lea.vmem %s2080_s0, %s1438_s25  ;;  %587 = vmatpush.msra.mxu1 %v512_v18  ;;  %v605_v32 = vld [vmem:[%s2083_s3 + $0x40] sm:$0xff]  ;;  %v603_v36 = vld [vmem:[%s2083_s3 + $0x30] sm:$0xff]  ;;  %v602_v37 = vld [vmem:[%s2083_s3 + $0x28] sm:$0xff]  ;;  %vm644_vm7 = vcmask 261120   ;;  %vm647_vm8 = vcmask 523264   ;;  %vm653_vm9 = vcmask 785408   ;;  %s509_s23 = scalar_lea.vmem %s2095_s15, %s1438_s25 }
  0x11   : > { %v510_v0 = vld [vmem:[%s504_s28] sm:$0xff]  ;;  %v511_v1 = vld [vmem:[%s504_s28 + $0x8] sm:$0xff]  ;;  %s1517_s28 = smov 32   ;;  %v600_v57 = vld [vmem:[%s2083_s3 + $0x18] sm:$0xff]  ;;  %vm706_vm10 = vcmask 1041408   ;;  %vm745_vm11 = vcmask 1044480  }
  0x12   : > { %v518_v2 = vrot.slane %v510_v0, 7  ;;  %v519_v3 = vrot.slane %v511_v1, 7  ;;  %664 = vmatpush.msrb.mxu1 %v608_v27  ;;  %v601_v56 = vld [vmem:[%s2083_s3 + $0x20] sm:$0xff]  ;;  %v599_v58 = vld [vmem:[%s2083_s3 + $0x10] sm:$0xff]  ;;  %v598_v59 = vld [vmem:[%s2083_s3 + $0x8] sm:$0xff]  ;;  %s1518_s24 = smov 96  }
  0x13   : > { %v597_v60 = vld [vmem:[%s2083_s3] sm:$0xff]  ;;  %vm811_vm13 = vcmask 138240   ;;  %vm1090_vm15 = vcmask 130048  }
  0x14   : > { %v520_v4 = vsel %vm517_vm0, %v518_v2, %v519_v3  ;;  %v524_v5 = vsel %vm517_vm0, 0.0, %v518_v2  ;;  %v525_v6 = vsel %vm517_vm0, %v519_v3, 0.0  ;;  %665 = vmatpush.msrb.mxu1 %v607_v28 }
  0x15   : > { %v529_v7 = vrot.slane %v524_v5, 1  ;;  %v530_v8 = vrot.slane %v520_v4, 1  ;;  %v532_v9 = vrot.slane %v525_v6, 1  ;;  %v541_v12 = vrot.slane %v524_v5, 2 }
  0x16   : > { %v542_v13 = vrot.slane %v520_v4, 2  ;;  %v544_v14 = vrot.slane %v525_v6, 2  ;;  %666 = vmatpush.msrb.mxu1 %v606_v30 }
  0x17   : > { %v531_v10 = vsel %vm528_vm1, %v529_v7, %v530_v8  ;;  %v533_v11 = vsel %vm528_vm1, %v530_v8, %v532_v9 }
  0x18   : > { %534 = vrot.lane.b32.xlu0 %v531_v10, %s1514_s29  ;;  %536 = vrot.lane.b32.xlu1 %v533_v11, %s1514_s29  ;;  %v543_v15 = vsel %vm540_vm2, %v541_v12, %v542_v13  ;;  %v545_v16 = vsel %vm540_vm2, %v542_v13, %v544_v14  ;;  %v702_v10 = vld [vmem:[%s2085_s5 + $0x78] sm:$0xff]  ;;  %v701_v11 = vld [vmem:[%s2085_s5 + $0x70] sm:$0xff] }
  0x19   : > { %667 = vmatpush.msrb.mxu1 %v605_v32  ;;  %772 = vmatpush.msra.mxu2 %v702_v10  ;;  %v700_v13 = vld [vmem:[%s2085_s5 + $0x68] sm:$0xff]  ;;  %v1467_v10 = vld [vmem:[%s2086_s6] ss:$0 sm:$0xff] }
  0x1b   : > { %668 = vmatpush.msrb.mxu1 %v604_v34  ;;  %773 = vmatpush.msra.mxu2 %v701_v11 }
  0x1d   : > { %669 = vmatpush.msrb.mxu1 %v603_v36  ;;  %774 = vmatpush.msra.mxu2 %v700_v13 }
  0x1f   : > { %670 = vmatpush.msrb.mxu1 %v602_v37  ;;  %v699_v37 = vld [vmem:[%s2085_s5 + $0x60] sm:$0xff] }
  0x20   : > { %546 = vrot.lane.b32.xlu0 %v543_v15, %s1515_s30  ;;  %548 = vrot.lane.b32.xlu1 %v545_v16, %s1515_s30 }
  0x21   : > { %671 = vmatpush.msrb.mxu1 %v601_v56  ;;  %775 = vmatpush.msra.mxu2 %v699_v37  ;;  %v855_v37 = vld [vmem:[%s2087_s7 + $0x48] sm:$0xff] }
  0x23   : > { %672 = vmatpush.msrb.mxu1 %v600_v57 }
  0x25   : > { %673 = vmatpush.msrb.mxu1 %v599_v58 }
  0x27   : > { %674 = vmatpush.msrb.mxu1 %v598_v59 }
  0x29   : > { %675 = vmatpush.msrb.mxu1 %v597_v60 }
  0x8a   : > { %v535_v19 = vpop.permute.xlu0 %534  ;;  %v537_v20 = vpop.permute.xlu1 %536 }
  0x8b   : > { %v553_v21 = vsel %vm552_vm4, %v524_v5, %v535_v19  ;;  %v554_v24 = vsel %vm552_vm4, %v520_v4, %v537_v20  ;;  %v1466_v5 = vld [vmem:[%s2084_s4] ss:$0 sm:$0xff] }
  0x92   : > { %v547_v22 = vpop.permute.xlu0 %546  ;;  %v549_v25 = vpop.permute.xlu1 %548 }
  0x93   : > { %v556_v23 = vsel %vm555_vm5, %v553_v21, %v547_v22  ;;  %v557_v26 = vsel %vm555_vm5, %v554_v24, %v549_v25 }
  0x94   : > { %1399 = vmatmul.msk.f32.vlgmr.msra.gmra.mxu1 %vm561_vm6, %v556_v23 }
  0x9c   : > { %1400 = vmatmul.msk.f32.gmra.mxu1 %vm561_vm6, %v557_v26 }
 0x111   : > { %v589_v31 = vpop.f32.mrf.mxu1 }
 0x112   : > { %v590_v33 = vadd.f32 %v1465_v29, %v589_v31 }
 0x114   : > { %v595_v35 = vmax.f32 %v590_v33, 0.0 }
 0x116   : > { %v612_v38 = vrot.slane %v595_v35, 7 }
 0x118   : > { %v618_v42 = vsel %vm517_vm0, 0.0, %v612_v38 }
 0x119   : > { %v592_v39 = vpop.f32.mrf.mxu1  ;;  %v622_v46 = vrot.slane %v618_v42, 1  ;;  %v633_v54 = vrot.slane %v618_v42, 2 }
 0x11a   : > { %v1656_v40 = vadd.f32 %v1465_v29, %v592_v39  ;;  %v697_v39 = vld [vmem:[%s2085_s5 + $0x50] sm:$0xff] }
 0x11c   : > { %v596_v41 = vmax.f32 %v1656_v40, 0.0  ;;  %v696_v40 = vld [vmem:[%s2085_s5 + $0x48] sm:$0xff] }
 0x11e   : > { %v613_v43 = vrot.slane %v596_v41, 7 }
 0x120   : > { %v614_v44 = vsel %vm517_vm0, %v612_v38, %v613_v43  ;;  %v619_v45 = vsel %vm517_vm0, %v613_v43, 0.0  ;;  %v698_v38 = vld [vmem:[%s2085_s5 + $0x58] sm:$0xff]  ;;  %v693_v43 = vld [vmem:[%s2085_s5 + $0x30] sm:$0xff] }
 0x121   : > { %v625_v47 = vrot.slane %v619_v45, 1  ;;  %v636_v48 = vrot.slane %v619_v45, 2  ;;  %v634_v49 = vrot.slane %v614_v44, 2  ;;  %v623_v50 = vrot.slane %v614_v44, 1  ;;  %776 = vmatpush.msra.mxu2 %v698_v38  ;;  %v691_v45 = vld [vmem:[%s2085_s5 + $0x20] sm:$0xff] }
 0x122   : > { %v854_v38 = vld [vmem:[%s2087_s7 + $0x40] sm:$0xff] }
 0x123   : > { %v637_v51 = vsel %vm540_vm2, %v634_v49, %v636_v48  ;;  %v626_v52 = vsel %vm528_vm1, %v623_v50, %v625_v47  ;;  %v624_v53 = vsel %vm528_vm1, %v622_v46, %v623_v50  ;;  %v635_v55 = vsel %vm540_vm2, %v633_v54, %v634_v49  ;;  %777 = vmatpush.msra.mxu2 %v697_v39  ;;  %v690_v46 = vld [vmem:[%s2085_s5 + $0x18] sm:$0xff]  ;;  %v689_v47 = vld [vmem:[%s2085_s5 + $0x10] sm:$0xff]  ;;  %v688_v48 = vld [vmem:[%s2085_s5 + $0x8] sm:$0xff] }
 0x124   : > { %640 = vrot.lane.b32.xlu1 %v637_v51, %s1516_s27  ;;  %629 = vrot.lane.b32.xlu0 %v626_v52, %s1517_s28  ;;  %v687_v49 = vld [vmem:[%s2085_s5] sm:$0xff]  ;;  %v853_v39 = vld [vmem:[%s2087_s7 + $0x38] sm:$0xff] }
 0x125   : > { %627 = vrot.lane.b32.xlu2 %v624_v53, %s1517_s28  ;;  %778 = vmatpush.msra.mxu2 %v696_v40  ;;  %v852_v40 = vld [vmem:[%s2087_s7 + $0x30] sm:$0xff] }
 0x12d   : > { %638 = vrot.lane.b32.xlu2 %v635_v55, %s1516_s27 }
 0x17f   : > { %v628_v61 = vpop.permute.xlu2 %627 }
 0x180   : > { %v645_v62 = vsel %vm644_vm7, %v618_v42, %v628_v61  ;;  %v694_v42 = vld [vmem:[%s2085_s5 + $0x38] sm:$0xff] }
 0x187   : > { %v639_v63 = vpop.permute.xlu2 %638 }
 0x188   : > { %v648_v0 = vsel %vm647_vm8, %v645_v62, %v639_v63 }
 0x189   : > { %1401 = vmatmul.msk.f32.vlgmr.msrb.gmra.mxu1 %vm653_vm9, %v648_v0 }
 0x196   : > { %v641_v1 = vpop.permute.xlu1 %640  ;;  %v630_v2 = vpop.permute.xlu0 %629 }
 0x197   : > { %v646_v3 = vsel %vm644_vm7, %v614_v44, %v630_v2  ;;  %v692_v44 = vld [vmem:[%s2085_s5 + $0x28] sm:$0xff] }
 0x198   : > { %v649_v4 = vsel %vm647_vm8, %v646_v3, %v641_v1 }
 0x199   : > { %1402 = vmatmul.msk.f32.gmra.mxu1 %vm653_vm9, %v649_v4 }
 0x206   : > { %v677_v6 = vpop.f32.mrf.mxu1 }
 0x207   : > { %v678_v7 = vadd.f32 %v1466_v5, %v677_v6 }
 0x209   : > { %v683_v8 = vmax.f32 %v678_v7, 0.0 }
 0x20b   : > { %v685_v9 = vadd.f32 %v683_v8, %v595_v35 }
 0x20d   : > { %v707_v15 = vrot.slane %v685_v9, 6 }
 0x20f   : > { %v713_v18 = vsel %vm706_vm10, 0.0, %v707_v15 }
 0x210   : > { %v746_v21 = vrot.slane %v713_v18, 3  ;;  %v731_v22 = vrot.slane %v713_v18, 2  ;;  %v717_v25 = vrot.slane %v713_v18, 1 }
 0x216   : > { %v680_v12 = vpop.f32.mrf.mxu1 }
 0x217   : > { %v681_v14 = vadd.f32 %v1466_v5, %v680_v12  ;;  %v798_v5 = vlaneseq }
 0x219   : > { %v684_v16 = vmax.f32 %v681_v14, 0.0  ;;  %v799_v7 = vshrl.u32 %v798_v5, 7  ;;  %v802_v8 = vand.u32 127, %v798_v5 }
 0x21b   : > { %v686_v17 = vadd.f32 %v684_v16, %v596_v41  ;;  %v695_v41 = vld [vmem:[%s2085_s5 + $0x40] sm:$0xff]  ;;  %v803_v9 = vmul.u32 2, %v799_v7  ;;  %v800_v13 = vadd.s32 8, %v799_v7  ;;  %v1519_v16 = vmov 0.0  }
 0x21c   : > { %779 = vmatpush.msra.mxu2 %v695_v41  ;;  %v851_v41 = vld [vmem:[%s2087_s7 + $0x28] sm:$0xff] }
 0x21d   : > { %v708_v19 = vrot.slane %v686_v17, 6  ;;  %vm805_vm12 = vcmp.eq.s32.totalorder %v802_v8, %v803_v9 }
 0x21e   : > { %780 = vmatpush.msra.mxu2 %v694_v42  ;;  %v1403_v17 = vsel %vm805_vm12, 1.0, %v1519_v16  ;;  %v850_v42 = vld [vmem:[%s2087_s7 + $0x20] sm:$0xff] }
 0x21f   : > { %v1705_v20 = vsel %vm706_vm10, %v707_v15, %v708_v19  ;;  %v714_v30 = vsel %vm706_vm10, %v708_v19, 0.0 }
 0x220   : > { %v747_v23 = vrot.slane %v1705_v20, 3  ;;  %v732_v24 = vrot.slane %v1705_v20, 2  ;;  %v718_v26 = vrot.slane %v1705_v20, 1  ;;  %v749_v31 = vrot.slane %v714_v30, 3  ;;  %781 = vmatpush.msra.mxu2 %v693_v43  ;;  %v849_v43 = vld [vmem:[%s2087_s7 + $0x18] sm:$0xff] }
 0x221   : > { %v734_v32 = vrot.slane %v714_v30, 2  ;;  %v720_v33 = vrot.slane %v714_v30, 1 }
 0x222   : > { %v748_v27 = vsel %vm745_vm11, %v746_v21, %v747_v23  ;;  %v733_v28 = vsel %vm540_vm2, %v731_v22, %v732_v24  ;;  %v719_v29 = vsel %vm528_vm1, %v717_v25, %v718_v26  ;;  %v750_v34 = vsel %vm745_vm11, %v747_v23, %v749_v31  ;;  %782 = vmatpush.msra.mxu2 %v692_v44  ;;  %v848_v44 = vld [vmem:[%s2087_s7 + $0x10] sm:$0xff] }
 0x223   : > { %751 = vrot.lane.b32.xlu1 %v748_v27, %s1518_s24  ;;  %736 = vrot.lane.b32.xlu0 %v733_v28, %s1516_s27  ;;  %v735_v35 = vsel %vm540_vm2, %v732_v24, %v734_v32  ;;  %v721_v36 = vsel %vm528_vm1, %v718_v26, %v720_v33 }
 0x224   : > { %722 = vrot.lane.b32.xlu2 %v719_v29, %s1517_s28  ;;  %783 = vmatpush.msra.mxu2 %v691_v45  ;;  %v847_v45 = vld [vmem:[%s2087_s7 + $0x8] sm:$0xff] }
 0x226   : > { %784 = vmatpush.msra.mxu2 %v690_v46  ;;  %v846_v46 = vld [vmem:[%s2087_s7] sm:$0xff] }
 0x228   : > { %785 = vmatpush.msra.mxu2 %v689_v47 }
 0x22a   : > { %786 = vmatpush.msra.mxu2 %v688_v48 }
 0x22b   : > { %753 = vrot.lane.b32.xlu1 %v750_v34, %s1518_s24  ;;  %738 = vrot.lane.b32.xlu0 %v735_v35, %s1516_s27  ;;  %v857_v35 = vld [vmem:[%s2087_s7 + $0x58] sm:$0xff] }
 0x22c   : > { %724 = vrot.lane.b32.xlu2 %v721_v36, %s1517_s28  ;;  %787 = vmatpush.msra.mxu2 %v687_v49  ;;  %v856_v36 = vld [vmem:[%s2087_s7 + $0x50] sm:$0xff] }
 0x22d   : > { %905 = vmatpush.msra.mxu0 %v857_v35 }
 0x22f   : > { %906 = vmatpush.msra.mxu0 %v856_v36 }
 0x231   : > { %907 = vmatpush.msra.mxu0 %v855_v37 }
 0x233   : > { %755 = vrot.lane.b32.xlu1 %v749_v31, %s1518_s24  ;;  %740 = vrot.lane.b32.xlu0 %v734_v32, %s1516_s27 }
 0x234   : > { %726 = vrot.lane.b32.xlu2 %v720_v33, %s1517_s28  ;;  %908 = vmatpush.msra.mxu0 %v854_v38 }
 0x236   : > { %909 = vmatpush.msra.mxu0 %v853_v39 }
 0x238   : > { %910 = vmatpush.msra.mxu0 %v852_v40 }
 0x23a   : > { %911 = vmatpush.msra.mxu0 %v851_v41 }
 0x23c   : > { %912 = vmatpush.msra.mxu0 %v850_v42 }
 0x23e   : > { %913 = vmatpush.msra.mxu0 %v849_v43 }
 0x240   : > { %914 = vmatpush.msra.mxu0 %v848_v44 }
 0x242   : > { %915 = vmatpush.msra.mxu0 %v847_v45 }
 0x244   : > { %916 = vmatpush.msra.mxu0 %v846_v46 }
 0x27e   : > { %v723_v50 = vpop.permute.xlu2 %722 }
 0x27f   : > { %v760_v51 = vsel %vm644_vm7, %v713_v18, %v723_v50  ;;  %v804_v18 = vmul.u32 2, %v800_v13  ;;  %v937_v13 = vld [vmem:[%s2089_s9 + $0x48] sm:$0xff] }
 0x281   : > { %vm806_vm14 = vcmp.eq.s32.totalorder %v802_v8, %v804_v18  ;;  %v932_v18 = vld [vmem:[%s2089_s9 + $0x20] sm:$0xff] }
 0x282   : > { %v1404_v19 = vsel %vm806_vm14, 1.0, %v1519_v16  ;;  %v934_v16 = vld [vmem:[%s2089_s9 + $0x30] sm:$0xff] }
 0x286   : > { %v725_v56 = vpop.permute.xlu2 %724 }
 0x287   : > { %v761_v57 = vsel %vm644_vm7, %v1705_v20, %v725_v56 }
 0x28e   : > { %v727_v62 = vpop.permute.xlu2 %726 }
 0x28f   : > { %v762_v63 = vsel %vm644_vm7, %v714_v30, %v727_v62 }
 0x295   : > { %v752_v52 = vpop.permute.xlu1 %751  ;;  %v737_v53 = vpop.permute.xlu0 %736 }
 0x296   : > { %v763_v54 = vsel %vm647_vm8, %v760_v51, %v737_v53 }
 0x297   : > { %v766_v55 = vsel %vm653_vm9, %v763_v54, %v752_v52 }
 0x298   : > { %788 = vmatmul.f32.vlgmr.msra.gmra.mxu2 %v766_v55  ;;  %v1468_v55 = vld [vmem:[%s2088_s8] ss:$0 sm:$0xff] }
 0x29d   : > { %v754_v58 = vpop.permute.xlu1 %753  ;;  %v739_v59 = vpop.permute.xlu0 %738 }
 0x29e   : > { %v764_v60 = vsel %vm647_vm8, %v761_v57, %v739_v59 }
 0x29f   : > { %v767_v61 = vsel %vm653_vm9, %v764_v60, %v754_v58 }
 0x2a0   : > { %791 = vmatmul.f32.gmra.mxu2 %v767_v61 }
 0x2a5   : > { %v756_v0 = vpop.permute.xlu1 %755  ;;  %v741_v1 = vpop.permute.xlu0 %740 }
 0x2a6   : > { %v765_v2 = vsel %vm647_vm8, %v762_v63, %v741_v1 }
 0x2a7   : > { %v768_v3 = vsel %vm653_vm9, %v765_v2, %v756_v0 }
 0x2a8   : > { %794 = vmatmul.f32.gmra.mxu2 %v768_v3 }
 0x31b   : > { %v789_v4 = vpop.f32.mrf.mxu2 }
 0x31c   : > { %v790_v15 = vadd.f32 %v1467_v10, %v789_v4 }
 0x323   : > { %v792_v6 = vpop.f32.mrf.mxu2 }
 0x324   : > { %v793_v14 = vadd.f32 %v1467_v10, %v792_v6 }
 0x32b   : > { %v795_v11 = vpop.f32.mrf.mxu2 }
 0x32c   : > { %v796_v12 = vadd.f32 %v1467_v10, %v795_v11  ;;  %v939_v11 = vld [vmem:[%s2089_s9 + $0x58] sm:$0xff] }
 0x32e   : > { %1405 = vmatpush.msk.msra.mxu3 %vm517_vm0, %v796_v12  ;;  %v938_v12 = vld [vmem:[%s2089_s9 + $0x50] sm:$0xff] }
 0x330   : > { %835 = vmatpush.msra.mxu3 %v793_v14  ;;  %v936_v14 = vld [vmem:[%s2089_s9 + $0x40] sm:$0xff] }
 0x332   : > { %836 = vmatpush.msra.mxu3 %v790_v15  ;;  %v935_v15 = vld [vmem:[%s2089_s9 + $0x38] sm:$0xff] }
 0x333   : > { %1406 = vmatmul.msk.f32.vlgmr.msra.gmra.mxu3 %vm811_vm13, %v1403_v17  ;;  %v933_v17 = vld [vmem:[%s2089_s9 + $0x28] sm:$0xff] }
 0x334   : > { %987 = vmatpush.msrb.mxu3 %v939_v11 }
 0x336   : > { %988 = vmatpush.msrb.mxu3 %v938_v12 }
 0x338   : > { %989 = vmatpush.msrb.mxu3 %v937_v13 }
 0x33a   : > { %990 = vmatpush.msrb.mxu3 %v936_v14 }
 0x33b   : > { %1407 = vmatmul.msk.f32.gmra.mxu3 %vm811_vm13, %v1404_v19  ;;  %v931_v19 = vld [vmem:[%s2089_s9 + $0x18] sm:$0xff] }
 0x33c   : > { %991 = vmatpush.msrb.mxu3 %v935_v15 }
 0x33e   : > { %992 = vmatpush.msrb.mxu3 %v934_v16 }
 0x340   : > { %993 = vmatpush.msrb.mxu3 %v933_v17 }
 0x342   : > { %994 = vmatpush.msrb.mxu3 %v932_v18 }
 0x344   : > { %995 = vmatpush.msrb.mxu3 %v931_v19 }
 0x3b6   : > { %v838_v20 = vpop.f32.mrf.mxu3 }
 0x3b7   : > { %v844_v21 = vmax.f32 %v838_v20, 0.0  ;;  %v930_v20 = vld [vmem:[%s2089_s9 + $0x10] sm:$0xff] }
 0x3b8   : > { %996 = vmatpush.msrb.mxu3 %v930_v20 }
 0x3b9   : > { %v861_v22 = vrot.slane %v844_v21, 7 }
 0x3bb   : > { %v866_v26 = vsel %vm517_vm0, 0.0, %v861_v22 }
 0x3bc   : > { %v879_v30 = vrot.slane %v866_v26, 2  ;;  %v870_v32 = vrot.slane %v866_v26, 1 }
 0x3be   : > { %v841_v23 = vpop.f32.mrf.mxu3 }
 0x3bf   : > { %v845_v24 = vmax.f32 %v841_v23, 0.0 }
 0x3c1   : > { %v862_v25 = vrot.slane %v845_v24, 7 }
 0x3c3   : > { %v863_v27 = vsel %vm517_vm0, %v861_v22, %v862_v25  ;;  %v928_v22 = vld [vmem:[%s2089_s9] sm:$0xff] }
 0x3c4   : > { %v867_v28 = vsel %vm706_vm10, %v863_v27, 0.0 }
 0x3c5   : > { %v871_v29 = vrot.slane %v867_v28, 1  ;;  %v880_v31 = vrot.slane %v867_v28, 2 }
 0x3c7   : > { %875 = vrot.lane.b32.xlu1 %v871_v29, %s1517_s28  ;;  %v881_v33 = vsel %vm540_vm2, %v879_v30, %v880_v31  ;;  %v872_v34 = vsel %vm528_vm1, %v870_v32, %v871_v29 }
 0x3c8   : > { %882 = vrot.lane.b32.xlu0 %v881_v33, %s1516_s27  ;;  %873 = vrot.lane.b32.xlu2 %v872_v34, %s1517_s28 }
 0x3d0   : > { %884 = vrot.lane.b32.xlu2 %v880_v31, %s1516_s27  ;;  %v1469_v31 = vld [vmem:[#allocation2] ss:$0 sm:$0xff] }
 0x422   : > { %v874_v47 = vpop.permute.xlu2 %873 }
 0x423   : > { %v888_v48 = vsel %vm644_vm7, %v866_v26, %v874_v47 }
 0x42a   : > { %v885_v53 = vpop.permute.xlu2 %884 }
 0x439   : > { %v876_v51 = vpop.permute.xlu1 %875 }
 0x43a   : > { %v883_v49 = vpop.permute.xlu0 %882  ;;  %v889_v52 = vsel %vm644_vm7, %v867_v28, %v876_v51 }
 0x43b   : > { %v890_v50 = vsel %vm647_vm8, %v888_v48, %v883_v49  ;;  %v891_v54 = vsel %vm647_vm8, %v889_v52, %v885_v53  ;;  %v1021_v53 = vld [vmem:[%s2091_s11 + $0x58] sm:$0xff] }
 0x43c   : > { %1408 = vmatmul.msk.f32.vlgmr.msra.gmra.mxu0 %vm653_vm9, %v890_v50  ;;  %1067 = vmatpush.msra.mxu1 %v1021_v53 }
 0x444   : > { %1409 = vmatmul.msk.f32.gmra.mxu0 %vm653_vm9, %v891_v54  ;;  %v1020_v54 = vld [vmem:[%s2091_s11 + $0x50] sm:$0xff] }
 0x445   : > { %1068 = vmatpush.msra.mxu1 %v1020_v54 }
 0x4b9   : > { %v918_v56 = vpop.f32.mrf.mxu0 }
 0x4ba   : > { %v919_v57 = vadd.f32 %v1468_v55, %v918_v56  ;;  %v1018_v56 = vld [vmem:[%s2091_s11 + $0x40] sm:$0xff] }
 0x4bc   : > { %v924_v58 = vmax.f32 %v919_v57, 0.0  ;;  %v1017_v57 = vld [vmem:[%s2091_s11 + $0x38] sm:$0xff] }
 0x4be   : > { %v926_v59 = vadd.f32 %v924_v58, %v844_v21  ;;  %v929_v21 = vld [vmem:[%s2089_s9 + $0x8] sm:$0xff]  ;;  %v1016_v58 = vld [vmem:[%s2091_s11 + $0x30] sm:$0xff] }
 0x4bf   : > { %997 = vmatpush.msrb.mxu3 %v929_v21 }
 0x4c0   : > { %v943_v63 = vrot.slane %v926_v59, 7 }
 0x4c1   : > { %v921_v60 = vpop.f32.mrf.mxu0  ;;  %998 = vmatpush.msrb.mxu3 %v928_v22 }
 0x4c2   : > { %v922_v61 = vadd.f32 %v1468_v55, %v921_v60  ;;  %v948_v2 = vsel %vm517_vm0, 0.0, %v943_v63  ;;  %v1019_v55 = vld [vmem:[%s2091_s11 + $0x48] sm:$0xff]  ;;  %v1014_v60 = vld [vmem:[%s2091_s11 + $0x20] sm:$0xff] }
 0x4c3   : > { %v961_v6 = vrot.slane %v948_v2, 2  ;;  %v952_v8 = vrot.slane %v948_v2, 1  ;;  %1069 = vmatpush.msra.mxu1 %v1019_v55 }
 0x4c4   : > { %v925_v62 = vmax.f32 %v922_v61, 0.0  ;;  %v1013_v61 = vld [vmem:[%s2091_s11 + $0x18] sm:$0xff] }
 0x4c5   : > { %1070 = vmatpush.msra.mxu1 %v1018_v56 }
 0x4c6   : > { %v927_v0 = vadd.f32 %v925_v62, %v845_v24  ;;  %v1012_v62 = vld [vmem:[%s2091_s11 + $0x10] sm:$0xff] }
 0x4c7   : > { %1071 = vmatpush.msra.mxu1 %v1017_v57 }
 0x4c8   : > { %v944_v1 = vrot.slane %v927_v0, 7 }
 0x4c9   : > { %1072 = vmatpush.msra.mxu1 %v1016_v58 }
 0x4ca   : > { %v945_v3 = vsel %vm517_vm0, %v943_v63, %v944_v1  ;;  %v1011_v63 = vld [vmem:[%s2091_s11 + $0x8] sm:$0xff] }
 0x4cb   : > { %v949_v4 = vsel %vm706_vm10, %v945_v3, 0.0  ;;  %v1089_v1 = vld [vmem:[%s2092_s12 + $0x8] sm:$0xff] }
 0x4cc   : > { %v953_v5 = vrot.slane %v949_v4, 1  ;;  %v962_v7 = vrot.slane %v949_v4, 2  ;;  %1111 = vmatpush.msrb.mxu0 %v1089_v1 }
 0x4ce   : > { %957 = vrot.lane.b32.xlu2 %v953_v5, %s1517_s28  ;;  %v963_v9 = vsel %vm540_vm2, %v961_v6, %v962_v7  ;;  %v954_v10 = vsel %vm528_vm1, %v952_v8, %v953_v5 }
 0x4cf   : > { %964 = vrot.lane.b32.xlu1 %v963_v9, %s1516_s27  ;;  %955 = vrot.lane.b32.xlu0 %v954_v10, %s1517_s28 }
 0x4d7   : > { %966 = vrot.lane.b32.xlu0 %v962_v7, %s1516_s27 }
 0x528   : > { %v958_v27 = vpop.permute.xlu2 %957 }
 0x529   : > { %v971_v28 = vsel %vm644_vm7, %v949_v4, %v958_v27 }
 0x541   : > { %v965_v23 = vpop.permute.xlu1 %964  ;;  %v956_v24 = vpop.permute.xlu0 %955 }
 0x542   : > { %v970_v25 = vsel %vm644_vm7, %v948_v2, %v956_v24  ;;  %v1088_v2 = vld [vmem:[%s2092_s12] sm:$0xff] }
 0x543   : > { %v972_v26 = vsel %vm647_vm8, %v970_v25, %v965_v23  ;;  %1112 = vmatpush.msrb.mxu0 %v1088_v2 }
 0x544   : > { %1410 = vmatmul.msk.f32.vlgmr.msrb.gmra.mxu3 %vm653_vm9, %v972_v26 }
 0x549   : > { %v967_v29 = vpop.permute.xlu0 %966 }
 0x54a   : > { %v973_v30 = vsel %vm647_vm8, %v971_v28, %v967_v29 }
 0x54c   : > { %1411 = vmatmul.msk.f32.gmra.mxu3 %vm653_vm9, %v973_v30 }
 0x5c7   : > { %v1000_v32 = vpop.f32.mrf.mxu3 }
 0x5c8   : > { %v1001_v33 = vadd.f32 %v1469_v31, %v1000_v32  ;;  %v1427_v32 = vld [vmem:[%s2091_s11 + $0xb8] sm:$0xff] }
 0x5c9   : > { %1180 = vmatpush.msra.mxu3 %v1427_v32 }
 0x5ca   : > { %v1006_v34 = vmax.f32 %v1001_v33, 0.0  ;;  %v1426_v33 = vld [vmem:[%s2091_s11 + $0xb0] sm:$0xff] }
 0x5cb   : > { %1181 = vmatpush.msra.mxu3 %v1426_v33  ;;  %v1470_v33 = vld [vmem:[%s2094_s14] ss:$0 sm:$0xff] }
 0x5cc   : > { %v1881_v35 = vadd.f32 %v1006_v34, %v926_v59  ;;  %v1015_v59 = vld [vmem:[%s2091_s11 + $0x28] sm:$0xff] }
 0x5cd   : > { %1073 = vmatpush.msra.mxu1 %v1015_v59  ;;  %v1425_v34 = vld [vmem:[%s2091_s11 + $0xa8] sm:$0xff] }
 0x5ce   : > { %v1022_v38 = vmax.f32 %v1881_v35, 0.0  ;;  %1182 = vmatpush.msra.mxu3 %v1425_v34 }
 0x5cf   : > { %v1003_v36 = vpop.f32.mrf.mxu3  ;;  %1074 = vmatpush.msra.mxu1 %v1014_v60 }
 0x5d0   : > { %v1004_v37 = vadd.f32 %v1469_v31, %v1003_v36  ;;  %v1026_v41 = vrot.slane %v1022_v38, 7  ;;  %v1424_v36 = vld [vmem:[%s2091_s11 + $0xa0] sm:$0xff]  ;;  %v1422_v38 = vld [vmem:[%s2091_s11 + $0x90] sm:$0xff] }
 0x5d1   : > { %1075 = vmatpush.msra.mxu1 %v1013_v61  ;;  %1183 = vmatpush.msra.mxu3 %v1424_v36 }
 0x5d2   : > { %v1007_v39 = vmax.f32 %v1004_v37, 0.0  ;;  %v1031_v44 = vsel %vm517_vm0, 0.0, %v1026_v41  ;;  %v1423_v37 = vld [vmem:[%s2091_s11 + $0x98] sm:$0xff] }
 0x5d3   : > { %v1044_v48 = vrot.slane %v1031_v44, 2  ;;  %v1035_v50 = vrot.slane %v1031_v44, 1  ;;  %1076 = vmatpush.msra.mxu1 %v1012_v62  ;;  %1184 = vmatpush.msra.mxu3 %v1423_v37 }
 0x5d4   : > { %v1884_v40 = vadd.f32 %v1007_v39, %v927_v0  ;;  %v1010_v0 = vld [vmem:[%s2091_s11] sm:$0xff]  ;;  %v1421_v39 = vld [vmem:[%s2091_s11 + $0x88] sm:$0xff] }
 0x5d5   : > { %1077 = vmatpush.msra.mxu1 %v1011_v63  ;;  %1185 = vmatpush.msra.mxu3 %v1422_v38 }
 0x5d6   : > { %v1023_v42 = vmax.f32 %v1884_v40, 0.0 }
 0x5d7   : > { %1078 = vmatpush.msra.mxu1 %v1010_v0  ;;  %1186 = vmatpush.msra.mxu3 %v1421_v39 }
 0x5d8   : > { %v1027_v43 = vrot.slane %v1023_v42, 7  ;;  %v1419_v42 = vld [vmem:[%s2091_s11 + $0x78] sm:$0xff] }
 0x5da   : > { %v1028_v45 = vsel %vm517_vm0, %v1026_v41, %v1027_v43  ;;  %v1420_v41 = vld [vmem:[%s2091_s11 + $0x80] sm:$0xff]  ;;  %v1418_v43 = vld [vmem:[%s2091_s11 + $0x70] sm:$0xff] }
 0x5db   : > { %v1032_v46 = vsel %vm706_vm10, %v1028_v45, 0.0  ;;  %1187 = vmatpush.msra.mxu3 %v1420_v41  ;;  %v1416_v45 = vld [vmem:[%s2091_s11 + $0x60] sm:$0xff] }
 0x5dc   : > { %v1036_v47 = vrot.slane %v1032_v46, 1  ;;  %v1045_v49 = vrot.slane %v1032_v46, 2 }
 0x5dd   : > { %1188 = vmatpush.msra.mxu3 %v1419_v42 }
 0x5de   : > { %1040 = vrot.lane.b32.xlu0 %v1036_v47, %s1517_s28  ;;  %v1046_v51 = vsel %vm540_vm2, %v1044_v48, %v1045_v49  ;;  %v1037_v52 = vsel %vm528_vm1, %v1035_v50, %v1036_v47  ;;  %v1430_v47 = vld [vmem:[%s2092_s12 + $0x10] sm:$0xff] }
 0x5df   : > { %1047 = vrot.lane.b32.xlu2 %v1046_v51, %s1516_s27  ;;  %1038 = vrot.lane.b32.xlu1 %v1037_v52, %s1517_s28 }
 0x5e0   : > { %1189 = vmatpush.msra.mxu3 %v1418_v43 }
 0x5e7   : > { %1049 = vrot.lane.b32.xlu1 %v1045_v49, %s1516_s27 }
 0x639   : > { %v1048_v4 = vpop.permute.xlu2 %1047 }
 0x650   : > { %v1041_v7 = vpop.permute.xlu0 %1040 }
 0x651   : > { %v1039_v3 = vpop.permute.xlu1 %1038  ;;  %v1054_v8 = vsel %vm644_vm7, %v1032_v46, %v1041_v7  ;;  %v1431_v46 = vld [vmem:[%s2092_s12 + $0x18] sm:$0xff] }
 0x652   : > { %v1053_v5 = vsel %vm644_vm7, %v1031_v44, %v1039_v3  ;;  %v1417_v44 = vld [vmem:[%s2091_s11 + $0x68] sm:$0xff]  ;;  %1224 = vmatpush.msrb.mxu2 %v1431_v46 }
 0x653   : > { %v1055_v6 = vsel %vm647_vm8, %v1053_v5, %v1048_v4  ;;  %1190 = vmatpush.msra.mxu3 %v1417_v44 }
 0x654   : > { %1412 = vmatmul.msk.f32.vlgmr.msra.gmra.mxu1 %vm653_vm9, %v1055_v6  ;;  %1225 = vmatpush.msrb.mxu2 %v1430_v47 }
 0x655   : > { %1191 = vmatpush.msra.mxu3 %v1416_v45 }
 0x659   : > { %v1050_v9 = vpop.permute.xlu1 %1049 }
 0x65a   : > { %v1056_v10 = vsel %vm647_vm8, %v1054_v8, %v1050_v9 }
 0x65c   : > { %1413 = vmatmul.msk.f32.gmra.mxu1 %vm653_vm9, %v1056_v10 }
 0x6d1   : > { %v1080_v11 = vpop.f32.mrf.mxu1 }
 0x6d2   : > { %v1086_v12 = vmax.f32 %v1080_v11, 0.0 }
 0x6d4   : > { %1414 = vmatmul.msk.f32.vlgmr.msrb.gmra.mxu0 %vm1090_vm15, %v1086_v12 }
 0x6d9   : > { %v1083_v13 = vpop.f32.mrf.mxu1 }
 0x6da   : > { %v1087_v14 = vmax.f32 %v1083_v13, 0.0 }
 0x6dc   : > { %1415 = vmatmul.msk.f32.gmra.mxu0 %vm1090_vm15, %v1087_v14  ;;  %v1249_v14 = vld [vmem:[%s2093_s13 + $0x50] sm:$0xff] }
 0x751   : > { %v1114_v15 = vpop.f32.mrf.mxu0 }
 0x752   : > { %v1947_v16 = vadd.f32 %v1114_v15, %v1881_v35  ;;  %v1248_v15 = vld [vmem:[%s2093_s13 + $0x48] sm:$0xff] }
 0x754   : > { %v1135_v17 = vmax.f32 %v1947_v16, 0.0 }
 0x756   : > { %v1139_v20 = vrot.slane %v1135_v17, 7  ;;  %v1246_v17 = vld [vmem:[%s2093_s13 + $0x38] sm:$0xff] }
 0x758   : > { %v1144_v23 = vsel %vm517_vm0, 0.0, %v1139_v20 }
 0x759   : > { %v1117_v18 = vpop.f32.mrf.mxu0  ;;  %v1157_v27 = vrot.slane %v1144_v23, 2  ;;  %v1148_v29 = vrot.slane %v1144_v23, 1 }
 0x75a   : > { %v1951_v19 = vadd.f32 %v1117_v18, %v1884_v40  ;;  %v1245_v18 = vld [vmem:[%s2093_s13 + $0x30] sm:$0xff] }
 0x75c   : > { %v1136_v21 = vmax.f32 %v1951_v19, 0.0 }
 0x75e   : > { %v1140_v22 = vrot.slane %v1136_v21, 7  ;;  %v1242_v21 = vld [vmem:[%s2093_s13 + $0x18] sm:$0xff] }
 0x760   : > { %v1141_v24 = vsel %vm517_vm0, %v1139_v20, %v1140_v22  ;;  %v1243_v20 = vld [vmem:[%s2093_s13 + $0x20] sm:$0xff]  ;;  %v1241_v22 = vld [vmem:[%s2093_s13 + $0x10] sm:$0xff] }
 0x761   : > { %v1145_v25 = vsel %vm706_vm10, %v1141_v24, 0.0  ;;  %v1239_v24 = vld [vmem:[%s2093_s13] sm:$0xff] }
 0x762   : > { %v1149_v26 = vrot.slane %v1145_v25, 1  ;;  %v1158_v28 = vrot.slane %v1145_v25, 2 }
 0x764   : > { %1153 = vrot.lane.b32.xlu1 %v1149_v26, %s1517_s28  ;;  %v1159_v30 = vsel %vm540_vm2, %v1157_v27, %v1158_v28  ;;  %v1150_v31 = vsel %vm528_vm1, %v1148_v29, %v1149_v26 }
 0x765   : > { %1160 = vrot.lane.b32.xlu0 %v1159_v30, %s1516_s27  ;;  %1151 = vrot.lane.b32.xlu2 %v1150_v31, %s1517_s28 }
 0x76d   : > { %1162 = vrot.lane.b32.xlu2 %v1158_v28, %s1516_s27 }
 0x7bf   : > { %v1152_v48 = vpop.permute.xlu2 %1151 }
 0x7c0   : > { %v1166_v49 = vsel %vm644_vm7, %v1144_v23, %v1152_v48  ;;  %v1240_v23 = vld [vmem:[%s2093_s13 + $0x8] sm:$0xff] }
 0x7c7   : > { %v1163_v54 = vpop.permute.xlu2 %1162 }
 0x7d6   : > { %v1154_v52 = vpop.permute.xlu1 %1153 }
 0x7d7   : > { %v1161_v50 = vpop.permute.xlu0 %1160  ;;  %v1167_v53 = vsel %vm644_vm7, %v1145_v25, %v1154_v52 }
 0x7d8   : > { %v1168_v51 = vsel %vm647_vm8, %v1166_v49, %v1161_v50  ;;  %v1169_v55 = vsel %vm647_vm8, %v1167_v53, %v1163_v54 }
 0x7d9   : > { %1428 = vmatmul.msk.f32.vlgmr.msra.gmra.mxu3 %vm653_vm9, %v1168_v51 }
 0x7e1   : > { %1429 = vmatmul.msk.f32.gmra.mxu3 %vm653_vm9, %v1169_v55 }
 0x85c   : > { %v1193_v56 = vpop.f32.mrf.mxu3 }
 0x85d   : > { %v1199_v57 = vmax.f32 %v1193_v56, 0.0 }
 0x85f   : > { %1432 = vmatmul.msk.f32.vlgmr.msrb.gmra.mxu2 %vm1090_vm15, %v1199_v57 }
 0x864   : > { %v1196_v58 = vpop.f32.mrf.mxu3 }
 0x865   : > { %v1200_v59 = vmax.f32 %v1196_v58, 0.0 }
 0x867   : > { %1433 = vmatmul.msk.f32.gmra.mxu2 %vm1090_vm15, %v1200_v59 }
 0x8e2   : > { %v1227_v60 = vpop.f32.mrf.mxu2 }
 0x8e3   : > { %v1233_v61 = vadd.f32 %v1227_v60, %v1947_v16  ;;  %v1247_v16 = vld [vmem:[%s2093_s13 + $0x40] sm:$0xff] }
 0x8e5   : > { %v1235_v62 = vmax.f32 %v1233_v61, 0.0 }
 0x8e7   : > { %v1237_v63 = vadd.f32 %v1235_v62, %v1881_v35 }
 0x8e9   : > { %v1254_v3 = vrot.slane %v1237_v63, 7 }
 0x8ea   : > { %v1230_v0 = vpop.f32.mrf.mxu2 }
 0x8eb   : > { %v1234_v1 = vadd.f32 %v1230_v0, %v1951_v19  ;;  %v1259_v6 = vsel %vm517_vm0, 0.0, %v1254_v3  ;;  %v1244_v19 = vld [vmem:[%s2093_s13 + $0x28] sm:$0xff] }
 0x8ec   : > { %v1272_v10 = vrot.slane %v1259_v6, 2  ;;  %v1263_v12 = vrot.slane %v1259_v6, 1 }
 0x8ed   : > { %v1236_v2 = vmax.f32 %v1234_v1, 0.0 }
 0x8ef   : > { %v1238_v4 = vadd.f32 %v1236_v2, %v1884_v40  ;;  %v1250_v40 = vld [vmem:[%s2093_s13 + $0x58] sm:$0xff] }
 0x8f0   : > { %1298 = vmatpush.msra.mxu0 %v1250_v40 }
 0x8f1   : > { %v1255_v5 = vrot.slane %v1238_v4, 7 }
 0x8f2   : > { %1299 = vmatpush.msra.mxu0 %v1249_v14 }
 0x8f3   : > { %v1256_v7 = vsel %vm517_vm0, %v1254_v3, %v1255_v5  ;;  %vm1318_vm0 = vcmask 122880  }
 0x8f4   : > { %v1260_v8 = vsel %vm706_vm10, %v1256_v7, 0.0  ;;  %1300 = vmatpush.msra.mxu0 %v1248_v15 }
 0x8f5   : > { %v1264_v9 = vrot.slane %v1260_v8, 1  ;;  %v1273_v11 = vrot.slane %v1260_v8, 2 }
 0x8f6   : > { %1301 = vmatpush.msra.mxu0 %v1247_v16 }
 0x8f7   : > { %1268 = vrot.lane.b32.xlu2 %v1264_v9, %s1517_s28  ;;  %v1274_v35 = vsel %vm540_vm2, %v1272_v10, %v1273_v11  ;;  %v1265_v13 = vsel %vm528_vm1, %v1263_v12, %v1264_v9 }
 0x8f8   : > { %1275 = vrot.lane.b32.xlu1 %v1274_v35, %s1516_s27  ;;  %1266 = vrot.lane.b32.xlu0 %v1265_v13, %s1517_s28 }
 0x8f9   : > { %1302 = vmatpush.msra.mxu0 %v1246_v17 }
 0x8fb   : > { %1303 = vmatpush.msra.mxu0 %v1245_v18 }
 0x8fd   : > { %1304 = vmatpush.msra.mxu0 %v1244_v19 }
 0x8ff   : > { %1305 = vmatpush.msra.mxu0 %v1243_v20 }
 0x900   : > { %1277 = vrot.lane.b32.xlu0 %v1273_v11, %s1516_s27 }
 0x901   : > { %1306 = vmatpush.msra.mxu0 %v1242_v21 }
 0x903   : > { %1307 = vmatpush.msra.mxu0 %v1241_v22 }
 0x905   : > { %1308 = vmatpush.msra.mxu0 %v1240_v23 }
 0x907   : > { %1309 = vmatpush.msra.mxu0 %v1239_v24 }
 0x951   : > { %v1269_v29 = vpop.permute.xlu2 %1268 }
 0x952   : > { %v1282_v30 = vsel %vm644_vm7, %v1260_v8, %v1269_v29 }
 0x96a   : > { %v1276_v25 = vpop.permute.xlu1 %1275  ;;  %v1267_v26 = vpop.permute.xlu0 %1266 }
 0x96b   : > { %v1281_v27 = vsel %vm644_vm7, %v1259_v6, %v1267_v26 }
 0x96c   : > { %v1283_v28 = vsel %vm647_vm8, %v1281_v27, %v1276_v25 }
 0x96d   : > { %1434 = vmatmul.msk.f32.vlgmr.msra.gmra.mxu0 %vm653_vm9, %v1283_v28 }
 0x972   : > { %v1278_v31 = vpop.permute.xlu0 %1277 }
 0x973   : > { %v1284_v32 = vsel %vm647_vm8, %v1282_v30, %v1278_v31 }
 0x975   : > { %1435 = vmatmul.msk.f32.gmra.mxu0 %vm653_vm9, %v1284_v32 }
 0x9ea   : > { %v1311_v34 = vpop.f32.mrf.mxu0 }
 0x9eb   : > { %v1312_v36 = vadd.f32 %v1470_v33, %v1311_v34 }
 0x9ed   : > { %1317 = vst.msk [vmem:[%s509_s23] sm:$0xff] %vm1090_vm15, %v1312_v36 }
 0x9f2   : > { %v1314_v37 = vpop.f32.mrf.mxu0 }
 0x9f3   : > { %v1315_v38 = vadd.f32 %v1470_v33, %v1314_v37 }
 0x9f5   : > { %1319 = vst.msk [vmem:[%s509_s23 + $0x8] sm:$0x1] %vm1318_vm0, %v1315_v38 }
 0x9f6 PF: > { %s26_s18 = sadd.s32 1, %s1511_s18  }
 0x9f7   : > { %p23_p7 = scmp.ge.s32.totalorder %s26_s18, 4  }
 0x9f9   :  { %25 = sbr.rel (!%p23_p7) target bundleno = 1 (0x1), region = 117 }
 0x9fe   :  { %1341 = vsyncpa [#allocation3], 1 }
 0x9ff   :  { %1343 = vsyncpa [#allocation3 + $0x1], 1 }

// kernel: convolutional_vq_vae_forward.5
= control target key start
LH: loop header
LB: loop body
LE: loop exit
PB: predicated region body
PF: predicated region fallthrough
CT: control target
= control target key end

     0   :  { %s1872_s0 = inlined_call_operand.vmem [shape: f32[2,9,16], index: 0, kind: input, shape index: {}]   ;;  %s1873_s1 = inlined_call_operand.vmem [shape: f32[48,32], index: 1, kind: input, shape index: {}]   ;;  %s1874_s2 = inlined_call_operand.vmem [shape: f32[1,32], index: 2, kind: input, shape index: {}]   ;;  %s1875_s3 = inlined_call_operand.vmem [shape: f32[2,96,16], index: 3, kind: input, shape index: {}]   ;;  %s1876_s4 = inlined_call_operand.vmem [shape: f32[2,16,32], index: 4, kind: input, shape index: {}]   ;;  %s1877_s5 = inlined_call_operand.vmem [shape: f32[96,32], index: 5, kind: input, shape index: {}]   ;;  %s1878_s6 = inlined_call_operand.vmem [shape: f32[1,32], index: 6, kind: input, shape index: {}]   ;;  %s1879_s7 = inlined_call_operand.vmem [shape: f32[96,32], index: 7, kind: input, shape index: {}]   ;;  %s1880_s8 = inlined_call_operand.vmem [shape: f32[1,32], index: 8, kind: input, shape index: {}]   ;;  %s1881_s9 = inlined_call_operand.vmem [shape: f32[4,64], index: 9, kind: input, shape index: {}]   ;;  %s1882_s10 = inlined_call_operand.vmem [shape: f32[4,1], index: 10, kind: input, shape index: {}]   ;;  %s1883_s11 = inlined_call_operand.hbm [shape: f32[2,4,16], index: 11, kind: output, shape index: {}]  }
   0x1   :  { %1888 = sst [smem:[#allocation5_spill]] %s1872_s0 }
   0x2   :  { %1889 = sst [smem:[#allocation6_spill]] %s1873_s1 }
   0x3   :  { %16 = vsyncpa [#allocation3], 0 }
   0x4   :  { %18 = vsyncpa [#allocation3 + $0x1], 0  ;;  %s1435_s17 = smov 0   ;;  %s1437_s18 = smov 0  }
   0x5   :  { %s1439_s19 = smov 0   ;;  %s1441_s20 = smov 0  }
   0x6 LB: > { %s1456_s21 = sadd.s32 4294967295, %s1368_s20   ;;  %s1176_s22 = sadd.s32 4294967294, %s1368_s20   ;;  %s1368_s20 = sphi %s1441_s20, %s1899_s20   ;;  %s1364_s19 = sphi %s1439_s19, %s1898_s19   ;;  %s1360_s18 = sphi %s1437_s18, %s1897_s18   ;;  %s1356_s17 = sphi %s1435_s17, %s1896_s17  }
   0x7   : > { %s1460_s23 = sadd.s32 1, %s1368_s20   ;;  %s267_s24 = sadd.s32 1, %s1364_s19 }
   0x8   : > { %s264_s25 = ssub.s32 %s1368_s20, %s1460_s23  ;;  %p277_p0 = scmp.ne.s32.totalorder %s1364_s19, %s1360_s18 }
   0x9   : > { %p265_p1 = scmp.eq.s32.totalorder %s264_s25, 0  ;;  %p278_p2 = scmp.eq.s32.totalorder %s1456_s21, 1 }
   0xa   : > { %p283_p3 = scmp.ne.s32.totalorder %s1360_s18, %s1356_s17  ;;  %p284_p4 = scmp.eq.s32.totalorder %s1176_s22, 1 }
   0xb   : > { %s1471_s26 = scalar_select %p265_p1, %s1364_s19, %s267_s24  }
   0xc   : > { %p1473_p5 = por %p278_p2, %p277_p0  ;;  %p1477_p6 = por %p284_p4, %p283_p3 }
   0xd   : > { %p1179_p7 = scmp.ge.s32.totalorder %s1368_s20, 1  ;;  %p340_p8 = scmp.lt.s32.totalorder %s1368_s20, 3 }
   0xf   : > { %p341_p9 = pnand %p1179_p7, %p340_p8 }
  0x10   : > { %p380_p10 = scmp.lt.s32.totalorder (!%p341_p9), %s1456_s21, 1  ;;  %s1892_s1 = sld [smem:[#allocation6_spill]] (!%p341_p9) }
  0x11   : > { %344 = sbr.rel (%p341_p9) target bundleno = 2032 (0x7f0), region = 64  ;;  %s1893_s0 = sld [smem:[#allocation5_spill]] (!%p341_p9) }
  0x12   : > { %s1370_s22 = smov (!%p341_p9), 16   ;;  %s1884_s24 = smov (!%p341_p9), 32  }
  0x13   : > { %s1894_s14 = smov (!%p341_p9), 32   ;;  %s1886_s15 = smov (!%p341_p9), 64  }
  0x14   : > { %s377_s25 = sand.u32 (!%p341_p9), 1, %s1360_s18   ;;  %s1229_s30 = sshll.u32 (!%p341_p9), %s1456_s21, 2 }
  0x15   : > { %s1180_s29 = sshll.u32 (!%p341_p9), %s377_s25, 2 }
  0x16   : > { %v392_v0 = vld [vmem:[%s1892_s1 + $0x28] sm:$0xff]  ;;  %s381_s12 = scalar_select %p380_p10, %s1456_s21, 1  ;;  %vm396_vm0 = vcmask 1040384   ;;  %vm403_vm1 = vcmask 1041408   ;;  %vm407_vm2 = vcmask 1046528   ;;  %vm417_vm3 = vcmask 1045504  }
  0x17   : > { %453 = vmatpush.msra.mxu0 %v392_v0  ;;  %v391_v14 = vld [vmem:[%s1892_s1 + $0x20] sm:$0xff]  ;;  %v390_v15 = vld [vmem:[%s1892_s1 + $0x18] sm:$0xff]  ;;  %v389_v16 = vld [vmem:[%s1892_s1 + $0x10] sm:$0xff]  ;;  %vm427_vm4 = vcmask 130048   ;;  %vm430_vm5 = vcmask 261120   ;;  %vm436_vm6 = vcmask 392192   ;;  %v466_v27 = vlaneseq }
  0x18   : > { %s1232_s13 = sshll.u32 %s381_s12, 4  ;;  %v388_v17 = vld [vmem:[%s1892_s1 + $0x8] sm:$0xff]  ;;  %v387_v18 = vld [vmem:[%s1892_s1] sm:$0xff]  ;;  %v1372_v38 = vmov 0.0   ;;  %vm489_vm10 = vcmask 72704   ;;  %v539_v44 = vld [vmem:[%s1875_s3 + $0x58] sm:$0xff] }
  0x19   : > { %s384_s16 = scalar_lea.vmem %s1893_s0, %s1232_s13  ;;  %454 = vmatpush.msra.mxu0 %v391_v14  ;;  %v471_v28 = vand.u32 127, %v466_v27  ;;  %v467_v31 = vshrl.u32 %v466_v27, 7  ;;  %v1303_v33 = vld [vmem:[%s1874_s2] ss:$0 sm:$0xff]  ;;  %v538_v45 = vld [vmem:[%s1875_s3 + $0x50] sm:$0xff]  ;;  %608 = vmatpush.msra.mxu2 %v539_v44  ;;  %v537_v47 = vld [vmem:[%s1875_s3 + $0x48] sm:$0xff]  ;;  %s1112_s0 = scalar_lea.hbm %s1883_s11, %s1229_s30 }
  0x1a   : > { %v385_v1 = vld [vmem:[%s384_s16] sm:$0xff]  ;;  %v386_v2 = vld [vmem:[%s384_s16 + $0x8] sm:$0x1]  ;;  %v535_v51 = vld [vmem:[%s1875_s3 + $0x38] sm:$0xff]  ;;  %s1116_s1 = sshll.u32 %s1112_s0, 4  ;;  %s1117_s1 = int_to_ptr.hbm [resolvable:$true] %s1116_s1 }
  0x1b   : > { %v397_v3 = vrot.slane %v385_v1, 7  ;;  %v398_v4 = vrot.slane %v386_v2, 7  ;;  %455 = vmatpush.msra.mxu0 %v390_v15  ;;  %v472_v29 = vmul.u32 2, %v471_v28  ;;  %v468_v36 = vadd.s32 8, %v467_v31  ;;  %609 = vmatpush.msra.mxu2 %v538_v45  ;;  %v536_v48 = vld [vmem:[%s1875_s3 + $0x40] sm:$0xff]  ;;  %v534_v53 = vld [vmem:[%s1875_s3 + $0x30] sm:$0xff] }
  0x1c   : > { %v469_v40 = vadd.s32 16, %v467_v31  ;;  %v533_v56 = vld [vmem:[%s1875_s3 + $0x28] sm:$0xff]  ;;  %v633_v27 = vld [vmem:[%s1876_s4] sm:$0xff] }
  0x1d   : > { %v399_v5 = vsel %vm396_vm0, %v397_v3, %v398_v4  ;;  %v402_v6 = vsel %vm396_vm0, 0.0, %v397_v3  ;;  %456 = vmatpush.msra.mxu0 %v389_v16  ;;  %v476_v32 = vadd.s32 1, %v472_v29  ;;  %vm473_vm7 = vcmp.eq.s32.totalorder %v467_v31, %v472_v29  ;;  %610 = vmatpush.msra.mxu2 %v537_v47 }
  0x1e   : > { %v404_v7 = vsel %vm403_vm1, %v399_v5, 0.0  ;;  %v408_v8 = vrot.slane %v402_v6, 1  ;;  %v418_v11 = vrot.slane %v402_v6, 2  ;;  %vm474_vm11 = vcmp.eq.s32.totalorder %v468_v36, %v472_v29 }
  0x1f   : > { %v409_v9 = vrot.slane %v404_v7, 1  ;;  %v419_v12 = vrot.slane %v404_v7, 2  ;;  %457 = vmatpush.msra.mxu0 %v388_v17  ;;  %vm477_vm8 = vcmp.eq.s32.totalorder %v467_v31, %v476_v32  ;;  %vm478_vm12 = vcmp.eq.s32.totalorder %v468_v36, %v476_v32  ;;  %611 = vmatpush.msra.mxu2 %v536_v48 }
  0x20   : > { %vm480_vm9 = vmor %vm473_vm7, %vm477_vm8  ;;  %vm475_vm14 = vcmp.eq.s32.totalorder %v469_v40, %v472_v29  ;;  %vm479_vm15 = vcmp.eq.s32.totalorder %v469_v40, %v476_v32  ;;  %vm555_vm7 = vcmask 1042432   ;;  %vm590_vm8 = vcmask 523264  }
  0x21   : > { %v410_v10 = vsel %vm407_vm2, %v408_v8, %v409_v9  ;;  %413 = vrot.lane.b32.xlu1 %v409_v9, %s1370_s22  ;;  %v420_v13 = vsel %vm417_vm3, %v418_v11, %v419_v12  ;;  %458 = vmatpush.msra.mxu0 %v387_v18  ;;  %v1185_v39 = vsel %vm480_vm9, 1.0, %v1372_v38  ;;  %vm481_vm13 = vmor %vm474_vm11, %vm478_vm12  ;;  %v532_v9 = vld [vmem:[%s1875_s3 + $0x20] sm:$0xff]  ;;  %v530_v11 = vld [vmem:[%s1875_s3 + $0x10] sm:$0xff]  ;;  %vm594_vm9 = vcmask 785408  }
  0x22   : > { %411 = vrot.lane.b32.xlu0 %v410_v10, %s1370_s22  ;;  %v1186_v41 = vsel %vm481_vm13, 1.0, %v1372_v38  ;;  %612 = vmatpush.msra.mxu2 %v535_v51  ;;  %v531_v10 = vld [vmem:[%s1875_s3 + $0x18] sm:$0xff]  ;;  %s1102_s22 = scalar_lea.sflag [#allocation3], %s377_s25 }
  0x24   : > { %613 = vmatpush.msra.mxu2 %v534_v53 }
  0x26   : > { %614 = vmatpush.msra.mxu2 %v533_v56 }
  0x28   : > { %615 = vmatpush.msra.mxu2 %v532_v9 }
  0x29   : > { %423 = vrot.lane.b32.xlu1 %v419_v12, %s1884_s24  ;;  %v529_v12 = vld [vmem:[%s1875_s3 + $0x8] sm:$0xff] }
  0x2a   : > { %421 = vrot.lane.b32.xlu0 %v420_v13, %s1884_s24  ;;  %616 = vmatpush.msra.mxu2 %v531_v10  ;;  %v528_v13 = vld [vmem:[%s1875_s3] sm:$0xff]  ;;  %s1895_s24 = smov 64  }
  0x2c   : > { %617 = vmatpush.msra.mxu2 %v530_v11 }
  0x2e   : > { %618 = vmatpush.msra.mxu2 %v529_v12 }
  0x30   : > { %619 = vmatpush.msra.mxu2 %v528_v13 }
  0x93   : > { %v414_v20 = vpop.permute.xlu1 %413 }
  0x94   : > { %v412_v19 = vpop.permute.xlu0 %411  ;;  %v429_v24 = vsel %vm427_vm4, %v404_v7, %v414_v20 }
  0x95   : > { %v428_v21 = vsel %vm427_vm4, %v402_v6, %v412_v19 }
  0x9b   : > { %v424_v25 = vpop.permute.xlu1 %423 }
  0x9c   : > { %v422_v22 = vpop.permute.xlu0 %421  ;;  %v432_v26 = vsel %vm430_vm5, %v429_v24, %v424_v25 }
  0x9d   : > { %v431_v23 = vsel %vm430_vm5, %v428_v21, %v422_v22 }
  0x9e   : > { %1183 = vmatmul.msk.f32.vlgmr.msra.gmra.mxu0 %vm436_vm6, %v431_v23 }
  0xa6   : > { %1184 = vmatmul.msk.f32.gmra.mxu0 %vm436_vm6, %v432_v26  ;;  %vm482_vm6 = vmor %vm475_vm14, %vm479_vm15  ;;  %v634_v26 = vld [vmem:[%s1876_s4 + $0x8] sm:$0xff] }
  0xa7   : > { %v1187_v42 = vsel %vm482_vm6, 1.0, %v1372_v38  ;;  %658 = vmatpush.msra.mxu3 %v634_v26 }
  0xa9   : > { %659 = vmatpush.msra.mxu3 %v633_v27 }
 0x11b   : > { %v460_v30 = vpop.f32.mrf.mxu0 }
 0x11c   : > { %v461_v37 = vadd.f32 %v1303_v33, %v460_v30 }
 0x123   : > { %v463_v34 = vpop.f32.mrf.mxu0 }
 0x124   : > { %v464_v35 = vadd.f32 %v1303_v33, %v463_v34 }
 0x126   : > { %1188 = vmatpush.msk.msra.mxu1 %vm396_vm0, %v464_v35 }
 0x128   : > { %517 = vmatpush.msra.mxu1 %v461_v37 }
 0x129   : > { %1189 = vmatmul.msk.f32.vlgmr.msra.gmra.mxu1 %vm489_vm10, %v1185_v39 }
 0x131   : > { %1190 = vmatmul.msk.f32.gmra.mxu1 %vm489_vm10, %v1186_v41 }
 0x139   : > { %1191 = vmatmul.msk.f32.gmra.mxu1 %vm489_vm10, %v1187_v42 }
 0x1a6   : > { %v1521_v43 = vpop.f32.mrf.mxu1 }
 0x1a7   : > { %v540_v46 = vmax.f32 %v1521_v43, 0.0 }
 0x1a9   : > { %v546_v49 = vrot.slane %v540_v46, 7 }
 0x1ab   : > { %v554_v54 = vsel %vm396_vm0, 0.0, %v546_v49 }
 0x1ac   : > { %v559_v58 = vrot.slane %v554_v54, 1  ;;  %v573_v3 = vrot.slane %v554_v54, 2 }
 0x1ae   : > { %v1536_v50 = vpop.f32.mrf.mxu1 }
 0x1af   : > { %v541_v52 = vmax.f32 %v1536_v50, 0.0 }
 0x1b1   : > { %v547_v55 = vrot.slane %v541_v52, 7 }
 0x1b3   : > { %v548_v57 = vsel %vm396_vm0, %v546_v49, %v547_v55 }
 0x1b4   : > { %v560_v59 = vrot.slane %v548_v57, 1  ;;  %v574_v0 = vrot.slane %v548_v57, 2 }
 0x1b6   : > { %v1550_v60 = vpop.f32.mrf.mxu1  ;;  %v561_v61 = vsel %vm407_vm2, %v559_v58, %v560_v59  ;;  %v575_v6 = vsel %vm417_vm3, %v573_v3, %v574_v0  ;;  %v1202_v3 = vld [vmem:[%s1875_s3 + $0x80] sm:$0xff] }
 0x1b7   : > { %v542_v62 = vmax.f32 %v1550_v60, 0.0  ;;  %564 = vrot.lane.b32.xlu2 %v561_v61, %s1894_s14  ;;  %v1208_v61 = vld [vmem:[%s1875_s3 + $0xb0] sm:$0xff] }
 0x1b9   : > { %v549_v63 = vrot.slane %v542_v62, 7  ;;  %v1207_v62 = vld [vmem:[%s1875_s3 + $0xa8] sm:$0xff] }
 0x1bb   : > { %v550_v1 = vsel %vm396_vm0, %v547_v55, %v549_v63  ;;  %v1206_v63 = vld [vmem:[%s1875_s3 + $0xa0] sm:$0xff] }
 0x1bc   : > { %v556_v2 = vsel %vm555_vm7, %v550_v1, 0.0  ;;  %v1204_v1 = vld [vmem:[%s1875_s3 + $0x90] sm:$0xff] }
 0x1bd   : > { %v576_v4 = vrot.slane %v556_v2, 2  ;;  %v562_v5 = vrot.slane %v556_v2, 1 }
 0x1bf   : > { %578 = vrot.lane.b32.xlu2 %v575_v6, %s1886_s15  ;;  %v577_v7 = vsel %vm417_vm3, %v574_v0, %v576_v4  ;;  %v563_v8 = vsel %vm407_vm2, %v560_v59, %v562_v5  ;;  %v1205_v0 = vld [vmem:[%s1875_s3 + $0x98] sm:$0xff]  ;;  %v1199_v6 = vld [vmem:[%s1875_s3 + $0x68] sm:$0xff] }
 0x1c0   : > { %580 = vrot.lane.b32.xlu1 %v577_v7, %s1886_s15  ;;  %566 = vrot.lane.b32.xlu0 %v563_v8, %s1894_s14  ;;  %v1198_v7 = vld [vmem:[%s1875_s3 + $0x60] sm:$0xff] }
 0x1c7   : > { %568 = vrot.lane.b32.xlu2 %v562_v5, %s1894_s14  ;;  %v1200_v5 = vld [vmem:[%s1875_s3 + $0x70] sm:$0xff] }
 0x1c8   : > { %582 = vrot.lane.b32.xlu0 %v576_v4, %s1886_s15  ;;  %v1201_v4 = vld [vmem:[%s1875_s3 + $0x78] sm:$0xff]  ;;  %s379_s15 = scalar_lea.vmem [#allocation2], %s1180_s29  ;;  %s1326_s29 = scalar_lea.hbm %s1883_s11, 8 }
 0x1c9   : > { %s1114_s16 = sshll.u32 %s379_s15, 4  ;;  %s1115_s16 = int_to_ptr.vmem [resolvable:$true] %s1114_s16 }
 0x211   : > { %v565_v14 = vpop.permute.xlu2 %564 }
 0x212   : > { %v587_v15 = vsel %vm430_vm5, %v554_v54, %v565_v14 }
 0x219   : > { %v579_v16 = vpop.permute.xlu2 %578 }
 0x21a   : > { %v591_v17 = vsel %vm590_vm8, %v587_v15, %v579_v16 }
 0x21b   : > { %1192 = vmatmul.msk.f32.vlgmr.msra.gmra.mxu2 %vm594_vm9, %v591_v17 }
 0x221   : > { %v569_v22 = vpop.permute.xlu2 %568 }
 0x222   : > { %v589_v23 = vsel %vm430_vm5, %v556_v2, %v569_v22  ;;  %v1203_v2 = vld [vmem:[%s1875_s3 + $0x88] sm:$0xff] }
 0x232   : > { %v581_v18 = vpop.permute.xlu1 %580  ;;  %v567_v19 = vpop.permute.xlu0 %566 }
 0x233   : > { %v588_v20 = vsel %vm430_vm5, %v548_v57, %v567_v19 }
 0x234   : > { %v592_v21 = vsel %vm590_vm8, %v588_v20, %v581_v18  ;;  %v1214_v20 = vld [vmem:[%s1876_s4 + $0x18] sm:$0xff] }
 0x235   : > { %1193 = vmatmul.msk.f32.gmra.mxu2 %vm594_vm9, %v592_v21  ;;  %802 = vmatpush.msrb.mxu0 %v1214_v20  ;;  %v1213_v21 = vld [vmem:[%s1876_s4 + $0x10] sm:$0xff] }
 0x237   : > { %803 = vmatpush.msrb.mxu0 %v1213_v21 }
 0x23a   : > { %v583_v24 = vpop.permute.xlu0 %582 }
 0x23b   : > { %v593_v25 = vsel %vm590_vm8, %v589_v23, %v583_v24 }
 0x23d   : > { %1194 = vmatmul.msk.f32.gmra.mxu2 %vm594_vm9, %v593_v25 }
 0x29e   : > { %v621_v28 = vpop.f32.mrf.mxu2 }
 0x29f   : > { %v630_v29 = vmax.f32 %v621_v28, 0.0 }
 0x2a1   : > { %1195 = vmatmul.msk.f32.vlgmr.msra.gmra.mxu3 %vm427_vm4, %v630_v29 }
 0x2b8   : > { %v624_v30 = vpop.f32.mrf.mxu2 }
 0x2b9   : > { %v631_v31 = vmax.f32 %v624_v30, 0.0 }
 0x2bb   : > { %1196 = vmatmul.msk.f32.gmra.mxu3 %vm427_vm4, %v631_v31 }
 0x2c0   : > { %v627_v32 = vpop.f32.mrf.mxu2 }
 0x2c1   : > { %v632_v33 = vmax.f32 %v627_v32, 0.0 }
 0x2c3   : > { %1197 = vmatmul.msk.f32.gmra.mxu3 %vm427_vm4, %v632_v33 }
 0x324   : > { %v661_v34 = vpop.f32.mrf.mxu3 }
 0x325   : > { %v1599_v35 = vadd.f32 %v661_v34, %v1521_v43 }
 0x327   : > { %v686_v36 = vmax.f32 %v1599_v35, 0.0 }
 0x329   : > { %v692_v38 = vrot.slane %v686_v36, 7 }
 0x32b   : > { %v700_v41 = vsel %vm396_vm0, 0.0, %v692_v38 }
 0x32c   : > { %v718_v46 = vrot.slane %v700_v41, 2  ;;  %v704_v48 = vrot.slane %v700_v41, 1 }
 0x33e   : > { %v664_v37 = vpop.f32.mrf.mxu3 }
 0x33f   : > { %v1603_v39 = vadd.f32 %v664_v37, %v1536_v50 }
 0x341   : > { %v687_v40 = vmax.f32 %v1603_v39, 0.0 }
 0x343   : > { %v693_v42 = vrot.slane %v687_v40, 7 }
 0x345   : > { %v694_v44 = vsel %vm396_vm0, %v692_v38, %v693_v42 }
 0x346   : > { %v667_v45 = vpop.f32.mrf.mxu3  ;;  %v719_v47 = vrot.slane %v694_v44, 2  ;;  %v705_v43 = vrot.slane %v694_v44, 1 }
 0x347   : > { %v1609_v49 = vadd.f32 %v667_v45, %v1550_v60  ;;  %v1209_v60 = vld [vmem:[%s1875_s3 + $0xb8] sm:$0xff] }
 0x348   : > { %v720_v51 = vsel %vm417_vm3, %v718_v46, %v719_v47  ;;  %v706_v50 = vsel %vm407_vm2, %v704_v48, %v705_v43  ;;  %751 = vmatpush.msrb.mxu1 %v1209_v60  ;;  %v825_v60 = vld [vmem:[%s1877_s5 + $0x28] sm:$0xff] }
 0x349   : > { %v688_v52 = vmax.f32 %v1609_v49, 0.0  ;;  %723 = vrot.lane.b32.xlu2 %v720_v51, %s1895_s24  ;;  %709 = vrot.lane.b32.xlu1 %v706_v50, %s1894_s14 }
 0x34a   : > { %752 = vmatpush.msrb.mxu1 %v1208_v61  ;;  %v824_v61 = vld [vmem:[%s1877_s5 + $0x20] sm:$0xff] }
 0x34b   : > { %v695_v53 = vrot.slane %v688_v52, 7 }
 0x34c   : > { %753 = vmatpush.msrb.mxu1 %v1207_v62  ;;  %v823_v62 = vld [vmem:[%s1877_s5 + $0x18] sm:$0xff] }
 0x34d   : > { %v696_v54 = vsel %vm396_vm0, %v693_v42, %v695_v53 }
 0x34e   : > { %v701_v55 = vsel %vm555_vm7, %v696_v54, 0.0  ;;  %754 = vmatpush.msrb.mxu1 %v1206_v63  ;;  %v831_v54 = vld [vmem:[%s1877_s5 + $0x58] sm:$0xff]  ;;  %v822_v63 = vld [vmem:[%s1877_s5 + $0x10] sm:$0xff] }
 0x34f   : > { %v707_v56 = vrot.slane %v701_v55, 1  ;;  %v721_v57 = vrot.slane %v701_v55, 2  ;;  %898 = vmatpush.msrb.mxu3 %v831_v54 }
 0x350   : > { %755 = vmatpush.msrb.mxu1 %v1205_v0  ;;  %v821_v0 = vld [vmem:[%s1877_s5 + $0x8] sm:$0xff] }
 0x351   : > { %713 = vrot.lane.b32.xlu2 %v707_v56, %s1894_s14  ;;  %v722_v58 = vsel %vm417_vm3, %v719_v47, %v721_v57  ;;  %v708_v59 = vsel %vm407_vm2, %v705_v43, %v707_v56  ;;  %v829_v56 = vld [vmem:[%s1877_s5 + $0x48] sm:$0xff] }
 0x352   : > { %725 = vrot.lane.b32.xlu1 %v722_v58, %s1895_s24  ;;  %711 = vrot.lane.b32.xlu0 %v708_v59, %s1894_s14  ;;  %v827_v58 = vld [vmem:[%s1877_s5 + $0x38] sm:$0xff]  ;;  %v826_v59 = vld [vmem:[%s1877_s5 + $0x30] sm:$0xff] }
 0x353   : > { %756 = vmatpush.msrb.mxu1 %v1204_v1  ;;  %v820_v1 = vld [vmem:[%s1877_s5] sm:$0xff] }
 0x355   : > { %757 = vmatpush.msrb.mxu1 %v1203_v2 }
 0x357   : > { %758 = vmatpush.msrb.mxu1 %v1202_v3 }
 0x359   : > { %759 = vmatpush.msrb.mxu1 %v1201_v4 }
 0x35a   : > { %727 = vrot.lane.b32.xlu0 %v721_v57, %s1895_s24  ;;  %v828_v57 = vld [vmem:[%s1877_s5 + $0x40] sm:$0xff] }
 0x35b   : > { %760 = vmatpush.msrb.mxu1 %v1200_v5 }
 0x35d   : > { %761 = vmatpush.msrb.mxu1 %v1199_v6 }
 0x35f   : > { %762 = vmatpush.msrb.mxu1 %v1198_v7 }
 0x3a3   : > { %v724_v9 = vpop.permute.xlu2 %723 }
 0x3ab   : > { %v714_v16 = vpop.permute.xlu2 %713 }
 0x3ac   : > { %v734_v17 = vsel %vm430_vm5, %v701_v55, %v714_v16  ;;  %v830_v55 = vld [vmem:[%s1877_s5 + $0x50] sm:$0xff] }
 0x3ad   : > { %899 = vmatpush.msrb.mxu3 %v830_v55 }
 0x3af   : > { %900 = vmatpush.msrb.mxu3 %v829_v56 }
 0x3b1   : > { %901 = vmatpush.msrb.mxu3 %v828_v57 }
 0x3b3   : > { %902 = vmatpush.msrb.mxu3 %v827_v58 }
 0x3b5   : > { %903 = vmatpush.msrb.mxu3 %v826_v59 }
 0x3b7   : > { %904 = vmatpush.msrb.mxu3 %v825_v60 }
 0x3b9   : > { %905 = vmatpush.msrb.mxu3 %v824_v61 }
 0x3bb   : > { %v710_v8 = vpop.permute.xlu1 %709  ;;  %906 = vmatpush.msrb.mxu3 %v823_v62 }
 0x3bc   : > { %v732_v10 = vsel %vm430_vm5, %v700_v41, %v710_v8 }
 0x3bd   : > { %v735_v11 = vsel %vm590_vm8, %v732_v10, %v724_v9  ;;  %907 = vmatpush.msrb.mxu3 %v822_v63 }
 0x3be   : > { %1210 = vmatmul.msk.f32.vlgmr.msrb.gmra.mxu1 %vm594_vm9, %v735_v11 }
 0x3bf   : > { %908 = vmatpush.msrb.mxu3 %v821_v0 }
 0x3c1   : > { %909 = vmatpush.msrb.mxu3 %v820_v1  ;;  %v1305_v1 = vld [vmem:[%s1880_s8] ss:$0 sm:$0xff] }
 0x3c4   : > { %v726_v12 = vpop.permute.xlu1 %725  ;;  %v712_v13 = vpop.permute.xlu0 %711 }
 0x3c5   : > { %v733_v14 = vsel %vm430_vm5, %v694_v44, %v712_v13 }
 0x3c6   : > { %v736_v15 = vsel %vm590_vm8, %v733_v14, %v726_v12 }
 0x3c7   : > { %1211 = vmatmul.msk.f32.gmra.mxu1 %vm594_vm9, %v736_v15  ;;  %v1304_v15 = vld [vmem:[%s1878_s6] ss:$0 sm:$0xff] }
 0x3cc   : > { %v728_v18 = vpop.permute.xlu0 %727 }
 0x3cd   : > { %v737_v19 = vsel %vm590_vm8, %v734_v17, %v728_v18 }
 0x3cf   : > { %1212 = vmatmul.msk.f32.gmra.mxu1 %vm594_vm9, %v737_v19 }
 0x43b   : > { %v764_v22 = vpop.f32.mrf.mxu1 }
 0x43c   : > { %v773_v23 = vmax.f32 %v764_v22, 0.0 }
 0x43e   : > { %1215 = vmatmul.msk.f32.vlgmr.msrb.gmra.mxu0 %vm427_vm4, %v773_v23 }
 0x444   : > { %v767_v24 = vpop.f32.mrf.mxu1 }
 0x445   : > { %v774_v25 = vmax.f32 %v767_v24, 0.0 }
 0x447   : > { %1216 = vmatmul.msk.f32.gmra.mxu0 %vm427_vm4, %v774_v25 }
 0x44c   : > { %v770_v26 = vpop.f32.mrf.mxu1 }
 0x44d   : > { %v775_v27 = vmax.f32 %v770_v26, 0.0 }
 0x44f   : > { %1217 = vmatmul.msk.f32.gmra.mxu0 %vm427_vm4, %v775_v27  ;;  %vm948_vm4 = vcmask 1043456  }
 0x4bb   : > { %v805_v28 = vpop.f32.mrf.mxu0 }
 0x4bc   : > { %v814_v29 = vadd.f32 %v805_v28, %v1599_v35 }
 0x4be   : > { %v817_v30 = vmax.f32 %v814_v29, 0.0 }
 0x4c0   : > { %v836_v32 = vrot.slane %v817_v30, 7 }
 0x4c2   : > { %v844_v36 = vsel %vm396_vm0, 0.0, %v836_v32 }
 0x4c3   : > { %v848_v40 = vrot.slane %v844_v36, 1  ;;  %v862_v41 = vrot.slane %v844_v36, 2 }
 0x4c4   : > { %v808_v31 = vpop.f32.mrf.mxu0 }
 0x4c5   : > { %v815_v33 = vadd.f32 %v808_v31, %v1603_v39 }
 0x4c7   : > { %v818_v34 = vmax.f32 %v815_v33, 0.0 }
 0x4c9   : > { %v837_v37 = vrot.slane %v818_v34, 7 }
 0x4cb   : > { %v838_v38 = vsel %vm396_vm0, %v836_v32, %v837_v37 }
 0x4cc   : > { %v811_v42 = vpop.f32.mrf.mxu0  ;;  %v863_v44 = vrot.slane %v838_v38, 2  ;;  %v849_v45 = vrot.slane %v838_v38, 1 }
 0x4cd   : > { %v816_v46 = vadd.f32 %v811_v42, %v1609_v49 }
 0x4ce   : > { %v864_v35 = vsel %vm417_vm3, %v862_v41, %v863_v44  ;;  %v850_v47 = vsel %vm407_vm2, %v848_v40, %v849_v45 }
 0x4cf   : > { %v819_v48 = vmax.f32 %v816_v46, 0.0  ;;  %867 = vrot.lane.b32.xlu2 %v864_v35, %s1895_s24  ;;  %853 = vrot.lane.b32.xlu1 %v850_v47, %s1894_s14  ;;  %v932_v46 = vld [vmem:[%s1879_s7 + $0x48] sm:$0xff]  ;;  %v931_v35 = vld [vmem:[%s1879_s7 + $0x40] sm:$0xff] }
 0x4d0   : > { %v930_v47 = vld [vmem:[%s1879_s7 + $0x38] sm:$0xff] }
 0x4d1   : > { %v839_v39 = vrot.slane %v819_v48, 7  ;;  %v929_v48 = vld [vmem:[%s1879_s7 + $0x30] sm:$0xff] }
 0x4d3   : > { %v840_v43 = vsel %vm396_vm0, %v837_v37, %v839_v39  ;;  %v928_v39 = vld [vmem:[%s1879_s7 + $0x28] sm:$0xff] }
 0x4d4   : > { %v845_v51 = vsel %vm555_vm7, %v840_v43, 0.0  ;;  %v927_v43 = vld [vmem:[%s1879_s7 + $0x20] sm:$0xff] }
 0x4d5   : > { %v851_v50 = vrot.slane %v845_v51, 1  ;;  %v865_v52 = vrot.slane %v845_v51, 2 }
 0x4d7   : > { %857 = vrot.lane.b32.xlu2 %v851_v50, %s1894_s14  ;;  %v866_v49 = vsel %vm417_vm3, %v863_v44, %v865_v52  ;;  %v852_v53 = vsel %vm407_vm2, %v849_v45, %v851_v50  ;;  %v934_v44 = vld [vmem:[%s1879_s7 + $0x58] sm:$0xff]  ;;  %v933_v45 = vld [vmem:[%s1879_s7 + $0x50] sm:$0xff] }
 0x4d8   : > { %869 = vrot.lane.b32.xlu1 %v866_v49, %s1895_s24  ;;  %855 = vrot.lane.b32.xlu0 %v852_v53, %s1894_s14  ;;  %v925_v50 = vld [vmem:[%s1879_s7 + $0x10] sm:$0xff]  ;;  %v923_v49 = vld [vmem:[%s1879_s7] sm:$0xff] }
 0x4d9   : > { %1233 = vmatpush.msrb.mxu2 %v934_v44  ;;  %1002 = vmatpush.msra.mxu1 %v934_v44 }
 0x4da   : > { %1234 = vmatpush.msra.mxu3 %v934_v44 }
 0x4db   : > { %1235 = vmatpush.msrb.mxu2 %v933_v45  ;;  %1003 = vmatpush.msra.mxu1 %v933_v45 }
 0x4dc   : > { %1236 = vmatpush.msra.mxu3 %v933_v45 }
 0x4dd   : > { %1237 = vmatpush.msrb.mxu2 %v932_v46  ;;  %1004 = vmatpush.msra.mxu1 %v932_v46 }
 0x4de   : > { %1238 = vmatpush.msra.mxu3 %v932_v46 }
 0x4df   : > { %1239 = vmatpush.msrb.mxu2 %v931_v35  ;;  %1005 = vmatpush.msra.mxu1 %v931_v35 }
 0x4e0   : > { %871 = vrot.lane.b32.xlu0 %v865_v52, %s1895_s24  ;;  %1240 = vmatpush.msra.mxu3 %v931_v35  ;;  %v924_v52 = vld [vmem:[%s1879_s7 + $0x8] sm:$0xff] }
 0x4e1   : > { %1241 = vmatpush.msrb.mxu2 %v930_v47  ;;  %1006 = vmatpush.msra.mxu1 %v930_v47 }
 0x4e2   : > { %1242 = vmatpush.msra.mxu3 %v930_v47 }
 0x4e3   : > { %1243 = vmatpush.msrb.mxu2 %v929_v48  ;;  %1007 = vmatpush.msra.mxu1 %v929_v48 }
 0x4e4   : > { %1244 = vmatpush.msra.mxu3 %v929_v48 }
 0x4e5   : > { %1245 = vmatpush.msrb.mxu2 %v928_v39  ;;  %1008 = vmatpush.msra.mxu1 %v928_v39 }
 0x4e6   : > { %1246 = vmatpush.msra.mxu3 %v928_v39 }
 0x4e7   : > { %1247 = vmatpush.msrb.mxu2 %v927_v43  ;;  %1009 = vmatpush.msra.mxu1 %v927_v43 }
 0x4e8   : > { %1248 = vmatpush.msra.mxu3 %v927_v43 }
 0x529   : > { %v868_v3 = vpop.permute.xlu2 %867 }
 0x531   : > { %v858_v10 = vpop.permute.xlu2 %857 }
 0x532   : > { %v878_v11 = vsel %vm430_vm5, %v845_v51, %v858_v10  ;;  %v926_v51 = vld [vmem:[%s1879_s7 + $0x18] sm:$0xff] }
 0x533   : > { %1249 = vmatpush.msrb.mxu2 %v926_v51  ;;  %1010 = vmatpush.msra.mxu1 %v926_v51 }
 0x534   : > { %1250 = vmatpush.msra.mxu3 %v926_v51 }
 0x535   : > { %1251 = vmatpush.msrb.mxu2 %v925_v50  ;;  %1011 = vmatpush.msra.mxu1 %v925_v50 }
 0x536   : > { %1252 = vmatpush.msra.mxu3 %v925_v50 }
 0x537   : > { %1253 = vmatpush.msrb.mxu2 %v924_v52  ;;  %1012 = vmatpush.msra.mxu1 %v924_v52 }
 0x538   : > { %1254 = vmatpush.msra.mxu3 %v924_v52 }
 0x539   : > { %1255 = vmatpush.msrb.mxu2 %v923_v49  ;;  %1013 = vmatpush.msra.mxu1 %v923_v49 }
 0x53a   : > { %1256 = vmatpush.msra.mxu3 %v923_v49 }
 0x541   : > { %v854_v2 = vpop.permute.xlu1 %853 }
 0x542   : > { %v876_v4 = vsel %vm430_vm5, %v844_v36, %v854_v2 }
 0x543   : > { %v879_v5 = vsel %vm590_vm8, %v876_v4, %v868_v3 }
 0x544   : > { %1218 = vmatmul.msk.f32.vlgmr.msrb.gmra.mxu3 %vm594_vm9, %v879_v5 }
 0x54a   : > { %v870_v6 = vpop.permute.xlu1 %869  ;;  %v856_v7 = vpop.permute.xlu0 %855 }
 0x54b   : > { %v877_v8 = vsel %vm430_vm5, %v838_v38, %v856_v7 }
 0x54c   : > { %v880_v9 = vsel %vm590_vm8, %v877_v8, %v870_v6 }
 0x54d   : > { %1219 = vmatmul.msk.f32.gmra.mxu3 %vm594_vm9, %v880_v9 }
 0x552   : > { %v872_v12 = vpop.permute.xlu0 %871 }
 0x553   : > { %v881_v13 = vsel %vm590_vm8, %v878_v11, %v872_v12 }
 0x555   : > { %1220 = vmatmul.msk.f32.gmra.mxu3 %vm594_vm9, %v881_v13 }
 0x5c7   : > { %v911_v14 = vpop.f32.mrf.mxu3 }
 0x5c8   : > { %v912_v18 = vadd.f32 %v1304_v15, %v911_v14 }
 0x5ca   : > { %v920_v20 = vmax.f32 %v912_v18, 0.0 }
 0x5cc   : > { %v939_v25 = vrot.slane %v920_v20, 6 }
 0x5ce   : > { %v1759_v37 = vsel %vm403_vm1, 0.0, %v939_v25 }
 0x5cf   : > { %v952_v38 = vrot.slane %v1759_v37, 1  ;;  %v966_v40 = vrot.slane %v1759_v37, 2 }
 0x5d0   : > { %v914_v16 = vpop.f32.mrf.mxu3 }
 0x5d1   : > { %v915_v17 = vadd.f32 %v1304_v15, %v914_v16 }
 0x5d3   : > { %v921_v19 = vmax.f32 %v915_v17, 0.0 }
 0x5d5   : > { %v940_v23 = vrot.slane %v921_v19, 6 }
 0x5d7   : > { %v1744_v27 = vsel %vm403_vm1, %v939_v25, %v940_v23 }
 0x5d8   : > { %v917_v21 = vpop.f32.mrf.mxu3  ;;  %v967_v31 = vrot.slane %v1744_v27, 2  ;;  %v953_v33 = vrot.slane %v1744_v27, 1 }
 0x5d9   : > { %v918_v22 = vadd.f32 %v1304_v15, %v917_v21 }
 0x5da   : > { %v954_v41 = vsel %vm407_vm2, %v952_v38, %v953_v33  ;;  %v968_v42 = vsel %vm417_vm3, %v966_v40, %v967_v31 }
 0x5db   : > { %v922_v24 = vmax.f32 %v918_v22, 0.0 }
 0x5dd   : > { %v942_v26 = vrot.slane %v922_v24, 6  ;;  %v1374_v24 = vmov 0  }
 0x5de   : > { %1301 = vset.pattern.permute.xlu1 %v1374_v24  ;;  %1302 = vset.pattern.permute.xlu0 %v1374_v24 }
 0x5df   : > { %v943_v28 = vsel %vm403_vm1, %v940_v23, %v942_v26  ;;  %vm1039_vm1 = vcmask 1044480   ;;  %v1061_v23 = vld [vmem:[%s1882_s10] sm:$0xf] }
 0x5e0   : > { %v1747_v29 = vsel %vm948_vm4, %v943_v28, 0.0 }
 0x5e1   : > { %v955_v30 = vrot.slane %v1747_v29, 1  ;;  %v969_v32 = vrot.slane %v1747_v29, 2 }
 0x5e3   : > { %961 = vrot.lane.b32.xlu2 %v955_v30, %s1894_s14  ;;  %v970_v34 = vsel %vm417_vm3, %v967_v31, %v969_v32  ;;  %v956_v36 = vsel %vm407_vm2, %v953_v33, %v955_v30  ;;  %v1060_v31 = vld [vmem:[%s1881_s9] sm:$0xf] }
 0x5e4   : > { %973 = vrot.lane.b32.xlu0 %v970_v34, %s1895_s24  ;;  %959 = vrot.lane.b32.xlu1 %v956_v36, %s1894_s14 }
 0x5eb   : > { %957 = vrot.lane.b32.xlu2 %v954_v41, %s1894_s14 }
 0x5ec   : > { %971 = vrot.lane.b32.xlu0 %v968_v42, %s1895_s24  ;;  %975 = vrot.lane.b32.xlu1 %v969_v32, %s1895_s24 }
 0x63d   : > { %v962_v53 = vpop.permute.xlu2 %961 }
 0x63e   : > { %v982_v59 = vsel %vm430_vm5, %v1747_v29, %v962_v53 }
 0x645   : > { %v958_v58 = vpop.permute.xlu2 %957 }
 0x646   : > { %v980_v60 = vsel %vm430_vm5, %v1759_v37, %v958_v58 }
 0x656   : > { %v974_v54 = vpop.permute.xlu0 %973  ;;  %v960_v55 = vpop.permute.xlu1 %959 }
 0x657   : > { %v981_v56 = vsel %vm430_vm5, %v1744_v27, %v960_v55 }
 0x658   : > { %v984_v57 = vsel %vm590_vm8, %v981_v56, %v974_v54 }
 0x659   : > { %1222 = vmatmul.msk.f32.vlgmr.msrb.gmra.mxu2 %vm594_vm9, %v984_v57 }
 0x65e   : > { %v972_v61 = vpop.permute.xlu0 %971  ;;  %v976_v62 = vpop.permute.xlu1 %975 }
 0x65f   : > { %v983_v63 = vsel %vm590_vm8, %v980_v60, %v972_v61  ;;  %v985_v0 = vsel %vm590_vm8, %v982_v59, %v976_v62 }
 0x660   : > { %1221 = vmatmul.msk.f32.vlgmr.msra.gmra.mxu1 %vm594_vm9, %v983_v63  ;;  %1223 = vmatmul.msk.f32.vlgmr.msra.gmra.mxu3 %vm594_vm9, %v985_v0 }
 0x6dc   : > { %v1018_v2 = vpop.f32.mrf.mxu2 }
 0x6dd   : > { %v1019_v3 = vadd.f32 %v1305_v1, %v1018_v2  ;;  %v1015_v4 = vpop.f32.mrf.mxu1 }
 0x6de   : > { %v1016_v5 = vadd.f32 %v1305_v1, %v1015_v4 }
 0x6df   : > { %v1025_v6 = vmax.f32 %v1019_v3, 0.0 }
 0x6e0   : > { %v1024_v7 = vmax.f32 %v1016_v5, 0.0 }
 0x6e1   : > { %v1031_v8 = vrot.slane %v1025_v6, 7 }
 0x6e2   : > { %v1030_v9 = vrot.slane %v1024_v7, 7 }
 0x6e3   : > { %v1021_v10 = vpop.f32.mrf.mxu3 }
 0x6e4   : > { %v1032_v11 = vsel %vm396_vm0, %v1030_v9, %v1031_v8  ;;  %v1038_v12 = vsel %vm396_vm0, 0.0, %v1030_v9  ;;  %v1022_v13 = vadd.f32 %v1305_v1, %v1021_v10 }
 0x6e5   : > { %v1043_v14 = vrot.slane %v1038_v12, 1  ;;  %v1044_v15 = vrot.slane %v1032_v11, 1 }
 0x6e6   : > { %v1026_v16 = vmax.f32 %v1022_v13, 0.0 }
 0x6e7   : > { %v1045_v17 = vsel %vm407_vm2, %v1043_v14, %v1044_v15 }
 0x6e8   : > { %v1033_v18 = vrot.slane %v1026_v16, 7  ;;  %1048 = vrot.lane.b32.xlu0 %v1045_v17, %s1894_s14 }
 0x6ea   : > { %v1034_v19 = vsel %vm396_vm0, %v1031_v8, %v1033_v18  ;;  %vm1099_vm0 = vcmask 125952  }
 0x6eb   : > { %v1040_v20 = vsel %vm1039_vm1, %v1034_v19, 0.0 }
 0x6ec   : > { %v1046_v21 = vrot.slane %v1040_v20, 1 }
 0x6ee   : > { %1052 = vrot.lane.b32.xlu1 %v1046_v21, %s1894_s14  ;;  %v1047_v22 = vsel %vm407_vm2, %v1044_v15, %v1046_v21 }
 0x6ef   : > { %1050 = vrot.lane.b32.xlu2 %v1047_v22, %s1894_s14  ;;  %s1320_s14 = sshra.s32 %s1117_s1, 4  ;;  %s1321_s14 = int_to_ptr.hbm [resolvable:$true] %s1320_s14 }
 0x6f0   : > { %s1322_s24 = scalar_lea.hbm %s1321_s14, 4  ;;  %p1327_p0 = scmp.lt.s32.totalorder %s1321_s14, %s1883_s11 }
 0x6f1   : > { %p1323_p11 = scmp.ne.s32.totalorder %s1321_s14, %s1322_s24  ;;  %p1328_p1 = scmp.lt.s32.totalorder %s1326_s29, %s1322_s24 }
 0x6f3   : > { %p1324_p12 = pnand %p1323_p11, %p1473_p5  ;;  %p1329_p2 = por %p1328_p1, %p1327_p0 }
 0x6f5   : > { %p1325_p13 = pneg %p1324_p12 }
 0x6f6   : > { %1064 = vperm.xlu1 %1301, %v1061_v23  }
 0x6f7   : > { %p1330_p3 = pnand %p1329_p2, %p1325_p13 }
 0x749   : > { %v1051_v27 = vpop.permute.xlu2 %1050 }
 0x74a   : > { %v1058_v28 = vsel %vm430_vm5, %v1032_v11, %v1051_v27 }
 0x75a   : > { %v1049_v29 = vpop.permute.xlu0 %1048 }
 0x75b   : > { %v1057_v30 = vsel %vm430_vm5, %v1038_v12, %v1049_v29 }
 0x760   : > { %v1053_v25 = vpop.permute.xlu1 %1052 }
 0x761   : > { %v1059_v26 = vsel %vm430_vm5, %v1040_v20, %v1053_v25 }
 0x762   : > { %1224 = vmatpush.xpose.msk.msra.mxu0 %vm590_vm8, %v1059_v26 }
 0x766   : > { %1225 = vmatpush.xpose.msk.msra.mxu0 %vm590_vm8, %v1058_v28 }
 0x768   : > { %v1065_v32 = vpop.permute.xlu1 %1064 }
 0x76a   : > { %1226 = vmatpush.xpose.msk.msra.mxu0 %vm590_vm8, %v1057_v30 }
 0x76d   : > { %1227 = vmatmul.msk.f32.vlgmr.msra.gmra.mxu0 %vm590_vm8, %v1060_v31 }
 0x7ea   : > { %v1096_v33 = vpop.f32.mrf.mxu0 }
 0x7eb   : > { %v1097_v34 = vadd.f32 %v1096_v33, %v1065_v32 }
 0x7ed   : > { %1100 = vst.msk [vmem:[%s379_s15] sm:$0xf] %vm1099_vm0, %v1097_v34 }
 0x7ee   : > { %1333 = shalt.err (!%p1330_p3)
}
 0x7ef   : > { %1257 = dma.vmem_to_hbm [thread:$0]  (%p1473_p5), %s1115_s16, 64, %s1117_s1, %s1102_s22  }
 0x7f0 PF: > { %p1263_p4 = scmp.ge.s32.totalorder %s1368_s20, 2  ;;  %s1128_s25 = sand.u32 1, %s1356_s17  }
 0x7f1   : > { %s1129_s0 = scalar_lea.sflag [#allocation3], %s1128_s25 }
 0x7f2   : > { %p1260_p7 = pnand %p1263_p4, %p1477_p6 }
 0x7f4   : > { %p1261_p8 = pneg %p1260_p7 }
 0x7f6   : > { %1351 = dma.done.wait (%p1261_p8), %s1129_s0, 64  }
 0x7f7   : > { %1353 = vsyncadd (%p1261_p8), %s1129_s0, 4294967232  ;;  %p21_p9 = scmp.ge.s32.totalorder %s1460_s23, 4   ;;  %s1896_s17 = smov %s1360_s18 }
 0x7f8   : > { %s1897_s18 = smov %s1364_s19  ;;  %s1898_s19 = smov %s1471_s26 }
 0x7f9   : > { %s1899_s20 = smov %s1460_s23  ;;  %23 = sbr.rel (!%p21_p9) target bundleno = 6 (0x6), region = 101 }
 0x7fe   :  { %1135 = vsyncpa [#allocation3], 1 }
 0x7ff   :  { %1137 = vsyncpa [#allocation3 + $0x1], 1 }

</bundles_post_ra>
